<compile_context>
chip_gen: v6e
topology: v6e:2x2x1
jax: 0.10.0
libtpu: 0.0.40
codegen_flags: <defaults>
</compile_context>

<pallas_src>
import math
from functools import partial

import jax
import jax.numpy as jnp
from jax.experimental import pallas as pl
from jax.experimental.pallas import tpu as pltpu

NUM_SHIFTS = 8  # KShiftEmbedding num_shifts


def _layer_norm(x, g, b, eps=1e-5):
    mu = jnp.mean(x, axis=-1, keepdims=True)
    var = jnp.mean((x - mu) ** 2, axis=-1, keepdims=True)
    return (x - mu) * jax.lax.rsqrt(var + eps) * g + b


# --------------------------------------------------------------------------
# Kernel 1 (fused): KShiftEmbedding tail (sum 8 gathered rows -> L2 normalize)
#   + type/pos embedding add + all TransformerEncoder layers (post-norm, ReLU,
#   causal mask, eval-mode dropout = identity).
# --------------------------------------------------------------------------
def gemma2_fused_kernel(rows_ref, type_ref, pos_ref,
                        wq_ref, wk_ref, wv_ref, bq_ref, bk_ref, bv_ref,
                        wo_ref, bo_ref, ln1_g_ref, ln1_b_ref,
                        w1_ref, b1_ref, w2_ref, b2_ref, ln2_g_ref, ln2_b_ref,
                        out_ref, *, batch, seq, num_heads, n_layers):
    n = batch * seq
    e = type_ref.shape[-1]
    hd = e // num_heads
    scale = 1.0 / math.sqrt(hd)

    # ---- KShiftEmbedding tail: sum of 8 hashed rows, L2 normalize, add ----
    item_sum = jnp.sum(rows_ref[...], axis=0)                         # (N, E)
    nrm = jnp.sqrt(jnp.sum(item_sum * item_sum, axis=-1, keepdims=True))
    item_emb = item_sum / jnp.maximum(nrm, 1e-12)                     # F.normalize(p=2)
    x = item_emb + type_ref[...] + pos_ref[...]                       # (N, E)

    # ---- causal bias built once, shared by every layer (hoisted broadcast) ----
    r_i = jax.lax.broadcasted_iota(jnp.int32, (seq, seq), 0)
    c_i = jax.lax.broadcasted_iota(jnp.int32, (seq, seq), 1)
    causal_bias = jnp.where(c_i > r_i, jnp.float32(-1e30),
                            jnp.float32(0.0))[None, :, :]             # (1, S, S)

    for l in range(n_layers):
        # ---- multi-head self attention (per-head weights, no VMEM scratch) ----
        attn = jnp.zeros((n, e), jnp.float32)
        for h in range(num_heads):
            lh = l * num_heads + h
            qh = (jnp.dot(x, wq_ref[lh], preferred_element_type=jnp.float32)
                  + bq_ref[lh]).reshape(batch, seq, hd)
            kh = (jnp.dot(x, wk_ref[lh], preferred_element_type=jnp.float32)
                  + bk_ref[lh]).reshape(batch, seq, hd)
            vh = (jnp.dot(x, wv_ref[lh], preferred_element_type=jnp.float32)
                  + bv_ref[lh]).reshape(batch, seq, hd)
            sc = jnp.einsum('bqd,bkd->bqk', qh, kh,
                            preferred_element_type=jnp.float32) * scale
            sc = sc + causal_bias
            sc = sc - jnp.max(sc, axis=-1, keepdims=True)
            p = jnp.exp(sc)
            p = p / jnp.sum(p, axis=-1, keepdims=True)
            ctx = jnp.einsum('bqk,bkd->bqd', p, vh,
                             preferred_element_type=jnp.float32)      # (B, S, hd)
            # distribute the output projection per head (avoids lane-concat)
            attn = attn + jnp.dot(ctx.reshape(n, hd), wo_ref[lh],
                                  preferred_element_type=jnp.float32)
        attn = attn + bo_ref[l]

        y = _layer_norm(x + attn, ln1_g_ref[l], ln1_b_ref[l])

        # ---- feed forward: bf16 weights/activations, f32 MXU accumulation ----
        h1 = jnp.dot(y.astype(jnp.bfloat16), w1_ref[l],
                     preferred_element_type=jnp.float32) + b1_ref[l]
        h1 = jnp.maximum(h1, 0.0)
        h2 = jnp.dot(h1.astype(jnp.bfloat16), w2_ref[l],
                     preferred_element_type=jnp.float32) + b2_ref[l]
        x = _layer_norm(y + h2, ln2_g_ref[l], ln2_b_ref[l])

    out_ref[...] = x


# --------------------------------------------------------------------------
# Kernel 2: output projection, tiled lane-dense over the padded vocab axis.
#   logits_block = x @ W_block + b_block
# --------------------------------------------------------------------------
def output_kernel(x_ref, w_ref, b_ref, o_ref):
    o_ref[...] = (jnp.dot(x_ref[...], w_ref[...],
                          preferred_element_type=jnp.float32) + b_ref[...])


# --------------------------------------------------------------------------
# Parameters (deterministic synthetic init; linear weights stored pre-transposed;
# FFN weights stored in bf16).
# --------------------------------------------------------------------------
def init_params(key, *, num_items, num_types=4, emb_dim=32, n_layers=2,
                max_seq_len=16, ff_dim=2048):
    num_emb = int(1.15 * num_items)  # KShiftEmbedding table size
    keys = iter(jax.random.split(key, 64))

    def w(shape, scale=0.05, dtype=jnp.float32):
        return (scale * jax.random.normal(next(keys), shape)).astype(dtype)

    params = {
        "num_emb": num_emb,
        "item_table": w((num_emb, emb_dim)),
        "type_table": w((num_types, emb_dim)),
        "pos_table": w((max_seq_len, emb_dim)),
        "out_w_t": w((emb_dim, num_items)),
        "out_b": jnp.zeros((1, num_items), jnp.float32),
        "layers": [],
    }
    for _ in range(n_layers):
        params["layers"].append({
            "in_w_t": w((emb_dim, 3 * emb_dim)),
            "in_b": w((1, 3 * emb_dim), 0.02),
            "out_w_t": w((emb_dim, emb_dim)),
            "out_b": w((1, emb_dim), 0.02),
            "ln1_g": jnp.ones((1, emb_dim), jnp.float32),
            "ln1_b": jnp.zeros((1, emb_dim), jnp.float32),
            "lin1_w_t": w((emb_dim, ff_dim), dtype=jnp.bfloat16),  # bf16 FFN weights
            "lin1_b": w((1, ff_dim), 0.02),
            "lin2_w_t": w((ff_dim, emb_dim), dtype=jnp.bfloat16),
            "lin2_b": w((1, emb_dim), 0.02),
            "ln2_g": jnp.ones((1, emb_dim), jnp.float32),
            "ln2_b": jnp.zeros((1, emb_dim), jnp.float32),
        })
    return params


# --------------------------------------------------------------------------
# Wrapper glue: hash-index math, per-head weight splits, gathers, padding.
# --------------------------------------------------------------------------
def _stack_layer_weights(layers, emb_dim, num_heads):
    """Pre-split attention weights per head and stack all layers for the fused kernel."""
    hd = emb_dim // num_heads
    wq, wk, wv, bq, bk, bv, wo = [], [], [], [], [], [], []
    bo, ln1g, ln1b, ln2g, ln2b = [], [], [], [], []
    w1, b1, w2, b2 = [], [], [], []
    for layer in layers:
        in_w = layer["in_w_t"]                 # (E, 3E)
        in_b = layer["in_b"][0]                # (3E,)
        wq_l = in_w[:, :emb_dim].reshape(emb_dim, num_heads, hd)
        wk_l = in_w[:, emb_dim:2 * emb_dim].reshape(emb_dim, num_heads, hd)
        wv_l = in_w[:, 2 * emb_dim:].reshape(emb_dim, num_heads, hd)
        wo_l = layer["out_w_t"].reshape(num_heads, hd, emb_dim)
        bq_l = in_b[:emb_dim].reshape(num_heads, 1, hd)
        bk_l = in_b[emb_dim:2 * emb_dim].reshape(num_heads, 1, hd)
        bv_l = in_b[2 * emb_dim:].reshape(num_heads, 1, hd)
        for h in range(num_heads):
            wq.append(wq_l[:, h, :]); wk.append(wk_l[:, h, :]); wv.append(wv_l[:, h, :])
            bq.append(bq_l[h]); bk.append(bk_l[h]); bv.append(bv_l[h])
            wo.append(wo_l[h])
        bo.append(layer["out_b"])
        ln1g.append(layer["ln1_g"]); ln1b.append(layer["ln1_b"])
        ln2g.append(layer["ln2_g"]); ln2b.append(layer["ln2_b"])
        w1.append(layer["lin1_w_t"]); b1.append(layer["lin1_b"])
        w2.append(layer["lin2_w_t"]); b2.append(layer["lin2_b"])
    st = lambda xs: jnp.stack(xs, axis=0)
    return (st(wq), st(wk), st(wv), st(bq), st(bk), st(bv), st(wo), st(bo),
            st(ln1g), st(ln1b), st(w1), st(b1), st(w2), st(b2), st(ln2g), st(ln2b))


def gemma2_forward(params, item_ids, interaction_types, *, num_heads=4):
    b, s = item_ids.shape
    n = b * s
    e = params["type_table"].shape[1]
    num_emb = params["num_emb"]
    num_items = params["out_w_t"].shape[1]
    n_layers = len(params["layers"])

    # ---- KShiftEmbedding hashed row indices ----
    # Exact emulation of the torch int64 rotate-left hash for ids < 2**31
    # (high 64-bit word after the rotate is ids >> (32-c)); exact as long as
    # num_emb < ~2**25.
    # TODO(synk): full int64 ids would need a two-word (lo,hi) rotate emulation.
    ids_u = item_ids.reshape(-1).astype(jnp.uint32)                  # (N,)
    pow32_mod = (1 << 32) % num_emb                                  # static python int
    idx_rows = []
    for c in range(NUM_SHIFTS):
        if c == 0:
            row = ids_u % jnp.uint32(num_emb)
        else:
            lo = ids_u << c                                          # (id << c) mod 2**32
            hi = ids_u >> (32 - c)                                   # high word of id << c
            row = (hi * jnp.uint32(pow32_mod)
                   + lo % jnp.uint32(num_emb)) % jnp.uint32(num_emb)
        idx_rows.append(row.astype(jnp.int32))
    idx = jnp.stack(idx_rows, axis=0)                                # (8, N)

    # Gather the 8 hashed rows per token from the HBM-resident table (XLA gather;
    # the full table never enters VMEM).  Type / position gathers likewise.
    item_rows = jnp.take(params["item_table"], idx, axis=0)          # (8, N, E)
    type_g = jnp.take(params["type_table"],
                      interaction_types.reshape(-1).astype(jnp.int32), axis=0)
    positions = jnp.tile(jnp.arange(s, dtype=jnp.int32), b)
    pos_g = jnp.take(params["pos_table"], positions, axis=0)

    stacked = _stack_layer_weights(params["layers"], e, num_heads)

    vmem = pl.BlockSpec(memory_space=pltpu.MemorySpace.VMEM)

    # ---- fused embed + all encoder layers: one pallas_call, one HBM writeback ----
    x = pl.pallas_call(
        partial(gemma2_fused_kernel, batch=b, seq=s,
                num_heads=num_heads, n_layers=n_layers),
        out_shape=jax.ShapeDtypeStruct((n, e), jnp.float32),
        in_specs=[vmem] * (3 + len(stacked)),
        out_specs=vmem,
        compiler_params=pltpu.CompilerParams(vmem_limit_bytes=32 * 1024 * 1024),
    )(item_rows, type_g, pos_g, *stacked)

    # ---- output projection, tiled lane-dense over the 128-padded vocab axis ----
    v_pad = ((num_items + 127) // 128) * 128
    tile_v = 512 if v_pad % 512 == 0 else (256 if v_pad % 256 == 0 else 128)
    out_w = jnp.zeros((e, v_pad), jnp.float32).at[:, :num_items].set(params["out_w_t"])
    out_b = jnp.zeros((1, v_pad), jnp.float32).at[:, :num_items].set(params["out_b"])

    logits = pl.pallas_call(
        output_kernel,
        out_shape=jax.ShapeDtypeStruct((n, v_pad), jnp.float32),
        grid=(v_pad // tile_v,),
        in_specs=[pl.BlockSpec((n, e), lambda j: (0, 0)),
                  pl.BlockSpec((e, tile_v), lambda j: (0, j)),
                  pl.BlockSpec((1, tile_v), lambda j: (0, j))],
        out_specs=pl.BlockSpec((n, tile_v), lambda j: (0, j)),
        compiler_params=pltpu.CompilerParams(
            dimension_semantics=("parallel",),
            vmem_limit_bytes=32 * 1024 * 1024),
    )(x, out_w, out_b)

    return logits[:, :num_items].reshape(b, s, num_items)


if __name__ == "__main__":
    key = jax.random.PRNGKey(0)
    pkey, xkey, tkey = jax.random.split(key, 3)

    B, S = 2, 8
    NUM_ITEMS, EMB, HEADS, LAYERS, MAX_SEQ = 64, 32, 4, 2, 16

    params = init_params(pkey, num_items=NUM_ITEMS, emb_dim=EMB,
                         n_layers=LAYERS, max_seq_len=MAX_SEQ)

    item_ids = jax.random.randint(xkey, (B, S), 0, 1 << 20, dtype=jnp.int32)
    interaction_types = jax.random.randint(tkey, (B, S), 0, 4, dtype=jnp.int32)

    logits = gemma2_forward(params, item_ids, interaction_types, num_heads=HEADS)
    logits = jax.block_until_ready(logits)

    assert logits.shape == (B, S, NUM_ITEMS), logits.shape
    assert bool(jnp.all(jnp.isfinite(logits)))
    print("KERNEL_OK")
</pallas_src>

<mosaic_0001>
module attributes {stable_mosaic.version = 11 : i64} {
  func.func @gemma2_fused_kernel(%arg0: memref<8x16x32xf32, #tpu.memory_space<vmem>>, %arg1: memref<16x32xf32, #tpu.memory_space<vmem>>, %arg2: memref<16x32xf32, #tpu.memory_space<vmem>>, %arg3: memref<8x32x8xf32, #tpu.memory_space<vmem>>, %arg4: memref<8x32x8xf32, #tpu.memory_space<vmem>>, %arg5: memref<8x32x8xf32, #tpu.memory_space<vmem>>, %arg6: memref<8x1x8xf32, #tpu.memory_space<vmem>>, %arg7: memref<8x1x8xf32, #tpu.memory_space<vmem>>, %arg8: memref<8x1x8xf32, #tpu.memory_space<vmem>>, %arg9: memref<8x8x32xf32, #tpu.memory_space<vmem>>, %arg10: memref<2x1x32xf32, #tpu.memory_space<vmem>>, %arg11: memref<2x1x32xf32, #tpu.memory_space<vmem>>, %arg12: memref<2x1x32xf32, #tpu.memory_space<vmem>>, %arg13: memref<2x32x2048xbf16, #tpu.memory_space<vmem>>, %arg14: memref<2x1x2048xf32, #tpu.memory_space<vmem>>, %arg15: memref<2x2048x32xbf16, #tpu.memory_space<vmem>>, %arg16: memref<2x1x32xf32, #tpu.memory_space<vmem>>, %arg17: memref<2x1x32xf32, #tpu.memory_space<vmem>>, %arg18: memref<2x1x32xf32, #tpu.memory_space<vmem>>, %arg19: memref<16x32xf32, #tpu.memory_space<vmem>>) attributes {dimension_semantics = [], scalar_prefetch = 0 : i64, scratch_operands = 0 : i64, tpu.core_type = #tpu.core_type<tc>} {
    %c0 = arith.constant 0 : index
    %c0_0 = arith.constant 0 : index
    %c0_1 = arith.constant 0 : index
    %0 = vector.load %arg0[%c0, %c0_0, %c0_1] : memref<8x16x32xf32, #tpu.memory_space<vmem>>, vector<8x16x32xf32>
    %cst = arith.constant dense<0.000000e+00> : vector<16x32xf32>
    %1 = vector.multi_reduction <add>, %0, %cst [0] : vector<8x16x32xf32> to vector<16x32xf32>
    %2 = arith.mulf %1, %1 : vector<16x32xf32>
    %cst_2 = arith.constant dense<0.000000e+00> : vector<16xf32>
    %3 = vector.multi_reduction <add>, %2, %cst_2 [1] : vector<16x32xf32> to vector<16xf32>
    %4 = vector.shape_cast %3 : vector<16xf32> to vector<16x1xf32>
    %5 = math.sqrt %4 : vector<16x1xf32>
    %cst_3 = arith.constant 9.99999996E-13 : f32
    %6 = vector.broadcast %cst_3 : f32 to vector<16x1xf32>
    %7 = arith.maximumf %5, %6 : vector<16x1xf32>
    %8 = vector.broadcast %7 : vector<16x1xf32> to vector<16x32xf32>
    %9 = arith.divf %1, %8 : vector<16x32xf32>
    %c0_4 = arith.constant 0 : index
    %c0_5 = arith.constant 0 : index
    %10 = vector.load %arg1[%c0_4, %c0_5] : memref<16x32xf32, #tpu.memory_space<vmem>>, vector<16x32xf32>
    %11 = arith.addf %9, %10 : vector<16x32xf32>
    %c0_6 = arith.constant 0 : index
    %c0_7 = arith.constant 0 : index
    %12 = vector.load %arg2[%c0_6, %c0_7] : memref<16x32xf32, #tpu.memory_space<vmem>>, vector<16x32xf32>
    %13 = arith.addf %11, %12 : vector<16x32xf32>
    %14 = tpu.iota {dimensions = array<i32: 0>} : vector<8x8xi32>
    %15 = tpu.iota {dimensions = array<i32: 1>} : vector<8x8xi32>
    %16 = arith.cmpi sgt, %15, %14 : vector<8x8xi32>
    %cst_8 = arith.constant -1.000000e+30 : f32
    %cst_9 = arith.constant 0.000000e+00 : f32
    %17 = vector.broadcast %cst_8 : f32 to vector<8x8xf32>
    %18 = vector.broadcast %cst_9 : f32 to vector<8x8xf32>
    %19 = arith.select %16, %17, %18 : vector<8x8xi1>, vector<8x8xf32>
    %20 = vector.shape_cast %19 : vector<8x8xf32> to vector<1x8x8xf32>
    %cst_10 = arith.constant 0.000000e+00 : f32
    %21 = vector.broadcast %cst_10 : f32 to vector<16x32xf32>
    %c0_11 = arith.constant 0 : index
    %c0_12 = arith.constant 0 : index
    %c0_13 = arith.constant 0 : index
    %22 = vector.load %arg3[%c0_11, %c0_12, %c0_13] : memref<8x32x8xf32, #tpu.memory_space<vmem>>, vector<1x32x8xf32>
    %23 = vector.shape_cast %22 : vector<1x32x8xf32> to vector<32x8xf32>
    %cst_14 = arith.constant dense<0.000000e+00> : vector<16x8xf32>
    %24 = tpu.matmul %13, %23, %cst_14 {dimension_numbers = #tpu.dot_dimension_numbers<[1], [0], [0], [1], [0, 0, 1, 1], [], []>} : vector<16x32xf32>, vector<32x8xf32>, vector<16x8xf32> -> vector<16x8xf32>
    %c0_15 = arith.constant 0 : index
    %c0_16 = arith.constant 0 : index
    %c0_17 = arith.constant 0 : index
    %25 = vector.load %arg6[%c0_15, %c0_16, %c0_17] : memref<8x1x8xf32, #tpu.memory_space<vmem>>, vector<1x1x8xf32>
    %26 = vector.shape_cast %25 : vector<1x1x8xf32> to vector<1x8xf32>
    %27 = vector.broadcast %26 : vector<1x8xf32> to vector<16x8xf32>
    %28 = arith.addf %24, %27 : vector<16x8xf32>
    %29 = vector.shape_cast %28 : vector<16x8xf32> to vector<2x8x8xf32>
    %c0_18 = arith.constant 0 : index
    %c0_19 = arith.constant 0 : index
    %c0_20 = arith.constant 0 : index
    %30 = vector.load %arg4[%c0_18, %c0_19, %c0_20] : memref<8x32x8xf32, #tpu.memory_space<vmem>>, vector<1x32x8xf32>
    %31 = vector.shape_cast %30 : vector<1x32x8xf32> to vector<32x8xf32>
    %cst_21 = arith.constant dense<0.000000e+00> : vector<16x8xf32>
    %32 = tpu.matmul %13, %31, %cst_21 {dimension_numbers = #tpu.dot_dimension_numbers<[1], [0], [0], [1], [0, 0, 1, 1], [], []>} : vector<16x32xf32>, vector<32x8xf32>, vector<16x8xf32> -> vector<16x8xf32>
    %c0_22 = arith.constant 0 : index
    %c0_23 = arith.constant 0 : index
    %c0_24 = arith.constant 0 : index
    %33 = vector.load %arg7[%c0_22, %c0_23, %c0_24] : memref<8x1x8xf32, #tpu.memory_space<vmem>>, vector<1x1x8xf32>
    %34 = vector.shape_cast %33 : vector<1x1x8xf32> to vector<1x8xf32>
    %35 = vector.broadcast %34 : vector<1x8xf32> to vector<16x8xf32>
    %36 = arith.addf %32, %35 : vector<16x8xf32>
    %37 = vector.shape_cast %36 : vector<16x8xf32> to vector<2x8x8xf32>
    %c0_25 = arith.constant 0 : index
    %c0_26 = arith.constant 0 : index
    %c0_27 = arith.constant 0 : index
    %38 = vector.load %arg5[%c0_25, %c0_26, %c0_27] : memref<8x32x8xf32, #tpu.memory_space<vmem>>, vector<1x32x8xf32>
    %39 = vector.shape_cast %38 : vector<1x32x8xf32> to vector<32x8xf32>
    %cst_28 = arith.constant dense<0.000000e+00> : vector<16x8xf32>
    %40 = tpu.matmul %13, %39, %cst_28 {dimension_numbers = #tpu.dot_dimension_numbers<[1], [0], [0], [1], [0, 0, 1, 1], [], []>} : vector<16x32xf32>, vector<32x8xf32>, vector<16x8xf32> -> vector<16x8xf32>
    %c0_29 = arith.constant 0 : index
    %c0_30 = arith.constant 0 : index
    %c0_31 = arith.constant 0 : index
    %41 = vector.load %arg8[%c0_29, %c0_30, %c0_31] : memref<8x1x8xf32, #tpu.memory_space<vmem>>, vector<1x1x8xf32>
    %42 = vector.shape_cast %41 : vector<1x1x8xf32> to vector<1x8xf32>
    %43 = vector.broadcast %42 : vector<1x8xf32> to vector<16x8xf32>
    %44 = arith.addf %40, %43 : vector<16x8xf32>
    %45 = vector.shape_cast %44 : vector<16x8xf32> to vector<2x8x8xf32>
    "tpu.trace_start"() <{level = 10 : i32, message = "bqd,bkd->bqk"}> : () -> ()
    %cst_32 = arith.constant dense<0.000000e+00> : vector<2x8x8xf32>
    %46 = tpu.matmul %29, %37, %cst_32 {dimension_numbers = #tpu.dot_dimension_numbers<[2], [2], [1], [1], [0, 0, 0, 1, 1, 1], [0], [0]>} : vector<2x8x8xf32>, vector<2x8x8xf32>, vector<2x8x8xf32> -> vector<2x8x8xf32>
    "tpu.trace_stop"() : () -> ()
    %cst_33 = arith.constant 0.353553385 : f32
    %47 = vector.broadcast %cst_33 : f32 to vector<2x8x8xf32>
    %48 = arith.mulf %46, %47 : vector<2x8x8xf32>
    %49 = vector.broadcast %20 : vector<1x8x8xf32> to vector<2x8x8xf32>
    %50 = arith.addf %48, %49 : vector<2x8x8xf32>
    %cst_34 = arith.constant dense<0xFF800000> : vector<2x8xf32>
    %51 = vector.multi_reduction <maximumf>, %50, %cst_34 [2] : vector<2x8x8xf32> to vector<2x8xf32>
    %52 = vector.shape_cast %51 : vector<2x8xf32> to vector<2x8x1xf32>
    %53 = vector.broadcast %52 : vector<2x8x1xf32> to vector<2x8x8xf32>
    %54 = arith.subf %50, %53 : vector<2x8x8xf32>
    %55 = math.exp %54 : vector<2x8x8xf32>
    %cst_35 = arith.constant dense<0.000000e+00> : vector<2x8xf32>
    %56 = vector.multi_reduction <add>, %55, %cst_35 [2] : vector<2x8x8xf32> to vector<2x8xf32>
    %57 = vector.shape_cast %56 : vector<2x8xf32> to vector<2x8x1xf32>
    %58 = vector.broadcast %57 : vector<2x8x1xf32> to vector<2x8x8xf32>
    %59 = arith.divf %55, %58 : vector<2x8x8xf32>
    "tpu.trace_start"() <{level = 10 : i32, message = "bqk,bkd->bqd"}> : () -> ()
    %cst_36 = arith.constant dense<0.000000e+00> : vector<2x8x8xf32>
    %60 = tpu.matmul %59, %45, %cst_36 {dimension_numbers = #tpu.dot_dimension_numbers<[2], [1], [1], [2], [0, 0, 0, 1, 1, 2], [0], [0]>} : vector<2x8x8xf32>, vector<2x8x8xf32>, vector<2x8x8xf32> -> vector<2x8x8xf32>
    "tpu.trace_stop"() : () -> ()
    %61 = vector.shape_cast %60 : vector<2x8x8xf32> to vector<16x8xf32>
    %c0_37 = arith.constant 0 : index
    %c0_38 = arith.constant 0 : index
    %c0_39 = arith.constant 0 : index
    %62 = vector.load %arg9[%c0_37, %c0_38, %c0_39] : memref<8x8x32xf32, #tpu.memory_space<vmem>>, vector<1x8x32xf32>
    %63 = vector.shape_cast %62 : vector<1x8x32xf32> to vector<8x32xf32>
    %cst_40 = arith.constant dense<0.000000e+00> : vector<16x32xf32>
    %64 = tpu.matmul %61, %63, %cst_40 {dimension_numbers = #tpu.dot_dimension_numbers<[1], [0], [0], [1], [0, 0, 1, 1], [], []>} : vector<16x8xf32>, vector<8x32xf32>, vector<16x32xf32> -> vector<16x32xf32>
    %65 = arith.addf %21, %64 : vector<16x32xf32>
    %c1 = arith.constant 1 : index
    %c0_41 = arith.constant 0 : index
    %c0_42 = arith.constant 0 : index
    %66 = vector.load %arg3[%c1, %c0_41, %c0_42] : memref<8x32x8xf32, #tpu.memory_space<vmem>>, vector<1x32x8xf32>
    %67 = vector.shape_cast %66 : vector<1x32x8xf32> to vector<32x8xf32>
    %cst_43 = arith.constant dense<0.000000e+00> : vector<16x8xf32>
    %68 = tpu.matmul %13, %67, %cst_43 {dimension_numbers = #tpu.dot_dimension_numbers<[1], [0], [0], [1], [0, 0, 1, 1], [], []>} : vector<16x32xf32>, vector<32x8xf32>, vector<16x8xf32> -> vector<16x8xf32>
    %c1_44 = arith.constant 1 : index
    %c0_45 = arith.constant 0 : index
    %c0_46 = arith.constant 0 : index
    %69 = vector.load %arg6[%c1_44, %c0_45, %c0_46] : memref<8x1x8xf32, #tpu.memory_space<vmem>>, vector<1x1x8xf32>
    %70 = vector.shape_cast %69 : vector<1x1x8xf32> to vector<1x8xf32>
    %71 = vector.broadcast %70 : vector<1x8xf32> to vector<16x8xf32>
    %72 = arith.addf %68, %71 : vector<16x8xf32>
    %73 = vector.shape_cast %72 : vector<16x8xf32> to vector<2x8x8xf32>
    %c1_47 = arith.constant 1 : index
    %c0_48 = arith.constant 0 : index
    %c0_49 = arith.constant 0 : index
    %74 = vector.load %arg4[%c1_47, %c0_48, %c0_49] : memref<8x32x8xf32, #tpu.memory_space<vmem>>, vector<1x32x8xf32>
    %75 = vector.shape_cast %74 : vector<1x32x8xf32> to vector<32x8xf32>
    %cst_50 = arith.constant dense<0.000000e+00> : vector<16x8xf32>
    %76 = tpu.matmul %13, %75, %cst_50 {dimension_numbers = #tpu.dot_dimension_numbers<[1], [0], [0], [1], [0, 0, 1, 1], [], []>} : vector<16x32xf32>, vector<32x8xf32>, vector<16x8xf32> -> vector<16x8xf32>
    %c1_51 = arith.constant 1 : index
    %c0_52 = arith.constant 0 : index
    %c0_53 = arith.constant 0 : index
    %77 = vector.load %arg7[%c1_51, %c0_52, %c0_53] : memref<8x1x8xf32, #tpu.memory_space<vmem>>, vector<1x1x8xf32>
    %78 = vector.shape_cast %77 : vector<1x1x8xf32> to vector<1x8xf32>
    %79 = vector.broadcast %78 : vector<1x8xf32> to vector<16x8xf32>
    %80 = arith.addf %76, %79 : vector<16x8xf32>
    %81 = vector.shape_cast %80 : vector<16x8xf32> to vector<2x8x8xf32>
    %c1_54 = arith.constant 1 : index
    %c0_55 = arith.constant 0 : index
    %c0_56 = arith.constant 0 : index
    %82 = vector.load %arg5[%c1_54, %c0_55, %c0_56] : memref<8x32x8xf32, #tpu.memory_space<vmem>>, vector<1x32x8xf32>
    %83 = vector.shape_cast %82 : vector<1x32x8xf32> to vector<32x8xf32>
    %cst_57 = arith.constant dense<0.000000e+00> : vector<16x8xf32>
    %84 = tpu.matmul %13, %83, %cst_57 {dimension_numbers = #tpu.dot_dimension_numbers<[1], [0], [0], [1], [0, 0, 1, 1], [], []>} : vector<16x32xf32>, vector<32x8xf32>, vector<16x8xf32> -> vector<16x8xf32>
    %c1_58 = arith.constant 1 : index
    %c0_59 = arith.constant 0 : index
    %c0_60 = arith.constant 0 : index
    %85 = vector.load %arg8[%c1_58, %c0_59, %c0_60] : memref<8x1x8xf32, #tpu.memory_space<vmem>>, vector<1x1x8xf32>
    %86 = vector.shape_cast %85 : vector<1x1x8xf32> to vector<1x8xf32>
    %87 = vector.broadcast %86 : vector<1x8xf32> to vector<16x8xf32>
    %88 = arith.addf %84, %87 : vector<16x8xf32>
    %89 = vector.shape_cast %88 : vector<16x8xf32> to vector<2x8x8xf32>
    "tpu.trace_start"() <{level = 10 : i32, message = "bqd,bkd->bqk"}> : () -> ()
    %cst_61 = arith.constant dense<0.000000e+00> : vector<2x8x8xf32>
    %90 = tpu.matmul %73, %81, %cst_61 {dimension_numbers = #tpu.dot_dimension_numbers<[2], [2], [1], [1], [0, 0, 0, 1, 1, 1], [0], [0]>} : vector<2x8x8xf32>, vector<2x8x8xf32>, vector<2x8x8xf32> -> vector<2x8x8xf32>
    "tpu.trace_stop"() : () -> ()
    %cst_62 = arith.constant 0.353553385 : f32
    %91 = vector.broadcast %cst_62 : f32 to vector<2x8x8xf32>
    %92 = arith.mulf %90, %91 : vector<2x8x8xf32>
    %93 = vector.broadcast %20 : vector<1x8x8xf32> to vector<2x8x8xf32>
    %94 = arith.addf %92, %93 : vector<2x8x8xf32>
    %cst_63 = arith.constant dense<0xFF800000> : vector<2x8xf32>
    %95 = vector.multi_reduction <maximumf>, %94, %cst_63 [2] : vector<2x8x8xf32> to vector<2x8xf32>
    %96 = vector.shape_cast %95 : vector<2x8xf32> to vector<2x8x1xf32>
    %97 = vector.broadcast %96 : vector<2x8x1xf32> to vector<2x8x8xf32>
    %98 = arith.subf %94, %97 : vector<2x8x8xf32>
    %99 = math.exp %98 : vector<2x8x8xf32>
    %cst_64 = arith.constant dense<0.000000e+00> : vector<2x8xf32>
    %100 = vector.multi_reduction <add>, %99, %cst_64 [2] : vector<2x8x8xf32> to vector<2x8xf32>
    %101 = vector.shape_cast %100 : vector<2x8xf32> to vector<2x8x1xf32>
    %102 = vector.broadcast %101 : vector<2x8x1xf32> to vector<2x8x8xf32>
    %103 = arith.divf %99, %102 : vector<2x8x8xf32>
    "tpu.trace_start"() <{level = 10 : i32, message = "bqk,bkd->bqd"}> : () -> ()
    %cst_65 = arith.constant dense<0.000000e+00> : vector<2x8x8xf32>
    %104 = tpu.matmul %103, %89, %cst_65 {dimension_numbers = #tpu.dot_dimension_numbers<[2], [1], [1], [2], [0, 0, 0, 1, 1, 2], [0], [0]>} : vector<2x8x8xf32>, vector<2x8x8xf32>, vector<2x8x8xf32> -> vector<2x8x8xf32>
    "tpu.trace_stop"() : () -> ()
    %105 = vector.shape_cast %104 : vector<2x8x8xf32> to vector<16x8xf32>
    %c1_66 = arith.constant 1 : index
    %c0_67 = arith.constant 0 : index
    %c0_68 = arith.constant 0 : index
    %106 = vector.load %arg9[%c1_66, %c0_67, %c0_68] : memref<8x8x32xf32, #tpu.memory_space<vmem>>, vector<1x8x32xf32>
    %107 = vector.shape_cast %106 : vector<1x8x32xf32> to vector<8x32xf32>
    %cst_69 = arith.constant dense<0.000000e+00> : vector<16x32xf32>
    %108 = tpu.matmul %105, %107, %cst_69 {dimension_numbers = #tpu.dot_dimension_numbers<[1], [0], [0], [1], [0, 0, 1, 1], [], []>} : vector<16x8xf32>, vector<8x32xf32>, vector<16x32xf32> -> vector<16x32xf32>
    %109 = arith.addf %65, %108 : vector<16x32xf32>
    %c2 = arith.constant 2 : index
    %c0_70 = arith.constant 0 : index
    %c0_71 = arith.constant 0 : index
    %110 = vector.load %arg3[%c2, %c0_70, %c0_71] : memref<8x32x8xf32, #tpu.memory_space<vmem>>, vector<1x32x8xf32>
    %111 = vector.shape_cast %110 : vector<1x32x8xf32> to vector<32x8xf32>
    %cst_72 = arith.constant dense<0.000000e+00> : vector<16x8xf32>
    %112 = tpu.matmul %13, %111, %cst_72 {dimension_numbers = #tpu.dot_dimension_numbers<[1], [0], [0], [1], [0, 0, 1, 1], [], []>} : vector<16x32xf32>, vector<32x8xf32>, vector<16x8xf32> -> vector<16x8xf32>
    %c2_73 = arith.constant 2 : index
    %c0_74 = arith.constant 0 : index
    %c0_75 = arith.constant 0 : index
    %113 = vector.load %arg6[%c2_73, %c0_74, %c0_75] : memref<8x1x8xf32, #tpu.memory_space<vmem>>, vector<1x1x8xf32>
    %114 = vector.shape_cast %113 : vector<1x1x8xf32> to vector<1x8xf32>
    %115 = vector.broadcast %114 : vector<1x8xf32> to vector<16x8xf32>
    %116 = arith.addf %112, %115 : vector<16x8xf32>
    %117 = vector.shape_cast %116 : vector<16x8xf32> to vector<2x8x8xf32>
    %c2_76 = arith.constant 2 : index
    %c0_77 = arith.constant 0 : index
    %c0_78 = arith.constant 0 : index
    %118 = vector.load %arg4[%c2_76, %c0_77, %c0_78] : memref<8x32x8xf32, #tpu.memory_space<vmem>>, vector<1x32x8xf32>
    %119 = vector.shape_cast %118 : vector<1x32x8xf32> to vector<32x8xf32>
    %cst_79 = arith.constant dense<0.000000e+00> : vector<16x8xf32>
    %120 = tpu.matmul %13, %119, %cst_79 {dimension_numbers = #tpu.dot_dimension_numbers<[1], [0], [0], [1], [0, 0, 1, 1], [], []>} : vector<16x32xf32>, vector<32x8xf32>, vector<16x8xf32> -> vector<16x8xf32>
    %c2_80 = arith.constant 2 : index
    %c0_81 = arith.constant 0 : index
    %c0_82 = arith.constant 0 : index
    %121 = vector.load %arg7[%c2_80, %c0_81, %c0_82] : memref<8x1x8xf32, #tpu.memory_space<vmem>>, vector<1x1x8xf32>
    %122 = vector.shape_cast %121 : vector<1x1x8xf32> to vector<1x8xf32>
    %123 = vector.broadcast %122 : vector<1x8xf32> to vector<16x8xf32>
    %124 = arith.addf %120, %123 : vector<16x8xf32>
    %125 = vector.shape_cast %124 : vector<16x8xf32> to vector<2x8x8xf32>
    %c2_83 = arith.constant 2 : index
    %c0_84 = arith.constant 0 : index
    %c0_85 = arith.constant 0 : index
    %126 = vector.load %arg5[%c2_83, %c0_84, %c0_85] : memref<8x32x8xf32, #tpu.memory_space<vmem>>, vector<1x32x8xf32>
    %127 = vector.shape_cast %126 : vector<1x32x8xf32> to vector<32x8xf32>
    %cst_86 = arith.constant dense<0.000000e+00> : vector<16x8xf32>
    %128 = tpu.matmul %13, %127, %cst_86 {dimension_numbers = #tpu.dot_dimension_numbers<[1], [0], [0], [1], [0, 0, 1, 1], [], []>} : vector<16x32xf32>, vector<32x8xf32>, vector<16x8xf32> -> vector<16x8xf32>
    %c2_87 = arith.constant 2 : index
    %c0_88 = arith.constant 0 : index
    %c0_89 = arith.constant 0 : index
    %129 = vector.load %arg8[%c2_87, %c0_88, %c0_89] : memref<8x1x8xf32, #tpu.memory_space<vmem>>, vector<1x1x8xf32>
    %130 = vector.shape_cast %129 : vector<1x1x8xf32> to vector<1x8xf32>
    %131 = vector.broadcast %130 : vector<1x8xf32> to vector<16x8xf32>
    %132 = arith.addf %128, %131 : vector<16x8xf32>
    %133 = vector.shape_cast %132 : vector<16x8xf32> to vector<2x8x8xf32>
    "tpu.trace_start"() <{level = 10 : i32, message = "bqd,bkd->bqk"}> : () -> ()
    %cst_90 = arith.constant dense<0.000000e+00> : vector<2x8x8xf32>
    %134 = tpu.matmul %117, %125, %cst_90 {dimension_numbers = #tpu.dot_dimension_numbers<[2], [2], [1], [1], [0, 0, 0, 1, 1, 1], [0], [0]>} : vector<2x8x8xf32>, vector<2x8x8xf32>, vector<2x8x8xf32> -> vector<2x8x8xf32>
    "tpu.trace_stop"() : () -> ()
    %cst_91 = arith.constant 0.353553385 : f32
    %135 = vector.broadcast %cst_91 : f32 to vector<2x8x8xf32>
    %136 = arith.mulf %134, %135 : vector<2x8x8xf32>
    %137 = vector.broadcast %20 : vector<1x8x8xf32> to vector<2x8x8xf32>
    %138 = arith.addf %136, %137 : vector<2x8x8xf32>
    %cst_92 = arith.constant dense<0xFF800000> : vector<2x8xf32>
    %139 = vector.multi_reduction <maximumf>, %138, %cst_92 [2] : vector<2x8x8xf32> to vector<2x8xf32>
    %140 = vector.shape_cast %139 : vector<2x8xf32> to vector<2x8x1xf32>
    %141 = vector.broadcast %140 : vector<2x8x1xf32> to vector<2x8x8xf32>
    %142 = arith.subf %138, %141 : vector<2x8x8xf32>
    %143 = math.exp %142 : vector<2x8x8xf32>
    %cst_93 = arith.constant dense<0.000000e+00> : vector<2x8xf32>
    %144 = vector.multi_reduction <add>, %143, %cst_93 [2] : vector<2x8x8xf32> to vector<2x8xf32>
    %145 = vector.shape_cast %144 : vector<2x8xf32> to vector<2x8x1xf32>
    %146 = vector.broadcast %145 : vector<2x8x1xf32> to vector<2x8x8xf32>
    %147 = arith.divf %143, %146 : vector<2x8x8xf32>
    "tpu.trace_start"() <{level = 10 : i32, message = "bqk,bkd->bqd"}> : () -> ()
    %cst_94 = arith.constant dense<0.000000e+00> : vector<2x8x8xf32>
    %148 = tpu.matmul %147, %133, %cst_94 {dimension_numbers = #tpu.dot_dimension_numbers<[2], [1], [1], [2], [0, 0, 0, 1, 1, 2], [0], [0]>} : vector<2x8x8xf32>, vector<2x8x8xf32>, vector<2x8x8xf32> -> vector<2x8x8xf32>
    "tpu.trace_stop"() : () -> ()
    %149 = vector.shape_cast %148 : vector<2x8x8xf32> to vector<16x8xf32>
    %c2_95 = arith.constant 2 : index
    %c0_96 = arith.constant 0 : index
    %c0_97 = arith.constant 0 : index
    %150 = vector.load %arg9[%c2_95, %c0_96, %c0_97] : memref<8x8x32xf32, #tpu.memory_space<vmem>>, vector<1x8x32xf32>
    %151 = vector.shape_cast %150 : vector<1x8x32xf32> to vector<8x32xf32>
    %cst_98 = arith.constant dense<0.000000e+00> : vector<16x32xf32>
    %152 = tpu.matmul %149, %151, %cst_98 {dimension_numbers = #tpu.dot_dimension_numbers<[1], [0], [0], [1], [0, 0, 1, 1], [], []>} : vector<16x8xf32>, vector<8x32xf32>, vector<16x32xf32> -> vector<16x32xf32>
    %153 = arith.addf %109, %152 : vector<16x32xf32>
    %c3 = arith.constant 3 : index
    %c0_99 = arith.constant 0 : index
    %c0_100 = arith.constant 0 : index
    %154 = vector.load %arg3[%c3, %c0_99, %c0_100] : memref<8x32x8xf32, #tpu.memory_space<vmem>>, vector<1x32x8xf32>
    %155 = vector.shape_cast %154 : vector<1x32x8xf32> to vector<32x8xf32>
    %cst_101 = arith.constant dense<0.000000e+00> : vector<16x8xf32>
    %156 = tpu.matmul %13, %155, %cst_101 {dimension_numbers = #tpu.dot_dimension_numbers<[1], [0], [0], [1], [0, 0, 1, 1], [], []>} : vector<16x32xf32>, vector<32x8xf32>, vector<16x8xf32> -> vector<16x8xf32>
    %c3_102 = arith.constant 3 : index
    %c0_103 = arith.constant 0 : index
    %c0_104 = arith.constant 0 : index
    %157 = vector.load %arg6[%c3_102, %c0_103, %c0_104] : memref<8x1x8xf32, #tpu.memory_space<vmem>>, vector<1x1x8xf32>
    %158 = vector.shape_cast %157 : vector<1x1x8xf32> to vector<1x8xf32>
    %159 = vector.broadcast %158 : vector<1x8xf32> to vector<16x8xf32>
    %160 = arith.addf %156, %159 : vector<16x8xf32>
    %161 = vector.shape_cast %160 : vector<16x8xf32> to vector<2x8x8xf32>
    %c3_105 = arith.constant 3 : index
    %c0_106 = arith.constant 0 : index
    %c0_107 = arith.constant 0 : index
    %162 = vector.load %arg4[%c3_105, %c0_106, %c0_107] : memref<8x32x8xf32, #tpu.memory_space<vmem>>, vector<1x32x8xf32>
    %163 = vector.shape_cast %162 : vector<1x32x8xf32> to vector<32x8xf32>
    %cst_108 = arith.constant dense<0.000000e+00> : vector<16x8xf32>
    %164 = tpu.matmul %13, %163, %cst_108 {dimension_numbers = #tpu.dot_dimension_numbers<[1], [0], [0], [1], [0, 0, 1, 1], [], []>} : vector<16x32xf32>, vector<32x8xf32>, vector<16x8xf32> -> vector<16x8xf32>
    %c3_109 = arith.constant 3 : index
    %c0_110 = arith.constant 0 : index
    %c0_111 = arith.constant 0 : index
    %165 = vector.load %arg7[%c3_109, %c0_110, %c0_111] : memref<8x1x8xf32, #tpu.memory_space<vmem>>, vector<1x1x8xf32>
    %166 = vector.shape_cast %165 : vector<1x1x8xf32> to vector<1x8xf32>
    %167 = vector.broadcast %166 : vector<1x8xf32> to vector<16x8xf32>
    %168 = arith.addf %164, %167 : vector<16x8xf32>
    %169 = vector.shape_cast %168 : vector<16x8xf32> to vector<2x8x8xf32>
    %c3_112 = arith.constant 3 : index
    %c0_113 = arith.constant 0 : index
    %c0_114 = arith.constant 0 : index
    %170 = vector.load %arg5[%c3_112, %c0_113, %c0_114] : memref<8x32x8xf32, #tpu.memory_space<vmem>>, vector<1x32x8xf32>
    %171 = vector.shape_cast %170 : vector<1x32x8xf32> to vector<32x8xf32>
    %cst_115 = arith.constant dense<0.000000e+00> : vector<16x8xf32>
    %172 = tpu.matmul %13, %171, %cst_115 {dimension_numbers = #tpu.dot_dimension_numbers<[1], [0], [0], [1], [0, 0, 1, 1], [], []>} : vector<16x32xf32>, vector<32x8xf32>, vector<16x8xf32> -> vector<16x8xf32>
    %c3_116 = arith.constant 3 : index
    %c0_117 = arith.constant 0 : index
    %c0_118 = arith.constant 0 : index
    %173 = vector.load %arg8[%c3_116, %c0_117, %c0_118] : memref<8x1x8xf32, #tpu.memory_space<vmem>>, vector<1x1x8xf32>
    %174 = vector.shape_cast %173 : vector<1x1x8xf32> to vector<1x8xf32>
    %175 = vector.broadcast %174 : vector<1x8xf32> to vector<16x8xf32>
    %176 = arith.addf %172, %175 : vector<16x8xf32>
    %177 = vector.shape_cast %176 : vector<16x8xf32> to vector<2x8x8xf32>
    "tpu.trace_start"() <{level = 10 : i32, message = "bqd,bkd->bqk"}> : () -> ()
    %cst_119 = arith.constant dense<0.000000e+00> : vector<2x8x8xf32>
    %178 = tpu.matmul %161, %169, %cst_119 {dimension_numbers = #tpu.dot_dimension_numbers<[2], [2], [1], [1], [0, 0, 0, 1, 1, 1], [0], [0]>} : vector<2x8x8xf32>, vector<2x8x8xf32>, vector<2x8x8xf32> -> vector<2x8x8xf32>
    "tpu.trace_stop"() : () -> ()
    %cst_120 = arith.constant 0.353553385 : f32
    %179 = vector.broadcast %cst_120 : f32 to vector<2x8x8xf32>
    %180 = arith.mulf %178, %179 : vector<2x8x8xf32>
    %181 = vector.broadcast %20 : vector<1x8x8xf32> to vector<2x8x8xf32>
    %182 = arith.addf %180, %181 : vector<2x8x8xf32>
    %cst_121 = arith.constant dense<0xFF800000> : vector<2x8xf32>
    %183 = vector.multi_reduction <maximumf>, %182, %cst_121 [2] : vector<2x8x8xf32> to vector<2x8xf32>
    %184 = vector.shape_cast %183 : vector<2x8xf32> to vector<2x8x1xf32>
    %185 = vector.broadcast %184 : vector<2x8x1xf32> to vector<2x8x8xf32>
    %186 = arith.subf %182, %185 : vector<2x8x8xf32>
    %187 = math.exp %186 : vector<2x8x8xf32>
    %cst_122 = arith.constant dense<0.000000e+00> : vector<2x8xf32>
    %188 = vector.multi_reduction <add>, %187, %cst_122 [2] : vector<2x8x8xf32> to vector<2x8xf32>
    %189 = vector.shape_cast %188 : vector<2x8xf32> to vector<2x8x1xf32>
    %190 = vector.broadcast %189 : vector<2x8x1xf32> to vector<2x8x8xf32>
    %191 = arith.divf %187, %190 : vector<2x8x8xf32>
    "tpu.trace_start"() <{level = 10 : i32, message = "bqk,bkd->bqd"}> : () -> ()
    %cst_123 = arith.constant dense<0.000000e+00> : vector<2x8x8xf32>
    %192 = tpu.matmul %191, %177, %cst_123 {dimension_numbers = #tpu.dot_dimension_numbers<[2], [1], [1], [2], [0, 0, 0, 1, 1, 2], [0], [0]>} : vector<2x8x8xf32>, vector<2x8x8xf32>, vector<2x8x8xf32> -> vector<2x8x8xf32>
    "tpu.trace_stop"() : () -> ()
    %193 = vector.shape_cast %192 : vector<2x8x8xf32> to vector<16x8xf32>
    %c3_124 = arith.constant 3 : index
    %c0_125 = arith.constant 0 : index
    %c0_126 = arith.constant 0 : index
    %194 = vector.load %arg9[%c3_124, %c0_125, %c0_126] : memref<8x8x32xf32, #tpu.memory_space<vmem>>, vector<1x8x32xf32>
    %195 = vector.shape_cast %194 : vector<1x8x32xf32> to vector<8x32xf32>
    %cst_127 = arith.constant dense<0.000000e+00> : vector<16x32xf32>
    %196 = tpu.matmul %193, %195, %cst_127 {dimension_numbers = #tpu.dot_dimension_numbers<[1], [0], [0], [1], [0, 0, 1, 1], [], []>} : vector<16x8xf32>, vector<8x32xf32>, vector<16x32xf32> -> vector<16x32xf32>
    %197 = arith.addf %153, %196 : vector<16x32xf32>
    %c0_128 = arith.constant 0 : index
    %c0_129 = arith.constant 0 : index
    %c0_130 = arith.constant 0 : index
    %198 = vector.load %arg10[%c0_128, %c0_129, %c0_130] : memref<2x1x32xf32, #tpu.memory_space<vmem>>, vector<1x1x32xf32>
    %199 = vector.shape_cast %198 : vector<1x1x32xf32> to vector<1x32xf32>
    %200 = vector.broadcast %199 : vector<1x32xf32> to vector<16x32xf32>
    %201 = arith.addf %197, %200 : vector<16x32xf32>
    %202 = arith.addf %13, %201 : vector<16x32xf32>
    %c0_131 = arith.constant 0 : index
    %c0_132 = arith.constant 0 : index
    %c0_133 = arith.constant 0 : index
    %203 = vector.load %arg11[%c0_131, %c0_132, %c0_133] : memref<2x1x32xf32, #tpu.memory_space<vmem>>, vector<1x1x32xf32>
    %204 = vector.shape_cast %203 : vector<1x1x32xf32> to vector<1x32xf32>
    %c0_134 = arith.constant 0 : index
    %c0_135 = arith.constant 0 : index
    %c0_136 = arith.constant 0 : index
    %205 = vector.load %arg12[%c0_134, %c0_135, %c0_136] : memref<2x1x32xf32, #tpu.memory_space<vmem>>, vector<1x1x32xf32>
    %206 = vector.shape_cast %205 : vector<1x1x32xf32> to vector<1x32xf32>
    %cst_137 = arith.constant dense<0.000000e+00> : vector<16xf32>
    %207 = vector.multi_reduction <add>, %202, %cst_137 [1] : vector<16x32xf32> to vector<16xf32>
    %208 = vector.shape_cast %207 : vector<16xf32> to vector<16x1xf32>
    %cst_138 = arith.constant 3.200000e+01 : f32
    %209 = vector.broadcast %cst_138 : f32 to vector<16x1xf32>
    %210 = arith.divf %208, %209 : vector<16x1xf32>
    %211 = vector.broadcast %210 : vector<16x1xf32> to vector<16x32xf32>
    %212 = arith.subf %202, %211 : vector<16x32xf32>
    %213 = arith.mulf %212, %212 : vector<16x32xf32>
    %cst_139 = arith.constant dense<0.000000e+00> : vector<16xf32>
    %214 = vector.multi_reduction <add>, %213, %cst_139 [1] : vector<16x32xf32> to vector<16xf32>
    %215 = vector.shape_cast %214 : vector<16xf32> to vector<16x1xf32>
    %cst_140 = arith.constant 3.200000e+01 : f32
    %216 = vector.broadcast %cst_140 : f32 to vector<16x1xf32>
    %217 = arith.divf %215, %216 : vector<16x1xf32>
    %218 = vector.broadcast %210 : vector<16x1xf32> to vector<16x32xf32>
    %219 = arith.subf %202, %218 : vector<16x32xf32>
    %cst_141 = arith.constant 9.99999974E-6 : f32
    %220 = vector.broadcast %cst_141 : f32 to vector<16x1xf32>
    %221 = arith.addf %217, %220 : vector<16x1xf32>
    %222 = math.rsqrt %221 : vector<16x1xf32>
    %223 = vector.broadcast %222 : vector<16x1xf32> to vector<16x32xf32>
    %224 = arith.mulf %219, %223 : vector<16x32xf32>
    %225 = vector.broadcast %204 : vector<1x32xf32> to vector<16x32xf32>
    %226 = arith.mulf %224, %225 : vector<16x32xf32>
    %227 = vector.broadcast %206 : vector<1x32xf32> to vector<16x32xf32>
    %228 = arith.addf %226, %227 : vector<16x32xf32>
    %229 = arith.truncf %228 : vector<16x32xf32> to vector<16x32xbf16>
    %c0_142 = arith.constant 0 : index
    %c0_143 = arith.constant 0 : index
    %c0_144 = arith.constant 0 : index
    %230 = vector.load %arg13[%c0_142, %c0_143, %c0_144] : memref<2x32x2048xbf16, #tpu.memory_space<vmem>>, vector<1x32x2048xbf16>
    %231 = vector.shape_cast %230 : vector<1x32x2048xbf16> to vector<32x2048xbf16>
    %cst_145 = arith.constant dense<0.000000e+00> : vector<16x2048xf32>
    %232 = tpu.matmul %229, %231, %cst_145 {dimension_numbers = #tpu.dot_dimension_numbers<[1], [0], [0], [1], [0, 0, 1, 1], [], []>} : vector<16x32xbf16>, vector<32x2048xbf16>, vector<16x2048xf32> -> vector<16x2048xf32>
    %c0_146 = arith.constant 0 : index
    %c0_147 = arith.constant 0 : index
    %c0_148 = arith.constant 0 : index
    %233 = vector.load %arg14[%c0_146, %c0_147, %c0_148] : memref<2x1x2048xf32, #tpu.memory_space<vmem>>, vector<1x1x2048xf32>
    %234 = vector.shape_cast %233 : vector<1x1x2048xf32> to vector<1x2048xf32>
    %235 = vector.broadcast %234 : vector<1x2048xf32> to vector<16x2048xf32>
    %236 = arith.addf %232, %235 : vector<16x2048xf32>
    %cst_149 = arith.constant 0.000000e+00 : f32
    %237 = vector.broadcast %cst_149 : f32 to vector<16x2048xf32>
    %238 = arith.maximumf %236, %237 : vector<16x2048xf32>
    %239 = arith.truncf %238 : vector<16x2048xf32> to vector<16x2048xbf16>
    %c0_150 = arith.constant 0 : index
    %c0_151 = arith.constant 0 : index
    %c0_152 = arith.constant 0 : index
    %240 = vector.load %arg15[%c0_150, %c0_151, %c0_152] : memref<2x2048x32xbf16, #tpu.memory_space<vmem>>, vector<1x2048x32xbf16>
    %241 = vector.shape_cast %240 : vector<1x2048x32xbf16> to vector<2048x32xbf16>
    %cst_153 = arith.constant dense<0.000000e+00> : vector<16x32xf32>
    %242 = tpu.matmul %239, %241, %cst_153 {dimension_numbers = #tpu.dot_dimension_numbers<[1], [0], [0], [1], [0, 0, 1, 1], [], []>} : vector<16x2048xbf16>, vector<2048x32xbf16>, vector<16x32xf32> -> vector<16x32xf32>
    %c0_154 = arith.constant 0 : index
    %c0_155 = arith.constant 0 : index
    %c0_156 = arith.constant 0 : index
    %243 = vector.load %arg16[%c0_154, %c0_155, %c0_156] : memref<2x1x32xf32, #tpu.memory_space<vmem>>, vector<1x1x32xf32>
    %244 = vector.shape_cast %243 : vector<1x1x32xf32> to vector<1x32xf32>
    %245 = vector.broadcast %244 : vector<1x32xf32> to vector<16x32xf32>
    %246 = arith.addf %242, %245 : vector<16x32xf32>
    %247 = arith.addf %228, %246 : vector<16x32xf32>
    %c0_157 = arith.constant 0 : index
    %c0_158 = arith.constant 0 : index
    %c0_159 = arith.constant 0 : index
    %248 = vector.load %arg17[%c0_157, %c0_158, %c0_159] : memref<2x1x32xf32, #tpu.memory_space<vmem>>, vector<1x1x32xf32>
    %249 = vector.shape_cast %248 : vector<1x1x32xf32> to vector<1x32xf32>
    %c0_160 = arith.constant 0 : index
    %c0_161 = arith.constant 0 : index
    %c0_162 = arith.constant 0 : index
    %250 = vector.load %arg18[%c0_160, %c0_161, %c0_162] : memref<2x1x32xf32, #tpu.memory_space<vmem>>, vector<1x1x32xf32>
    %251 = vector.shape_cast %250 : vector<1x1x32xf32> to vector<1x32xf32>
    %cst_163 = arith.constant dense<0.000000e+00> : vector<16xf32>
    %252 = vector.multi_reduction <add>, %247, %cst_163 [1] : vector<16x32xf32> to vector<16xf32>
    %253 = vector.shape_cast %252 : vector<16xf32> to vector<16x1xf32>
    %cst_164 = arith.constant 3.200000e+01 : f32
    %254 = vector.broadcast %cst_164 : f32 to vector<16x1xf32>
    %255 = arith.divf %253, %254 : vector<16x1xf32>
    %256 = vector.broadcast %255 : vector<16x1xf32> to vector<16x32xf32>
    %257 = arith.subf %247, %256 : vector<16x32xf32>
    %258 = arith.mulf %257, %257 : vector<16x32xf32>
    %cst_165 = arith.constant dense<0.000000e+00> : vector<16xf32>
    %259 = vector.multi_reduction <add>, %258, %cst_165 [1] : vector<16x32xf32> to vector<16xf32>
    %260 = vector.shape_cast %259 : vector<16xf32> to vector<16x1xf32>
    %cst_166 = arith.constant 3.200000e+01 : f32
    %261 = vector.broadcast %cst_166 : f32 to vector<16x1xf32>
    %262 = arith.divf %260, %261 : vector<16x1xf32>
    %263 = vector.broadcast %255 : vector<16x1xf32> to vector<16x32xf32>
    %264 = arith.subf %247, %263 : vector<16x32xf32>
    %cst_167 = arith.constant 9.99999974E-6 : f32
    %265 = vector.broadcast %cst_167 : f32 to vector<16x1xf32>
    %266 = arith.addf %262, %265 : vector<16x1xf32>
    %267 = math.rsqrt %266 : vector<16x1xf32>
    %268 = vector.broadcast %267 : vector<16x1xf32> to vector<16x32xf32>
    %269 = arith.mulf %264, %268 : vector<16x32xf32>
    %270 = vector.broadcast %249 : vector<1x32xf32> to vector<16x32xf32>
    %271 = arith.mulf %269, %270 : vector<16x32xf32>
    %272 = vector.broadcast %251 : vector<1x32xf32> to vector<16x32xf32>
    %273 = arith.addf %271, %272 : vector<16x32xf32>
    %cst_168 = arith.constant 0.000000e+00 : f32
    %274 = vector.broadcast %cst_168 : f32 to vector<16x32xf32>
    %c4 = arith.constant 4 : index
    %c0_169 = arith.constant 0 : index
    %c0_170 = arith.constant 0 : index
    %275 = vector.load %arg3[%c4, %c0_169, %c0_170] : memref<8x32x8xf32, #tpu.memory_space<vmem>>, vector<1x32x8xf32>
    %276 = vector.shape_cast %275 : vector<1x32x8xf32> to vector<32x8xf32>
    %cst_171 = arith.constant dense<0.000000e+00> : vector<16x8xf32>
    %277 = tpu.matmul %273, %276, %cst_171 {dimension_numbers = #tpu.dot_dimension_numbers<[1], [0], [0], [1], [0, 0, 1, 1], [], []>} : vector<16x32xf32>, vector<32x8xf32>, vector<16x8xf32> -> vector<16x8xf32>
    %c4_172 = arith.constant 4 : index
    %c0_173 = arith.constant 0 : index
    %c0_174 = arith.constant 0 : index
    %278 = vector.load %arg6[%c4_172, %c0_173, %c0_174] : memref<8x1x8xf32, #tpu.memory_space<vmem>>, vector<1x1x8xf32>
    %279 = vector.shape_cast %278 : vector<1x1x8xf32> to vector<1x8xf32>
    %280 = vector.broadcast %279 : vector<1x8xf32> to vector<16x8xf32>
    %281 = arith.addf %277, %280 : vector<16x8xf32>
    %282 = vector.shape_cast %281 : vector<16x8xf32> to vector<2x8x8xf32>
    %c4_175 = arith.constant 4 : index
    %c0_176 = arith.constant 0 : index
    %c0_177 = arith.constant 0 : index
    %283 = vector.load %arg4[%c4_175, %c0_176, %c0_177] : memref<8x32x8xf32, #tpu.memory_space<vmem>>, vector<1x32x8xf32>
    %284 = vector.shape_cast %283 : vector<1x32x8xf32> to vector<32x8xf32>
    %cst_178 = arith.constant dense<0.000000e+00> : vector<16x8xf32>
    %285 = tpu.matmul %273, %284, %cst_178 {dimension_numbers = #tpu.dot_dimension_numbers<[1], [0], [0], [1], [0, 0, 1, 1], [], []>} : vector<16x32xf32>, vector<32x8xf32>, vector<16x8xf32> -> vector<16x8xf32>
    %c4_179 = arith.constant 4 : index
    %c0_180 = arith.constant 0 : index
    %c0_181 = arith.constant 0 : index
    %286 = vector.load %arg7[%c4_179, %c0_180, %c0_181] : memref<8x1x8xf32, #tpu.memory_space<vmem>>, vector<1x1x8xf32>
    %287 = vector.shape_cast %286 : vector<1x1x8xf32> to vector<1x8xf32>
    %288 = vector.broadcast %287 : vector<1x8xf32> to vector<16x8xf32>
    %289 = arith.addf %285, %288 : vector<16x8xf32>
    %290 = vector.shape_cast %289 : vector<16x8xf32> to vector<2x8x8xf32>
    %c4_182 = arith.constant 4 : index
    %c0_183 = arith.constant 0 : index
    %c0_184 = arith.constant 0 : index
    %291 = vector.load %arg5[%c4_182, %c0_183, %c0_184] : memref<8x32x8xf32, #tpu.memory_space<vmem>>, vector<1x32x8xf32>
    %292 = vector.shape_cast %291 : vector<1x32x8xf32> to vector<32x8xf32>
    %cst_185 = arith.constant dense<0.000000e+00> : vector<16x8xf32>
    %293 = tpu.matmul %273, %292, %cst_185 {dimension_numbers = #tpu.dot_dimension_numbers<[1], [0], [0], [1], [0, 0, 1, 1], [], []>} : vector<16x32xf32>, vector<32x8xf32>, vector<16x8xf32> -> vector<16x8xf32>
    %c4_186 = arith.constant 4 : index
    %c0_187 = arith.constant 0 : index
    %c0_188 = arith.constant 0 : index
    %294 = vector.load %arg8[%c4_186, %c0_187, %c0_188] : memref<8x1x8xf32, #tpu.memory_space<vmem>>, vector<1x1x8xf32>
    %295 = vector.shape_cast %294 : vector<1x1x8xf32> to vector<1x8xf32>
    %296 = vector.broadcast %295 : vector<1x8xf32> to vector<16x8xf32>
    %297 = arith.addf %293, %296 : vector<16x8xf32>
    %298 = vector.shape_cast %297 : vector<16x8xf32> to vector<2x8x8xf32>
    "tpu.trace_start"() <{level = 10 : i32, message = "bqd,bkd->bqk"}> : () -> ()
    %cst_189 = arith.constant dense<0.000000e+00> : vector<2x8x8xf32>
    %299 = tpu.matmul %282, %290, %cst_189 {dimension_numbers = #tpu.dot_dimension_numbers<[2], [2], [1], [1], [0, 0, 0, 1, 1, 1], [0], [0]>} : vector<2x8x8xf32>, vector<2x8x8xf32>, vector<2x8x8xf32> -> vector<2x8x8xf32>
    "tpu.trace_stop"() : () -> ()
    %cst_190 = arith.constant 0.353553385 : f32
    %300 = vector.broadcast %cst_190 : f32 to vector<2x8x8xf32>
    %301 = arith.mulf %299, %300 : vector<2x8x8xf32>
    %302 = vector.broadcast %20 : vector<1x8x8xf32> to vector<2x8x8xf32>
    %303 = arith.addf %301, %302 : vector<2x8x8xf32>
    %cst_191 = arith.constant dense<0xFF800000> : vector<2x8xf32>
    %304 = vector.multi_reduction <maximumf>, %303, %cst_191 [2] : vector<2x8x8xf32> to vector<2x8xf32>
    %305 = vector.shape_cast %304 : vector<2x8xf32> to vector<2x8x1xf32>
    %306 = vector.broadcast %305 : vector<2x8x1xf32> to vector<2x8x8xf32>
    %307 = arith.subf %303, %306 : vector<2x8x8xf32>
    %308 = math.exp %307 : vector<2x8x8xf32>
    %cst_192 = arith.constant dense<0.000000e+00> : vector<2x8xf32>
    %309 = vector.multi_reduction <add>, %308, %cst_192 [2] : vector<2x8x8xf32> to vector<2x8xf32>
    %310 = vector.shape_cast %309 : vector<2x8xf32> to vector<2x8x1xf32>
    %311 = vector.broadcast %310 : vector<2x8x1xf32> to vector<2x8x8xf32>
    %312 = arith.divf %308, %311 : vector<2x8x8xf32>
    "tpu.trace_start"() <{level = 10 : i32, message = "bqk,bkd->bqd"}> : () -> ()
    %cst_193 = arith.constant dense<0.000000e+00> : vector<2x8x8xf32>
    %313 = tpu.matmul %312, %298, %cst_193 {dimension_numbers = #tpu.dot_dimension_numbers<[2], [1], [1], [2], [0, 0, 0, 1, 1, 2], [0], [0]>} : vector<2x8x8xf32>, vector<2x8x8xf32>, vector<2x8x8xf32> -> vector<2x8x8xf32>
    "tpu.trace_stop"() : () -> ()
    %314 = vector.shape_cast %313 : vector<2x8x8xf32> to vector<16x8xf32>
    %c4_194 = arith.constant 4 : index
    %c0_195 = arith.constant 0 : index
    %c0_196 = arith.constant 0 : index
    %315 = vector.load %arg9[%c4_194, %c0_195, %c0_196] : memref<8x8x32xf32, #tpu.memory_space<vmem>>, vector<1x8x32xf32>
    %316 = vector.shape_cast %315 : vector<1x8x32xf32> to vector<8x32xf32>
    %cst_197 = arith.constant dense<0.000000e+00> : vector<16x32xf32>
    %317 = tpu.matmul %314, %316, %cst_197 {dimension_numbers = #tpu.dot_dimension_numbers<[1], [0], [0], [1], [0, 0, 1, 1], [], []>} : vector<16x8xf32>, vector<8x32xf32>, vector<16x32xf32> -> vector<16x32xf32>
    %318 = arith.addf %274, %317 : vector<16x32xf32>
    %c5 = arith.constant 5 : index
    %c0_198 = arith.constant 0 : index
    %c0_199 = arith.constant 0 : index
    %319 = vector.load %arg3[%c5, %c0_198, %c0_199] : memref<8x32x8xf32, #tpu.memory_space<vmem>>, vector<1x32x8xf32>
    %320 = vector.shape_cast %319 : vector<1x32x8xf32> to vector<32x8xf32>
    %cst_200 = arith.constant dense<0.000000e+00> : vector<16x8xf32>
    %321 = tpu.matmul %273, %320, %cst_200 {dimension_numbers = #tpu.dot_dimension_numbers<[1], [0], [0], [1], [0, 0, 1, 1], [], []>} : vector<16x32xf32>, vector<32x8xf32>, vector<16x8xf32> -> vector<16x8xf32>
    %c5_201 = arith.constant 5 : index
    %c0_202 = arith.constant 0 : index
    %c0_203 = arith.constant 0 : index
    %322 = vector.load %arg6[%c5_201, %c0_202, %c0_203] : memref<8x1x8xf32, #tpu.memory_space<vmem>>, vector<1x1x8xf32>
    %323 = vector.shape_cast %322 : vector<1x1x8xf32> to vector<1x8xf32>
    %324 = vector.broadcast %323 : vector<1x8xf32> to vector<16x8xf32>
    %325 = arith.addf %321, %324 : vector<16x8xf32>
    %326 = vector.shape_cast %325 : vector<16x8xf32> to vector<2x8x8xf32>
    %c5_204 = arith.constant 5 : index
    %c0_205 = arith.constant 0 : index
    %c0_206 = arith.constant 0 : index
    %327 = vector.load %arg4[%c5_204, %c0_205, %c0_206] : memref<8x32x8xf32, #tpu.memory_space<vmem>>, vector<1x32x8xf32>
    %328 = vector.shape_cast %327 : vector<1x32x8xf32> to vector<32x8xf32>
    %cst_207 = arith.constant dense<0.000000e+00> : vector<16x8xf32>
    %329 = tpu.matmul %273, %328, %cst_207 {dimension_numbers = #tpu.dot_dimension_numbers<[1], [0], [0], [1], [0, 0, 1, 1], [], []>} : vector<16x32xf32>, vector<32x8xf32>, vector<16x8xf32> -> vector<16x8xf32>
    %c5_208 = arith.constant 5 : index
    %c0_209 = arith.constant 0 : index
    %c0_210 = arith.constant 0 : index
    %330 = vector.load %arg7[%c5_208, %c0_209, %c0_210] : memref<8x1x8xf32, #tpu.memory_space<vmem>>, vector<1x1x8xf32>
    %331 = vector.shape_cast %330 : vector<1x1x8xf32> to vector<1x8xf32>
    %332 = vector.broadcast %331 : vector<1x8xf32> to vector<16x8xf32>
    %333 = arith.addf %329, %332 : vector<16x8xf32>
    %334 = vector.shape_cast %333 : vector<16x8xf32> to vector<2x8x8xf32>
    %c5_211 = arith.constant 5 : index
    %c0_212 = arith.constant 0 : index
    %c0_213 = arith.constant 0 : index
    %335 = vector.load %arg5[%c5_211, %c0_212, %c0_213] : memref<8x32x8xf32, #tpu.memory_space<vmem>>, vector<1x32x8xf32>
    %336 = vector.shape_cast %335 : vector<1x32x8xf32> to vector<32x8xf32>
    %cst_214 = arith.constant dense<0.000000e+00> : vector<16x8xf32>
    %337 = tpu.matmul %273, %336, %cst_214 {dimension_numbers = #tpu.dot_dimension_numbers<[1], [0], [0], [1], [0, 0, 1, 1], [], []>} : vector<16x32xf32>, vector<32x8xf32>, vector<16x8xf32> -> vector<16x8xf32>
    %c5_215 = arith.constant 5 : index
    %c0_216 = arith.constant 0 : index
    %c0_217 = arith.constant 0 : index
    %338 = vector.load %arg8[%c5_215, %c0_216, %c0_217] : memref<8x1x8xf32, #tpu.memory_space<vmem>>, vector<1x1x8xf32>
    %339 = vector.shape_cast %338 : vector<1x1x8xf32> to vector<1x8xf32>
    %340 = vector.broadcast %339 : vector<1x8xf32> to vector<16x8xf32>
    %341 = arith.addf %337, %340 : vector<16x8xf32>
    %342 = vector.shape_cast %341 : vector<16x8xf32> to vector<2x8x8xf32>
    "tpu.trace_start"() <{level = 10 : i32, message = "bqd,bkd->bqk"}> : () -> ()
    %cst_218 = arith.constant dense<0.000000e+00> : vector<2x8x8xf32>
    %343 = tpu.matmul %326, %334, %cst_218 {dimension_numbers = #tpu.dot_dimension_numbers<[2], [2], [1], [1], [0, 0, 0, 1, 1, 1], [0], [0]>} : vector<2x8x8xf32>, vector<2x8x8xf32>, vector<2x8x8xf32> -> vector<2x8x8xf32>
    "tpu.trace_stop"() : () -> ()
    %cst_219 = arith.constant 0.353553385 : f32
    %344 = vector.broadcast %cst_219 : f32 to vector<2x8x8xf32>
    %345 = arith.mulf %343, %344 : vector<2x8x8xf32>
    %346 = vector.broadcast %20 : vector<1x8x8xf32> to vector<2x8x8xf32>
    %347 = arith.addf %345, %346 : vector<2x8x8xf32>
    %cst_220 = arith.constant dense<0xFF800000> : vector<2x8xf32>
    %348 = vector.multi_reduction <maximumf>, %347, %cst_220 [2] : vector<2x8x8xf32> to vector<2x8xf32>
    %349 = vector.shape_cast %348 : vector<2x8xf32> to vector<2x8x1xf32>
    %350 = vector.broadcast %349 : vector<2x8x1xf32> to vector<2x8x8xf32>
    %351 = arith.subf %347, %350 : vector<2x8x8xf32>
    %352 = math.exp %351 : vector<2x8x8xf32>
    %cst_221 = arith.constant dense<0.000000e+00> : vector<2x8xf32>
    %353 = vector.multi_reduction <add>, %352, %cst_221 [2] : vector<2x8x8xf32> to vector<2x8xf32>
    %354 = vector.shape_cast %353 : vector<2x8xf32> to vector<2x8x1xf32>
    %355 = vector.broadcast %354 : vector<2x8x1xf32> to vector<2x8x8xf32>
    %356 = arith.divf %352, %355 : vector<2x8x8xf32>
    "tpu.trace_start"() <{level = 10 : i32, message = "bqk,bkd->bqd"}> : () -> ()
    %cst_222 = arith.constant dense<0.000000e+00> : vector<2x8x8xf32>
    %357 = tpu.matmul %356, %342, %cst_222 {dimension_numbers = #tpu.dot_dimension_numbers<[2], [1], [1], [2], [0, 0, 0, 1, 1, 2], [0], [0]>} : vector<2x8x8xf32>, vector<2x8x8xf32>, vector<2x8x8xf32> -> vector<2x8x8xf32>
    "tpu.trace_stop"() : () -> ()
    %358 = vector.shape_cast %357 : vector<2x8x8xf32> to vector<16x8xf32>
    %c5_223 = arith.constant 5 : index
    %c0_224 = arith.constant 0 : index
    %c0_225 = arith.constant 0 : index
    %359 = vector.load %arg9[%c5_223, %c0_224, %c0_225] : memref<8x8x32xf32, #tpu.memory_space<vmem>>, vector<1x8x32xf32>
    %360 = vector.shape_cast %359 : vector<1x8x32xf32> to vector<8x32xf32>
    %cst_226 = arith.constant dense<0.000000e+00> : vector<16x32xf32>
    %361 = tpu.matmul %358, %360, %cst_226 {dimension_numbers = #tpu.dot_dimension_numbers<[1], [0], [0], [1], [0, 0, 1, 1], [], []>} : vector<16x8xf32>, vector<8x32xf32>, vector<16x32xf32> -> vector<16x32xf32>
    %362 = arith.addf %318, %361 : vector<16x32xf32>
    %c6 = arith.constant 6 : index
    %c0_227 = arith.constant 0 : index
    %c0_228 = arith.constant 0 : index
    %363 = vector.load %arg3[%c6, %c0_227, %c0_228] : memref<8x32x8xf32, #tpu.memory_space<vmem>>, vector<1x32x8xf32>
    %364 = vector.shape_cast %363 : vector<1x32x8xf32> to vector<32x8xf32>
    %cst_229 = arith.constant dense<0.000000e+00> : vector<16x8xf32>
    %365 = tpu.matmul %273, %364, %cst_229 {dimension_numbers = #tpu.dot_dimension_numbers<[1], [0], [0], [1], [0, 0, 1, 1], [], []>} : vector<16x32xf32>, vector<32x8xf32>, vector<16x8xf32> -> vector<16x8xf32>
    %c6_230 = arith.constant 6 : index
    %c0_231 = arith.constant 0 : index
    %c0_232 = arith.constant 0 : index
    %366 = vector.load %arg6[%c6_230, %c0_231, %c0_232] : memref<8x1x8xf32, #tpu.memory_space<vmem>>, vector<1x1x8xf32>
    %367 = vector.shape_cast %366 : vector<1x1x8xf32> to vector<1x8xf32>
    %368 = vector.broadcast %367 : vector<1x8xf32> to vector<16x8xf32>
    %369 = arith.addf %365, %368 : vector<16x8xf32>
    %370 = vector.shape_cast %369 : vector<16x8xf32> to vector<2x8x8xf32>
    %c6_233 = arith.constant 6 : index
    %c0_234 = arith.constant 0 : index
    %c0_235 = arith.constant 0 : index
    %371 = vector.load %arg4[%c6_233, %c0_234, %c0_235] : memref<8x32x8xf32, #tpu.memory_space<vmem>>, vector<1x32x8xf32>
    %372 = vector.shape_cast %371 : vector<1x32x8xf32> to vector<32x8xf32>
    %cst_236 = arith.constant dense<0.000000e+00> : vector<16x8xf32>
    %373 = tpu.matmul %273, %372, %cst_236 {dimension_numbers = #tpu.dot_dimension_numbers<[1], [0], [0], [1], [0, 0, 1, 1], [], []>} : vector<16x32xf32>, vector<32x8xf32>, vector<16x8xf32> -> vector<16x8xf32>
    %c6_237 = arith.constant 6 : index
    %c0_238 = arith.constant 0 : index
    %c0_239 = arith.constant 0 : index
    %374 = vector.load %arg7[%c6_237, %c0_238, %c0_239] : memref<8x1x8xf32, #tpu.memory_space<vmem>>, vector<1x1x8xf32>
    %375 = vector.shape_cast %374 : vector<1x1x8xf32> to vector<1x8xf32>
    %376 = vector.broadcast %375 : vector<1x8xf32> to vector<16x8xf32>
    %377 = arith.addf %373, %376 : vector<16x8xf32>
    %378 = vector.shape_cast %377 : vector<16x8xf32> to vector<2x8x8xf32>
    %c6_240 = arith.constant 6 : index
    %c0_241 = arith.constant 0 : index
    %c0_242 = arith.constant 0 : index
    %379 = vector.load %arg5[%c6_240, %c0_241, %c0_242] : memref<8x32x8xf32, #tpu.memory_space<vmem>>, vector<1x32x8xf32>
    %380 = vector.shape_cast %379 : vector<1x32x8xf32> to vector<32x8xf32>
    %cst_243 = arith.constant dense<0.000000e+00> : vector<16x8xf32>
    %381 = tpu.matmul %273, %380, %cst_243 {dimension_numbers = #tpu.dot_dimension_numbers<[1], [0], [0], [1], [0, 0, 1, 1], [], []>} : vector<16x32xf32>, vector<32x8xf32>, vector<16x8xf32> -> vector<16x8xf32>
    %c6_244 = arith.constant 6 : index
    %c0_245 = arith.constant 0 : index
    %c0_246 = arith.constant 0 : index
    %382 = vector.load %arg8[%c6_244, %c0_245, %c0_246] : memref<8x1x8xf32, #tpu.memory_space<vmem>>, vector<1x1x8xf32>
    %383 = vector.shape_cast %382 : vector<1x1x8xf32> to vector<1x8xf32>
    %384 = vector.broadcast %383 : vector<1x8xf32> to vector<16x8xf32>
    %385 = arith.addf %381, %384 : vector<16x8xf32>
    %386 = vector.shape_cast %385 : vector<16x8xf32> to vector<2x8x8xf32>
    "tpu.trace_start"() <{level = 10 : i32, message = "bqd,bkd->bqk"}> : () -> ()
    %cst_247 = arith.constant dense<0.000000e+00> : vector<2x8x8xf32>
    %387 = tpu.matmul %370, %378, %cst_247 {dimension_numbers = #tpu.dot_dimension_numbers<[2], [2], [1], [1], [0, 0, 0, 1, 1, 1], [0], [0]>} : vector<2x8x8xf32>, vector<2x8x8xf32>, vector<2x8x8xf32> -> vector<2x8x8xf32>
    "tpu.trace_stop"() : () -> ()
    %cst_248 = arith.constant 0.353553385 : f32
    %388 = vector.broadcast %cst_248 : f32 to vector<2x8x8xf32>
    %389 = arith.mulf %387, %388 : vector<2x8x8xf32>
    %390 = vector.broadcast %20 : vector<1x8x8xf32> to vector<2x8x8xf32>
    %391 = arith.addf %389, %390 : vector<2x8x8xf32>
    %cst_249 = arith.constant dense<0xFF800000> : vector<2x8xf32>
    %392 = vector.multi_reduction <maximumf>, %391, %cst_249 [2] : vector<2x8x8xf32> to vector<2x8xf32>
    %393 = vector.shape_cast %392 : vector<2x8xf32> to vector<2x8x1xf32>
    %394 = vector.broadcast %393 : vector<2x8x1xf32> to vector<2x8x8xf32>
    %395 = arith.subf %391, %394 : vector<2x8x8xf32>
    %396 = math.exp %395 : vector<2x8x8xf32>
    %cst_250 = arith.constant dense<0.000000e+00> : vector<2x8xf32>
    %397 = vector.multi_reduction <add>, %396, %cst_250 [2] : vector<2x8x8xf32> to vector<2x8xf32>
    %398 = vector.shape_cast %397 : vector<2x8xf32> to vector<2x8x1xf32>
    %399 = vector.broadcast %398 : vector<2x8x1xf32> to vector<2x8x8xf32>
    %400 = arith.divf %396, %399 : vector<2x8x8xf32>
    "tpu.trace_start"() <{level = 10 : i32, message = "bqk,bkd->bqd"}> : () -> ()
    %cst_251 = arith.constant dense<0.000000e+00> : vector<2x8x8xf32>
    %401 = tpu.matmul %400, %386, %cst_251 {dimension_numbers = #tpu.dot_dimension_numbers<[2], [1], [1], [2], [0, 0, 0, 1, 1, 2], [0], [0]>} : vector<2x8x8xf32>, vector<2x8x8xf32>, vector<2x8x8xf32> -> vector<2x8x8xf32>
    "tpu.trace_stop"() : () -> ()
    %402 = vector.shape_cast %401 : vector<2x8x8xf32> to vector<16x8xf32>
    %c6_252 = arith.constant 6 : index
    %c0_253 = arith.constant 0 : index
    %c0_254 = arith.constant 0 : index
    %403 = vector.load %arg9[%c6_252, %c0_253, %c0_254] : memref<8x8x32xf32, #tpu.memory_space<vmem>>, vector<1x8x32xf32>
    %404 = vector.shape_cast %403 : vector<1x8x32xf32> to vector<8x32xf32>
    %cst_255 = arith.constant dense<0.000000e+00> : vector<16x32xf32>
    %405 = tpu.matmul %402, %404, %cst_255 {dimension_numbers = #tpu.dot_dimension_numbers<[1], [0], [0], [1], [0, 0, 1, 1], [], []>} : vector<16x8xf32>, vector<8x32xf32>, vector<16x32xf32> -> vector<16x32xf32>
    %406 = arith.addf %362, %405 : vector<16x32xf32>
    %c7 = arith.constant 7 : index
    %c0_256 = arith.constant 0 : index
    %c0_257 = arith.constant 0 : index
    %407 = vector.load %arg3[%c7, %c0_256, %c0_257] : memref<8x32x8xf32, #tpu.memory_space<vmem>>, vector<1x32x8xf32>
    %408 = vector.shape_cast %407 : vector<1x32x8xf32> to vector<32x8xf32>
    %cst_258 = arith.constant dense<0.000000e+00> : vector<16x8xf32>
    %409 = tpu.matmul %273, %408, %cst_258 {dimension_numbers = #tpu.dot_dimension_numbers<[1], [0], [0], [1], [0, 0, 1, 1], [], []>} : vector<16x32xf32>, vector<32x8xf32>, vector<16x8xf32> -> vector<16x8xf32>
    %c7_259 = arith.constant 7 : index
    %c0_260 = arith.constant 0 : index
    %c0_261 = arith.constant 0 : index
    %410 = vector.load %arg6[%c7_259, %c0_260, %c0_261] : memref<8x1x8xf32, #tpu.memory_space<vmem>>, vector<1x1x8xf32>
    %411 = vector.shape_cast %410 : vector<1x1x8xf32> to vector<1x8xf32>
    %412 = vector.broadcast %411 : vector<1x8xf32> to vector<16x8xf32>
    %413 = arith.addf %409, %412 : vector<16x8xf32>
    %414 = vector.shape_cast %413 : vector<16x8xf32> to vector<2x8x8xf32>
    %c7_262 = arith.constant 7 : index
    %c0_263 = arith.constant 0 : index
    %c0_264 = arith.constant 0 : index
    %415 = vector.load %arg4[%c7_262, %c0_263, %c0_264] : memref<8x32x8xf32, #tpu.memory_space<vmem>>, vector<1x32x8xf32>
    %416 = vector.shape_cast %415 : vector<1x32x8xf32> to vector<32x8xf32>
    %cst_265 = arith.constant dense<0.000000e+00> : vector<16x8xf32>
    %417 = tpu.matmul %273, %416, %cst_265 {dimension_numbers = #tpu.dot_dimension_numbers<[1], [0], [0], [1], [0, 0, 1, 1], [], []>} : vector<16x32xf32>, vector<32x8xf32>, vector<16x8xf32> -> vector<16x8xf32>
    %c7_266 = arith.constant 7 : index
    %c0_267 = arith.constant 0 : index
    %c0_268 = arith.constant 0 : index
    %418 = vector.load %arg7[%c7_266, %c0_267, %c0_268] : memref<8x1x8xf32, #tpu.memory_space<vmem>>, vector<1x1x8xf32>
    %419 = vector.shape_cast %418 : vector<1x1x8xf32> to vector<1x8xf32>
    %420 = vector.broadcast %419 : vector<1x8xf32> to vector<16x8xf32>
    %421 = arith.addf %417, %420 : vector<16x8xf32>
    %422 = vector.shape_cast %421 : vector<16x8xf32> to vector<2x8x8xf32>
    %c7_269 = arith.constant 7 : index
    %c0_270 = arith.constant 0 : index
    %c0_271 = arith.constant 0 : index
    %423 = vector.load %arg5[%c7_269, %c0_270, %c0_271] : memref<8x32x8xf32, #tpu.memory_space<vmem>>, vector<1x32x8xf32>
    %424 = vector.shape_cast %423 : vector<1x32x8xf32> to vector<32x8xf32>
    %cst_272 = arith.constant dense<0.000000e+00> : vector<16x8xf32>
    %425 = tpu.matmul %273, %424, %cst_272 {dimension_numbers = #tpu.dot_dimension_numbers<[1], [0], [0], [1], [0, 0, 1, 1], [], []>} : vector<16x32xf32>, vector<32x8xf32>, vector<16x8xf32> -> vector<16x8xf32>
    %c7_273 = arith.constant 7 : index
    %c0_274 = arith.constant 0 : index
    %c0_275 = arith.constant 0 : index
    %426 = vector.load %arg8[%c7_273, %c0_274, %c0_275] : memref<8x1x8xf32, #tpu.memory_space<vmem>>, vector<1x1x8xf32>
    %427 = vector.shape_cast %426 : vector<1x1x8xf32> to vector<1x8xf32>
    %428 = vector.broadcast %427 : vector<1x8xf32> to vector<16x8xf32>
    %429 = arith.addf %425, %428 : vector<16x8xf32>
    %430 = vector.shape_cast %429 : vector<16x8xf32> to vector<2x8x8xf32>
    "tpu.trace_start"() <{level = 10 : i32, message = "bqd,bkd->bqk"}> : () -> ()
    %cst_276 = arith.constant dense<0.000000e+00> : vector<2x8x8xf32>
    %431 = tpu.matmul %414, %422, %cst_276 {dimension_numbers = #tpu.dot_dimension_numbers<[2], [2], [1], [1], [0, 0, 0, 1, 1, 1], [0], [0]>} : vector<2x8x8xf32>, vector<2x8x8xf32>, vector<2x8x8xf32> -> vector<2x8x8xf32>
    "tpu.trace_stop"() : () -> ()
    %cst_277 = arith.constant 0.353553385 : f32
    %432 = vector.broadcast %cst_277 : f32 to vector<2x8x8xf32>
    %433 = arith.mulf %431, %432 : vector<2x8x8xf32>
    %434 = vector.broadcast %20 : vector<1x8x8xf32> to vector<2x8x8xf32>
    %435 = arith.addf %433, %434 : vector<2x8x8xf32>
    %cst_278 = arith.constant dense<0xFF800000> : vector<2x8xf32>
    %436 = vector.multi_reduction <maximumf>, %435, %cst_278 [2] : vector<2x8x8xf32> to vector<2x8xf32>
    %437 = vector.shape_cast %436 : vector<2x8xf32> to vector<2x8x1xf32>
    %438 = vector.broadcast %437 : vector<2x8x1xf32> to vector<2x8x8xf32>
    %439 = arith.subf %435, %438 : vector<2x8x8xf32>
    %440 = math.exp %439 : vector<2x8x8xf32>
    %cst_279 = arith.constant dense<0.000000e+00> : vector<2x8xf32>
    %441 = vector.multi_reduction <add>, %440, %cst_279 [2] : vector<2x8x8xf32> to vector<2x8xf32>
    %442 = vector.shape_cast %441 : vector<2x8xf32> to vector<2x8x1xf32>
    %443 = vector.broadcast %442 : vector<2x8x1xf32> to vector<2x8x8xf32>
    %444 = arith.divf %440, %443 : vector<2x8x8xf32>
    "tpu.trace_start"() <{level = 10 : i32, message = "bqk,bkd->bqd"}> : () -> ()
    %cst_280 = arith.constant dense<0.000000e+00> : vector<2x8x8xf32>
    %445 = tpu.matmul %444, %430, %cst_280 {dimension_numbers = #tpu.dot_dimension_numbers<[2], [1], [1], [2], [0, 0, 0, 1, 1, 2], [0], [0]>} : vector<2x8x8xf32>, vector<2x8x8xf32>, vector<2x8x8xf32> -> vector<2x8x8xf32>
    "tpu.trace_stop"() : () -> ()
    %446 = vector.shape_cast %445 : vector<2x8x8xf32> to vector<16x8xf32>
    %c7_281 = arith.constant 7 : index
    %c0_282 = arith.constant 0 : index
    %c0_283 = arith.constant 0 : index
    %447 = vector.load %arg9[%c7_281, %c0_282, %c0_283] : memref<8x8x32xf32, #tpu.memory_space<vmem>>, vector<1x8x32xf32>
    %448 = vector.shape_cast %447 : vector<1x8x32xf32> to vector<8x32xf32>
    %cst_284 = arith.constant dense<0.000000e+00> : vector<16x32xf32>
    %449 = tpu.matmul %446, %448, %cst_284 {dimension_numbers = #tpu.dot_dimension_numbers<[1], [0], [0], [1], [0, 0, 1, 1], [], []>} : vector<16x8xf32>, vector<8x32xf32>, vector<16x32xf32> -> vector<16x32xf32>
    %450 = arith.addf %406, %449 : vector<16x32xf32>
    %c1_285 = arith.constant 1 : index
    %c0_286 = arith.constant 0 : index
    %c0_287 = arith.constant 0 : index
    %451 = vector.load %arg10[%c1_285, %c0_286, %c0_287] : memref<2x1x32xf32, #tpu.memory_space<vmem>>, vector<1x1x32xf32>
    %452 = vector.shape_cast %451 : vector<1x1x32xf32> to vector<1x32xf32>
    %453 = vector.broadcast %452 : vector<1x32xf32> to vector<16x32xf32>
    %454 = arith.addf %450, %453 : vector<16x32xf32>
    %455 = arith.addf %273, %454 : vector<16x32xf32>
    %c1_288 = arith.constant 1 : index
    %c0_289 = arith.constant 0 : index
    %c0_290 = arith.constant 0 : index
    %456 = vector.load %arg11[%c1_288, %c0_289, %c0_290] : memref<2x1x32xf32, #tpu.memory_space<vmem>>, vector<1x1x32xf32>
    %457 = vector.shape_cast %456 : vector<1x1x32xf32> to vector<1x32xf32>
    %c1_291 = arith.constant 1 : index
    %c0_292 = arith.constant 0 : index
    %c0_293 = arith.constant 0 : index
    %458 = vector.load %arg12[%c1_291, %c0_292, %c0_293] : memref<2x1x32xf32, #tpu.memory_space<vmem>>, vector<1x1x32xf32>
    %459 = vector.shape_cast %458 : vector<1x1x32xf32> to vector<1x32xf32>
    %cst_294 = arith.constant dense<0.000000e+00> : vector<16xf32>
    %460 = vector.multi_reduction <add>, %455, %cst_294 [1] : vector<16x32xf32> to vector<16xf32>
    %461 = vector.shape_cast %460 : vector<16xf32> to vector<16x1xf32>
    %cst_295 = arith.constant 3.200000e+01 : f32
    %462 = vector.broadcast %cst_295 : f32 to vector<16x1xf32>
    %463 = arith.divf %461, %462 : vector<16x1xf32>
    %464 = vector.broadcast %463 : vector<16x1xf32> to vector<16x32xf32>
    %465 = arith.subf %455, %464 : vector<16x32xf32>
    %466 = arith.mulf %465, %465 : vector<16x32xf32>
    %cst_296 = arith.constant dense<0.000000e+00> : vector<16xf32>
    %467 = vector.multi_reduction <add>, %466, %cst_296 [1] : vector<16x32xf32> to vector<16xf32>
    %468 = vector.shape_cast %467 : vector<16xf32> to vector<16x1xf32>
    %cst_297 = arith.constant 3.200000e+01 : f32
    %469 = vector.broadcast %cst_297 : f32 to vector<16x1xf32>
    %470 = arith.divf %468, %469 : vector<16x1xf32>
    %471 = vector.broadcast %463 : vector<16x1xf32> to vector<16x32xf32>
    %472 = arith.subf %455, %471 : vector<16x32xf32>
    %cst_298 = arith.constant 9.99999974E-6 : f32
    %473 = vector.broadcast %cst_298 : f32 to vector<16x1xf32>
    %474 = arith.addf %470, %473 : vector<16x1xf32>
    %475 = math.rsqrt %474 : vector<16x1xf32>
    %476 = vector.broadcast %475 : vector<16x1xf32> to vector<16x32xf32>
    %477 = arith.mulf %472, %476 : vector<16x32xf32>
    %478 = vector.broadcast %457 : vector<1x32xf32> to vector<16x32xf32>
    %479 = arith.mulf %477, %478 : vector<16x32xf32>
    %480 = vector.broadcast %459 : vector<1x32xf32> to vector<16x32xf32>
    %481 = arith.addf %479, %480 : vector<16x32xf32>
    %482 = arith.truncf %481 : vector<16x32xf32> to vector<16x32xbf16>
    %c1_299 = arith.constant 1 : index
    %c0_300 = arith.constant 0 : index
    %c0_301 = arith.constant 0 : index
    %483 = vector.load %arg13[%c1_299, %c0_300, %c0_301] : memref<2x32x2048xbf16, #tpu.memory_space<vmem>>, vector<1x32x2048xbf16>
    %484 = vector.shape_cast %483 : vector<1x32x2048xbf16> to vector<32x2048xbf16>
    %cst_302 = arith.constant dense<0.000000e+00> : vector<16x2048xf32>
    %485 = tpu.matmul %482, %484, %cst_302 {dimension_numbers = #tpu.dot_dimension_numbers<[1], [0], [0], [1], [0, 0, 1, 1], [], []>} : vector<16x32xbf16>, vector<32x2048xbf16>, vector<16x2048xf32> -> vector<16x2048xf32>
    %c1_303 = arith.constant 1 : index
    %c0_304 = arith.constant 0 : index
    %c0_305 = arith.constant 0 : index
    %486 = vector.load %arg14[%c1_303, %c0_304, %c0_305] : memref<2x1x2048xf32, #tpu.memory_space<vmem>>, vector<1x1x2048xf32>
    %487 = vector.shape_cast %486 : vector<1x1x2048xf32> to vector<1x2048xf32>
    %488 = vector.broadcast %487 : vector<1x2048xf32> to vector<16x2048xf32>
    %489 = arith.addf %485, %488 : vector<16x2048xf32>
    %cst_306 = arith.constant 0.000000e+00 : f32
    %490 = vector.broadcast %cst_306 : f32 to vector<16x2048xf32>
    %491 = arith.maximumf %489, %490 : vector<16x2048xf32>
    %492 = arith.truncf %491 : vector<16x2048xf32> to vector<16x2048xbf16>
    %c1_307 = arith.constant 1 : index
    %c0_308 = arith.constant 0 : index
    %c0_309 = arith.constant 0 : index
    %493 = vector.load %arg15[%c1_307, %c0_308, %c0_309] : memref<2x2048x32xbf16, #tpu.memory_space<vmem>>, vector<1x2048x32xbf16>
    %494 = vector.shape_cast %493 : vector<1x2048x32xbf16> to vector<2048x32xbf16>
    %cst_310 = arith.constant dense<0.000000e+00> : vector<16x32xf32>
    %495 = tpu.matmul %492, %494, %cst_310 {dimension_numbers = #tpu.dot_dimension_numbers<[1], [0], [0], [1], [0, 0, 1, 1], [], []>} : vector<16x2048xbf16>, vector<2048x32xbf16>, vector<16x32xf32> -> vector<16x32xf32>
    %c1_311 = arith.constant 1 : index
    %c0_312 = arith.constant 0 : index
    %c0_313 = arith.constant 0 : index
    %496 = vector.load %arg16[%c1_311, %c0_312, %c0_313] : memref<2x1x32xf32, #tpu.memory_space<vmem>>, vector<1x1x32xf32>
    %497 = vector.shape_cast %496 : vector<1x1x32xf32> to vector<1x32xf32>
    %498 = vector.broadcast %497 : vector<1x32xf32> to vector<16x32xf32>
    %499 = arith.addf %495, %498 : vector<16x32xf32>
    %500 = arith.addf %481, %499 : vector<16x32xf32>
    %c1_314 = arith.constant 1 : index
    %c0_315 = arith.constant 0 : index
    %c0_316 = arith.constant 0 : index
    %501 = vector.load %arg17[%c1_314, %c0_315, %c0_316] : memref<2x1x32xf32, #tpu.memory_space<vmem>>, vector<1x1x32xf32>
    %502 = vector.shape_cast %501 : vector<1x1x32xf32> to vector<1x32xf32>
    %c1_317 = arith.constant 1 : index
    %c0_318 = arith.constant 0 : index
    %c0_319 = arith.constant 0 : index
    %503 = vector.load %arg18[%c1_317, %c0_318, %c0_319] : memref<2x1x32xf32, #tpu.memory_space<vmem>>, vector<1x1x32xf32>
    %504 = vector.shape_cast %503 : vector<1x1x32xf32> to vector<1x32xf32>
    %cst_320 = arith.constant dense<0.000000e+00> : vector<16xf32>
    %505 = vector.multi_reduction <add>, %500, %cst_320 [1] : vector<16x32xf32> to vector<16xf32>
    %506 = vector.shape_cast %505 : vector<16xf32> to vector<16x1xf32>
    %cst_321 = arith.constant 3.200000e+01 : f32
    %507 = vector.broadcast %cst_321 : f32 to vector<16x1xf32>
    %508 = arith.divf %506, %507 : vector<16x1xf32>
    %509 = vector.broadcast %508 : vector<16x1xf32> to vector<16x32xf32>
    %510 = arith.subf %500, %509 : vector<16x32xf32>
    %511 = arith.mulf %510, %510 : vector<16x32xf32>
    %cst_322 = arith.constant dense<0.000000e+00> : vector<16xf32>
    %512 = vector.multi_reduction <add>, %511, %cst_322 [1] : vector<16x32xf32> to vector<16xf32>
    %513 = vector.shape_cast %512 : vector<16xf32> to vector<16x1xf32>
    %cst_323 = arith.constant 3.200000e+01 : f32
    %514 = vector.broadcast %cst_323 : f32 to vector<16x1xf32>
    %515 = arith.divf %513, %514 : vector<16x1xf32>
    %516 = vector.broadcast %508 : vector<16x1xf32> to vector<16x32xf32>
    %517 = arith.subf %500, %516 : vector<16x32xf32>
    %cst_324 = arith.constant 9.99999974E-6 : f32
    %518 = vector.broadcast %cst_324 : f32 to vector<16x1xf32>
    %519 = arith.addf %515, %518 : vector<16x1xf32>
    %520 = math.rsqrt %519 : vector<16x1xf32>
    %521 = vector.broadcast %520 : vector<16x1xf32> to vector<16x32xf32>
    %522 = arith.mulf %517, %521 : vector<16x32xf32>
    %523 = vector.broadcast %502 : vector<1x32xf32> to vector<16x32xf32>
    %524 = arith.mulf %522, %523 : vector<16x32xf32>
    %525 = vector.broadcast %504 : vector<1x32xf32> to vector<16x32xf32>
    %526 = arith.addf %524, %525 : vector<16x32xf32>
    %c0_325 = arith.constant 0 : index
    %c0_326 = arith.constant 0 : index
    %527 = vector.load %arg19[%c0_325, %c0_326] : memref<16x32xf32, #tpu.memory_space<vmem>>, vector<16x32xf32>
    tpu.vector_store %arg19[%c0_325, %c0_326], %526 {strides = array<i32>} : memref<16x32xf32, #tpu.memory_space<vmem>>, vector<16x32xf32>,
    return
  }
}

</mosaic_0001>

<bundles_post_ra>
// kernel: tpu_custom_call.1
= control target key start
LH: loop header
LB: loop body
LE: loop exit
PB: predicated region body
PF: predicated region fallthrough
CT: control target
= control target key end

     0   :  { %s14347_s0 = inlined_call_operand.vmem [shape: f32[8,16,32], index: 0, kind: input, shape index: {}]   ;;  %s14348_s1 = inlined_call_operand.vmem [shape: f32[16,32], index: 1, kind: input, shape index: {}]   ;;  %s14349_s2 = inlined_call_operand.vmem [shape: f32[16,32], index: 2, kind: input, shape index: {}]   ;;  %s14350_s3 = inlined_call_operand.vmem [shape: f32[8,32,8], index: 3, kind: input, shape index: {}]   ;;  %s14351_s4 = inlined_call_operand.vmem [shape: f32[8,32,8], index: 4, kind: input, shape index: {}]   ;;  %s14352_s5 = inlined_call_operand.vmem [shape: f32[8,32,8], index: 5, kind: input, shape index: {}]   ;;  %s14353_s6 = inlined_call_operand.vmem [shape: f32[8,1,8], index: 6, kind: input, shape index: {}]   ;;  %s14354_s7 = inlined_call_operand.vmem [shape: f32[8,1,8], index: 7, kind: input, shape index: {}]   ;;  %s14355_s8 = inlined_call_operand.vmem [shape: f32[8,1,8], index: 8, kind: input, shape index: {}]   ;;  %s14356_s9 = inlined_call_operand.vmem [shape: f32[8,8,32], index: 9, kind: input, shape index: {}]   ;;  %s14357_s10 = inlined_call_operand.vmem [shape: f32[2,1,32], index: 10, kind: input, shape index: {}]   ;;  %s14358_s11 = inlined_call_operand.vmem [shape: f32[2,1,32], index: 11, kind: input, shape index: {}]   ;;  %s14359_s12 = inlined_call_operand.vmem [shape: f32[2,1,32], index: 12, kind: input, shape index: {}]   ;;  %s14360_s13 = inlined_call_operand.vmem [shape: bf16[2,32,2048], index: 13, kind: input, shape index: {}]   ;;  %s14361_s14 = inlined_call_operand.vmem [shape: f32[2,1,2048], index: 14, kind: input, shape index: {}]   ;;  %s14362_s15 = inlined_call_operand.vmem [shape: bf16[2,2048,32], index: 15, kind: input, shape index: {}]   ;;  %s14363_s16 = inlined_call_operand.vmem [shape: f32[2,1,32], index: 16, kind: input, shape index: {}]   ;;  %s14364_s17 = inlined_call_operand.vmem [shape: f32[2,1,32], index: 17, kind: input, shape index: {}]   ;;  %s14365_s18 = inlined_call_operand.vmem [shape: f32[2,1,32], index: 18, kind: input, shape index: {}]   ;;  %s14366_s19 = inlined_call_operand.hbm [shape: f32[16,32], index: 19, kind: output, shape index: {}]  }
   0x1   :  { %14371 = sst [smem:[#allocation5_spill]] %s14347_s0 }
   0x2   :  { %14372 = sst [smem:[#allocation6_spill]] %s14348_s1 }
   0x3   :  { %14373 = sst [smem:[#allocation7_spill]] %s14349_s2 }
   0x4   :  { %14374 = sst [smem:[#allocation8_spill]] %s14350_s3 }
   0x5   :  { %s14375_s20 = sld [smem:[#allocation5_spill]]  ;;  %vm80_vm0 = vcmask 261120   ;;  %v248_v51 = vld [vmem:[%s14351_s4 + $0x18] sm:$0xff]  ;;  %v247_v53 = vld [vmem:[%s14351_s4 + $0x10] sm:$0xff]  ;;  %v246_v55 = vld [vmem:[%s14351_s4 + $0x8] sm:$0xff] }
   0x6   :  { %s14376_s2 = sld [smem:[#allocation8_spill]]  ;;  %11314 = vmatprep.subr.mxu1 %v248_v51  ;;  %v245_v57 = vld [vmem:[%s14351_s4] sm:$0xff]  ;;  %v334_v58 = vld [vmem:[%s14352_s5 + $0x18] sm:$0xff] }
   0x7   :  { %11315 = vmatpush3.msra.mxu1 %v248_v51 }
   0x8   :  { %11316 = vmatprep.subr.mxu1 %v247_v53 }
   0x9   :  { %11317 = vmatpush3.msra.mxu1 %v247_v53 }
   0xa   :  { %11318 = vmatprep.subr.mxu1 %v246_v55 }
   0xb   :  { %v64_v0 = vld [vmem:[%s14375_s20] sm:$0xff]  ;;  %v66_v1 = vld [vmem:[%s14375_s20 + $0x10] sm:$0xff]  ;;  %v65_v14 = vld [vmem:[%s14375_s20 + $0x8] sm:$0xff]  ;;  %11319 = vmatpush3.msra.mxu1 %v246_v55 }
   0xc   :  { %v68_v2 = vld [vmem:[%s14375_s20 + $0x20] sm:$0xff]  ;;  %v70_v3 = vld [vmem:[%s14375_s20 + $0x30] sm:$0xff]  ;;  %v81_v6 = vsel %vm80_vm0, %v64_v0, 0.0  ;;  %v82_v7 = vsel %vm80_vm0, %v66_v1, 0.0  ;;  %v67_v17 = vld [vmem:[%s14375_s20 + $0x18] sm:$0xff]  ;;  %v96_v20 = vsel %vm80_vm0, %v65_v14, 0.0  ;;  %11320 = vmatprep.subr.mxu1 %v245_v57 }
   0xd   :  { %v72_v4 = vld [vmem:[%s14375_s20 + $0x40] sm:$0xff]  ;;  %v74_v5 = vld [vmem:[%s14375_s20 + $0x50] sm:$0xff]  ;;  %v84_v8 = vsel %vm80_vm0, %v68_v2, 0.0  ;;  %v83_v11 = vadd.f32 %v82_v7, %v81_v6  ;;  %v86_v12 = vsel %vm80_vm0, %v70_v3, 0.0  ;;  %v69_v18 = vld [vmem:[%s14375_s20 + $0x28] sm:$0xff]  ;;  %v97_v26 = vsel %vm80_vm0, %v67_v17, 0.0  ;;  %11321 = vmatpush3.msra.mxu1 %v245_v57 }
   0xe   :  { %v76_v9 = vld [vmem:[%s14375_s20 + $0x60] sm:$0xff]  ;;  %v78_v10 = vld [vmem:[%s14375_s20 + $0x70] sm:$0xff]  ;;  %v88_v13 = vsel %vm80_vm0, %v72_v4, 0.0  ;;  %v90_v15 = vsel %vm80_vm0, %v74_v5, 0.0  ;;  %v71_v19 = vld [vmem:[%s14375_s20 + $0x38] sm:$0xff]  ;;  %v99_v27 = vsel %vm80_vm0, %v69_v18, 0.0  ;;  %v98_v29 = vadd.f32 %v97_v26, %v96_v20 }
   0xf   :  { %v92_v16 = vsel %vm80_vm0, %v76_v9, 0.0  ;;  %v85_v21 = vadd.f32 %v84_v8, %v83_v11  ;;  %v94_v22 = vsel %vm80_vm0, %v78_v10, 0.0  ;;  %v73_v23 = vld [vmem:[%s14375_s20 + $0x48] sm:$0xff]  ;;  %v75_v24 = vld [vmem:[%s14375_s20 + $0x58] sm:$0xff]  ;;  %v101_v30 = vsel %vm80_vm0, %v71_v19, 0.0  ;;  %v155_v52 = vld [vmem:[%s14376_s2 + $0x10] sm:$0xff] }
  0x10   :  { %v77_v25 = vld [vmem:[%s14375_s20 + $0x68] sm:$0xff]  ;;  %v79_v28 = vld [vmem:[%s14375_s20 + $0x78] sm:$0xff]  ;;  %v103_v31 = vsel %vm80_vm0, %v73_v23, 0.0  ;;  %v105_v32 = vsel %vm80_vm0, %v75_v24, 0.0  ;;  %v100_v36 = vadd.f32 %v99_v27, %v98_v29  ;;  %v153_v56 = vld [vmem:[%s14376_s2] sm:$0xff] }
  0x11   :  { %v87_v33 = vadd.f32 %v86_v12, %v85_v21  ;;  %v107_v34 = vsel %vm80_vm0, %v77_v25, 0.0  ;;  %v109_v35 = vsel %vm80_vm0, %v79_v28, 0.0  ;;  %v156_v50 = vld [vmem:[%s14376_s2 + $0x18] sm:$0xff]  ;;  %v154_v54 = vld [vmem:[%s14376_s2 + $0x8] sm:$0xff] }
  0x12   :  { %v102_v38 = vadd.f32 %v101_v30, %v100_v36  ;;  %11303 = vmatprep.subr.mxu0 %v156_v50 }
  0x13   :  { %v89_v37 = vadd.f32 %v88_v13, %v87_v33  ;;  %11304 = vmatpush3.msra.mxu0 %v156_v50 }
  0x14   :  { %v104_v40 = vadd.f32 %v103_v31, %v102_v38  ;;  %11305 = vmatprep.subr.mxu0 %v155_v52 }
  0x15   :  { %v91_v39 = vadd.f32 %v90_v15, %v89_v37  ;;  %11306 = vmatpush3.msra.mxu0 %v155_v52 }
  0x16   :  { %v106_v42 = vadd.f32 %v105_v32, %v104_v40  ;;  %11307 = vmatprep.subr.mxu0 %v154_v54 }
  0x17   :  { %v93_v41 = vadd.f32 %v92_v16, %v91_v39  ;;  %11308 = vmatpush3.msra.mxu0 %v154_v54 }
  0x18   :  { %v108_v44 = vadd.f32 %v107_v34, %v106_v42  ;;  %11309 = vmatprep.subr.mxu0 %v153_v56 }
  0x19   :  { %v95_v43 = vadd.f32 %v94_v22, %v93_v41  ;;  %11310 = vmatpush3.msra.mxu0 %v153_v56 }
  0x1a   :  { %v12309_v46 = vadd.f32 %v109_v35, %v108_v44  ;;  %11325 = vmatprep.subr.mxu0 %v334_v58 }
  0x1b   :  { %v111_v45 = vmul.f32 %v95_v43, %v95_v43 }
  0x1c   :  { %v112_v48 = vmul.f32 %v12309_v46, %v12309_v46 }
  0x1d   :  { %v113_v47 = vsel %vm80_vm0, %v111_v45, 0.0 }
  0x1e   :  { %114 = vadd.xlane.f32.xlu0 %v113_v47  ;;  %v116_v49 = vsel %vm80_vm0, %v112_v48, 0.0 }
  0x22   :  { %117 = vadd.xlane.f32.xlu0 %v116_v49 }
  0xa7   :  { %v115_v59 = vpop.xlane.xlu0 %114 }
  0xa8   :  { %12029 = vrsqrt.f32 %v115_v59  ;;  %v124_v61 = vand.u32 2147483648, %v115_v59  ;;  %vm121_vm1 = vcmp.eq.f32.partialorder %v115_v59, inf  ;;  %vm123_vm2 = vcmp.eq.f32.partialorder %v115_v59, 0.0 }
  0xab   :  { %v118_v60 = vpop.xlane.xlu0 %117 }
  0xac   :  { %12031 = vrsqrt.f32 %v118_v60  ;;  %v131_v62 = vand.u32 2147483648, %v118_v60  ;;  %vm128_vm3 = vcmp.eq.f32.partialorder %v118_v60, inf  ;;  %vm130_vm4 = vcmp.eq.f32.partialorder %v118_v60, 0.0 }
  0xb5   :  { %v12030_v63 = vpop.eup %12029 }
  0xb6   :  { %v120_v0 = vmul.f32 %v12030_v63, %v115_v59 }
  0xb8   :  { %v122_v1 = vsel %vm121_vm1, %v115_v59, %v120_v0 }
  0xb9   :  { %v12032_v2 = vpop.eup %12031  ;;  %v125_v3 = vsel %vm123_vm2, %v124_v61, %v122_v1 }
  0xba   :  { %v133_v4 = vmax.f32 %v125_v3, 1e-12  ;;  %v127_v5 = vmul.f32 %v12032_v2, %v118_v60 }
  0xbc   :  { %12033 = vrcp.f32 %v133_v4  ;;  %v129_v6 = vsel %vm128_vm3, %v118_v60, %v127_v5 }
  0xbd   :  { %v132_v7 = vsel %vm130_vm4, %v131_v62, %v129_v6 }
  0xbe   :  { %v134_v8 = vmax.f32 %v132_v7, 1e-12 }
  0xc0   :  { %12035 = vrcp.f32 %v134_v8 }
  0xc1   :  { %24 = vsyncpa [#allocation3], 0  ;;  %s14377_s26 = sld [smem:[#allocation6_spill]]  ;;  %v333_v21 = vld [vmem:[%s14352_s5 + $0x10] sm:$0xff]  ;;  %v332_v22 = vld [vmem:[%s14352_s5 + $0x8] sm:$0xff]  ;;  %v12139_v24 = vmov 0.0   ;;  %v147_v40 = vlaneseq }
  0xc2   :  { %s14378_s29 = sld [smem:[#allocation7_spill]]  ;;  %v331_v23 = vld [vmem:[%s14352_s5] sm:$0xff]  ;;  %11336 = vmatprep.subr.mxu1 %v12139_v24  ;;  %vm12140_vm5 = vmmov 0   ;;  %vm417_vm6 = vcmask 64512   ;;  %v9853_v0 = vld [vmem:[%s14351_s4 + $0x38] sm:$0xff]  ;;  %v9852_v6 = vld [vmem:[%s14351_s4 + $0x30] sm:$0xff] }
  0xc3   :  { %v9830_v27 = vld [vmem:[%s14354_s7] ss:$0 sm:$0xff]  ;;  %v12405_v41 = vshrl.u32 %v147_v40, 7  ;;  %v150_v42 = vand.u32 127, %v147_v40  ;;  %v9845_v1 = vld [vmem:[%s14376_s2 + $0x38] sm:$0xff]  ;;  %v9851_v8 = vld [vmem:[%s14351_s4 + $0x28] sm:$0xff] }
  0xc4   :  { %v9827_v31 = vld [vmem:[%s14353_s6] ss:$0 sm:$0xff] }
  0xc5   :  { %v9833_v35 = vld [vmem:[%s14355_s8] ss:$0 sm:$0xff]  ;;  %vm151_vm7 = vcmp.gt.s32.totalorder %v150_v42, %v12405_v41 }
  0xc6   :  { %v12409_v49 = vsel %vm151_vm7, -1e+30, %v12139_v24 }
  0xc7   :  { %v139_v10 = vld [vmem:[%s14377_s26] sm:$0xff]  ;;  %v140_v15 = vld [vmem:[%s14377_s26 + $0x8] sm:$0xff] }
  0xc8   :  { %v143_v12 = vld [vmem:[%s14378_s29] sm:$0xff]  ;;  %v144_v18 = vld [vmem:[%s14378_s29 + $0x8] sm:$0xff] }
  0xc9   :  { %v12034_v9 = vpop.eup %12033 }
  0xca   :  { %v136_v11 = vmul.f32 %v12034_v9, %v95_v43 }
  0xcc   :  { %v141_v13 = vadd.f32 %v139_v10, %v136_v11  ;;  %v9844_v10 = vld [vmem:[%s14376_s2 + $0x30] sm:$0xff]  ;;  %v9850_v11 = vld [vmem:[%s14351_s4 + $0x20] sm:$0xff] }
  0xcd   :  { %v12036_v14 = vpop.eup %12035 }
  0xce   :  { %v12351_v16 = vadd.f32 %v143_v12, %v141_v13  ;;  %v138_v17 = vmul.f32 %v12036_v14, %v12309_v46  ;;  %v9843_v12 = vld [vmem:[%s14376_s2 + $0x28] sm:$0xff]  ;;  %v9842_v13 = vld [vmem:[%s14376_s2 + $0x20] sm:$0xff]  ;;  %v9861_v14 = vld [vmem:[%s14352_s5 + $0x38] sm:$0xff] }
  0xd0   :  { %v142_v19 = vadd.f32 %v140_v15, %v138_v17  ;;  %11311 = vmatprep.mubr.msk.f32.mxu0 %vm80_vm0, %v12351_v16  ;;  %11322 = vmatprep.mubr.msk.f32.mxu1 %vm80_vm0, %v12351_v16  ;;  %v9860_v15 = vld [vmem:[%s14352_s5 + $0x30] sm:$0xff]  ;;  %v9859_v17 = vld [vmem:[%s14352_s5 + $0x28] sm:$0xff] }
  0xd2   :  { %v12361_v20 = vadd.f32 %v144_v18, %v142_v19  ;;  %v9858_v18 = vld [vmem:[%s14352_s5 + $0x20] sm:$0xff] }
  0xd4   :  { %11312 = vmatmul.mubr.msk.f32.vlgmr.msra.gmra.mxu0 %vm80_vm0, %v12361_v20  ;;  %11323 = vmatmul.mubr.msk.f32.vlgmr.msra.gmra.mxu1 %vm80_vm0, %v12361_v20 }
  0xd5   :  { %11326 = vmatpush3.msra.mxu0 %v334_v58  ;;  %11333 = vmatprep.mubr.msk.f32.mxu0 %vm80_vm0, %v12351_v16 }
  0xd6   :  { %11327 = vmatprep.subr.mxu0 %v333_v21  ;;  %11338 = vmatprep.mubr.msk.f32.mxu1 %vm12140_vm5, %v12139_v24 }
  0xd7   :  { %11328 = vmatpush3.msra.mxu0 %v333_v21 }
  0xd8   :  { %11329 = vmatprep.subr.mxu0 %v332_v22 }
  0xd9   :  { %11330 = vmatpush3.msra.mxu0 %v332_v22 }
  0xda   :  { %11331 = vmatprep.subr.mxu0 %v331_v23 }
  0xdb   :  { %11332 = vmatpush3.msra.mxu0 %v331_v23 }
  0xdc   :  { %11334 = vmatmul.mubr.msk.f32.vlgmr.msra.gmra.mxu0 %vm80_vm0, %v12361_v20  ;;  %11346 = vmatprep.subr.mxu0 %v12139_v24 }
  0xdd   :  { %11348 = vmatprep.mubr.msk.f32.mxu0 %vm12140_vm5, %v12139_v24 }
 0x194   :  { %v11313_v25 = vpop.f32.mrf.mxu0  ;;  %v11324_v26 = vpop.f32.mrf.mxu1 }
 0x195   :  { %v328_v33 = vadd.f32 %v11324_v26, %v9830_v27  ;;  %v242_v36 = vadd.f32 %v11313_v25, %v9827_v31  ;;  %v9855_v26 = vld [vmem:[%s14354_s7 + $0x1] ss:$0 sm:$0xff] }
 0x196   :  { %v322_v28 = vpop.f32.mrf.mxu1  ;;  %v236_v29 = vpop.f32.mrf.mxu0 }
 0x197   :  { %v323_v30 = vadd.f32 %v9830_v27, %v322_v28  ;;  %v237_v32 = vadd.f32 %v9827_v31, %v236_v29 }
 0x199   :  { %11337 = vmatpush3.xpose.msk.msra.mxu1 %vm417_vm6, %v323_v30  ;;  %v9847_v30 = vld [vmem:[%s14353_s6 + $0x1] ss:$0 sm:$0xff] }
 0x19a   :  { %11341 = vmatprep.subr.mxu1 %v12139_v24 }
 0x19c   :  { %v11335_v34 = vpop.f32.mrf.mxu0  ;;  %11339 = vmatmul.mubr.msk.f32.vlgmr.msra.gmra.mxu1 %vm417_vm6, %v237_v32 }
 0x19d   :  { %11342 = vmatpush3.xpose.msk.msra.mxu1 %vm417_vm6, %v328_v33  ;;  %11343 = vmatprep.mubr.msk.f32.mxu1 %vm12140_vm5, %v12139_v24  ;;  %v414_v38 = vadd.f32 %v11335_v34, %v9833_v35  ;;  %v9863_v34 = vld [vmem:[%s14355_s8 + $0x1] ss:$0 sm:$0xff] }
 0x19e   :  { %v408_v37 = vpop.f32.mrf.mxu0  ;;  %11351 = vmatprep.subr.mxu1 %v12139_v24 }
 0x19f   :  { %v409_v39 = vadd.f32 %v9833_v35, %v408_v37 }
 0x1a0   :  { %11344 = vmatmul.mubr.msk.f32.vlgmr.msra.gmra.mxu1 %vm417_vm6, %v242_v36 }
 0x1a1   :  { %11347 = vmatpush3.msra.mxu0 %v409_v39  ;;  %11352 = vmatpush3.msra.mxu1 %v414_v38 }
 0x1a2   :  { %11353 = vmatprep.mubr.msk.f32.mxu1 %vm12140_vm5, %v12139_v24  ;;  %11367 = vmatprep.subr.mxu1 %v9853_v0 }
 0x1a3   :  { %11356 = vmatprep.subr.mxu0 %v9845_v1 }
 0x25c   :  { %v490_v43 = vpop.f32.mrf.mxu1 }
 0x25d   :  { %v570_v46 = vmul.f32 0.35355338, %v490_v43 }
 0x25e   :  { %v11340_v44 = vpop.f32.mrf.mxu1 }
 0x25f   :  { %v572_v52 = vadd.f32 %v570_v46, %v12409_v49 }
 0x260   :  { %v566_v45 = vpop.f32.mrf.mxu1 }
 0x261   :  { %v571_v47 = vmul.f32 0.35355338, %v566_v45  ;;  %v574_v53 = vsel %vm417_vm6, %v572_v52, -inf }
 0x262   :  { %v11345_v48 = vpop.f32.mrf.mxu1 }
 0x263   :  { %v573_v50 = vadd.f32 %v571_v47, %v12409_v49 }
 0x265   :  { %v577_v51 = vsel %vm417_vm6, %v573_v50, -inf }
 0x266   :  { %578 = vmax.xlane.f32.xlu1 %v577_v51 }
 0x26a   :  { %575 = vmax.xlane.f32.xlu1 %v574_v53 }
 0x2ef   :  { %v579_v54 = vpop.xlane.xlu1 %578 }
 0x2f0   :  { %v581_v55 = vsub.f32 %v573_v50, %v579_v54 }
 0x2f2   :  { %v584_v56 = vmul.f32 1.442695, %v581_v55 }
 0x2f3   :  { %v576_v57 = vpop.xlane.xlu1 %575 }
 0x2f4   :  { %12037 = vpow2.f32 %v584_v56  ;;  %v580_v58 = vsub.f32 %v572_v52, %v576_v57 }
 0x2f6   :  { %v582_v59 = vmul.f32 1.442695, %v580_v58 }
 0x2f8   :  { %12039 = vpow2.f32 %v582_v59 }
 0x301   :  { %v12038_v60 = vpop.eup %12037 }
 0x302   :  { %v589_v61 = vsel %vm417_vm6, %v12038_v60, 0.0 }
 0x303   :  { %590 = vadd.xlane.f32.xlu0 %v589_v61 }
 0x305   :  { %v12040_v62 = vpop.eup %12039 }
 0x306   :  { %v586_v63 = vsel %vm417_vm6, %v12040_v62, 0.0 }
 0x307   :  { %587 = vadd.xlane.f32.xlu1 %v586_v63 }
 0x38c   :  { %v591_v2 = vpop.xlane.xlu0 %590 }
 0x38d   :  { %12041 = vrcp.f32 %v591_v2 }
 0x390   :  { %v588_v3 = vpop.xlane.xlu1 %587 }
 0x391   :  { %12043 = vrcp.f32 %v588_v3 }
 0x39a   :  { %v12042_v4 = vpop.eup %12041 }
 0x39b   :  { %v595_v5 = vmul.f32 %v12042_v4, %v12038_v60 }
 0x39d   :  { %11354 = vmatmul.mubr.msk.f32.vlgmr.msra.gmra.mxu1 %vm417_vm6, %v595_v5  ;;  %v9888_v5 = vld [vmem:[%s14351_s4 + $0x58] sm:$0xff] }
 0x39e   :  { %v12044_v7 = vpop.eup %12043  ;;  %11368 = vmatpush3.msra.mxu1 %v9853_v0  ;;  %11375 = vmatprep.mubr.msk.f32.mxu1 %vm80_vm0, %v12351_v16 }
 0x39f   :  { %11369 = vmatprep.subr.mxu1 %v9852_v6  ;;  %v593_v9 = vmul.f32 %v12044_v7, %v12040_v62  ;;  %v742_v62 = vld [vmem:[%s14356_s9] sm:$0xff]  ;;  %v9886_v7 = vld [vmem:[%s14351_s4 + $0x48] sm:$0xff] }
 0x3a0   :  { %11370 = vmatpush3.msra.mxu1 %v9852_v6  ;;  %v9887_v6 = vld [vmem:[%s14351_s4 + $0x50] sm:$0xff] }
 0x3a1   :  { %11371 = vmatprep.subr.mxu1 %v9851_v8  ;;  %11349 = vmatmul.mubr.msk.f32.vlgmr.msra.gmra.mxu0 %vm417_vm6, %v593_v9  ;;  %v9872_v9 = vld [vmem:[%s14356_s9 + $0x8] sm:$0xff] }
 0x3a2   :  { %11357 = vmatpush3.msra.mxu0 %v9845_v1  ;;  %11372 = vmatpush3.msra.mxu1 %v9851_v8  ;;  %v9885_v8 = vld [vmem:[%s14351_s4 + $0x40] sm:$0xff] }
 0x3a3   :  { %11358 = vmatprep.subr.mxu0 %v9844_v10  ;;  %11364 = vmatprep.mubr.msk.f32.mxu0 %vm80_vm0, %v12351_v16 }
 0x3a4   :  { %11373 = vmatprep.subr.mxu1 %v9850_v11  ;;  %11359 = vmatpush3.msra.mxu0 %v9844_v10  ;;  %v9880_v10 = vld [vmem:[%s14376_s2 + $0x58] sm:$0xff] }
 0x3a5   :  { %11374 = vmatpush3.msra.mxu1 %v9850_v11  ;;  %11360 = vmatprep.subr.mxu0 %v9843_v12 }
 0x3a6   :  { %11376 = vmatmul.mubr.msk.f32.vlgmr.msra.gmra.mxu1 %vm80_vm0, %v12361_v20  ;;  %11361 = vmatpush3.msra.mxu0 %v9843_v12 }
 0x3a7   :  { %11362 = vmatprep.subr.mxu0 %v9842_v13  ;;  %11389 = vmatprep.subr.mxu1 %v12139_v24 }
 0x3a8   :  { %11363 = vmatpush3.msra.mxu0 %v9842_v13  ;;  %11391 = vmatprep.mubr.msk.f32.mxu1 %vm12140_vm5, %v12139_v24 }
 0x3a9   :  { %11365 = vmatmul.mubr.msk.f32.vlgmr.msra.gmra.mxu0 %vm80_vm0, %v12361_v20  ;;  %11378 = vmatprep.subr.mxu0 %v9861_v14 }
 0x3aa   :  { %11379 = vmatpush3.msra.mxu0 %v9861_v14  ;;  %11386 = vmatprep.mubr.msk.f32.mxu0 %vm80_vm0, %v12351_v16  ;;  %v9879_v14 = vld [vmem:[%s14376_s2 + $0x50] sm:$0xff] }
 0x3ab   :  { %11380 = vmatprep.subr.mxu0 %v9860_v15 }
 0x3ac   :  { %11381 = vmatpush3.msra.mxu0 %v9860_v15 }
 0x3ad   :  { %11382 = vmatprep.subr.mxu0 %v9859_v17 }
 0x3ae   :  { %11383 = vmatpush3.msra.mxu0 %v9859_v17  ;;  %v9878_v17 = vld [vmem:[%s14376_s2 + $0x48] sm:$0xff] }
 0x3af   :  { %11384 = vmatprep.subr.mxu0 %v9858_v18 }
 0x3b0   :  { %11385 = vmatpush3.msra.mxu0 %v9858_v18  ;;  %v9877_v18 = vld [vmem:[%s14376_s2 + $0x40] sm:$0xff] }
 0x3b1   :  { %11387 = vmatmul.mubr.msk.f32.vlgmr.msra.gmra.mxu0 %vm80_vm0, %v12361_v20  ;;  %11399 = vmatprep.subr.mxu0 %v12139_v24 }
 0x3b2   :  { %11401 = vmatprep.mubr.msk.f32.mxu0 %vm12140_vm5, %v12139_v24 }
 0x45d   :  { %v12473_v19 = vpop.f32.mrf.mxu1 }
 0x45f   :  { %v11355_v21 = vpop.f32.mrf.mxu1 }
 0x460   :  { %v9896_v21 = vld [vmem:[%s14352_s5 + $0x58] sm:$0xff] }
 0x461   :  { %v12475_v22 = vpop.f32.mrf.mxu0 }
 0x463   :  { %v11350_v23 = vpop.f32.mrf.mxu0 }
 0x466   :  { %v11377_v25 = vpop.f32.mrf.mxu1 }
 0x467   :  { %v916_v33 = vadd.f32 %v11377_v25, %v9855_v26  ;;  %v9890_v25 = vld [vmem:[%s14354_s7 + $0x2] ss:$0 sm:$0xff] }
 0x468   :  { %v910_v27 = vpop.f32.mrf.mxu1 }
 0x469   :  { %v911_v28 = vadd.f32 %v9855_v26, %v910_v27  ;;  %v11366_v29 = vpop.f32.mrf.mxu0  ;;  %v9894_v26 = vld [vmem:[%s14352_s5 + $0x48] sm:$0xff] }
 0x46a   :  { %v828_v35 = vadd.f32 %v11366_v29, %v9847_v30 }
 0x46b   :  { %11390 = vmatpush3.xpose.msk.msra.mxu1 %vm417_vm6, %v911_v28  ;;  %v822_v31 = vpop.f32.mrf.mxu0  ;;  %v9893_v28 = vld [vmem:[%s14352_s5 + $0x40] sm:$0xff] }
 0x46c   :  { %v823_v32 = vadd.f32 %v9847_v30, %v822_v31  ;;  %11394 = vmatprep.subr.mxu1 %v12139_v24 }
 0x46e   :  { %11392 = vmatmul.mubr.msk.f32.vlgmr.msra.gmra.mxu1 %vm417_vm6, %v823_v32 }
 0x46f   :  { %11395 = vmatpush3.xpose.msk.msra.mxu1 %vm417_vm6, %v916_v33  ;;  %11396 = vmatprep.mubr.msk.f32.mxu1 %vm12140_vm5, %v12139_v24 }
 0x470   :  { %11404 = vmatprep.subr.mxu1 %v12139_v24 }
 0x471   :  { %v11388_v36 = vpop.f32.mrf.mxu0 }
 0x472   :  { %v1004_v37 = vadd.f32 %v11388_v36, %v9863_v34  ;;  %11397 = vmatmul.mubr.msk.f32.vlgmr.msra.gmra.mxu1 %vm417_vm6, %v828_v35  ;;  %v9882_v35 = vld [vmem:[%s14353_s6 + $0x2] ss:$0 sm:$0xff] }
 0x473   :  { %v998_v38 = vpop.f32.mrf.mxu0  ;;  %11406 = vmatprep.mubr.msk.f32.mxu1 %vm12140_vm5, %v12139_v24 }
 0x474   :  { %v999_v39 = vadd.f32 %v9863_v34, %v998_v38  ;;  %11405 = vmatpush3.msra.mxu1 %v1004_v37  ;;  %v9898_v38 = vld [vmem:[%s14355_s8 + $0x2] ss:$0 sm:$0xff] }
 0x475   :  { %11414 = vmatprep.subr.mxu1 %v742_v62 }
 0x476   :  { %11400 = vmatpush3.msra.mxu0 %v999_v39 }
 0x477   :  { %11409 = vmatprep.subr.mxu0 %v9872_v9 }
 0x52e   :  { %v1079_v40 = vpop.f32.mrf.mxu1 }
 0x52f   :  { %v1159_v42 = vmul.f32 0.35355338, %v1079_v40 }
 0x530   :  { %v11393_v43 = vpop.f32.mrf.mxu1 }
 0x531   :  { %v1161_v44 = vadd.f32 %v1159_v42, %v12409_v49 }
 0x532   :  { %v1155_v45 = vpop.f32.mrf.mxu1 }
 0x533   :  { %v1160_v46 = vmul.f32 0.35355338, %v1155_v45  ;;  %v1163_v47 = vsel %vm417_vm6, %v1161_v44, -inf }
 0x534   :  { %1164 = vmax.xlane.f32.xlu0 %v1163_v47  ;;  %v11398_v48 = vpop.f32.mrf.mxu1 }
 0x535   :  { %v1162_v50 = vadd.f32 %v1160_v46, %v12409_v49 }
 0x537   :  { %v1166_v51 = vsel %vm417_vm6, %v1162_v50, -inf }
 0x538   :  { %1167 = vmax.xlane.f32.xlu1 %v1166_v51 }
 0x5bd   :  { %v1165_v52 = vpop.xlane.xlu0 %1164 }
 0x5be   :  { %v1169_v53 = vsub.f32 %v1161_v44, %v1165_v52 }
 0x5c0   :  { %v1171_v54 = vmul.f32 1.442695, %v1169_v53 }
 0x5c1   :  { %v1168_v55 = vpop.xlane.xlu1 %1167 }
 0x5c2   :  { %12045 = vpow2.f32 %v1171_v54  ;;  %v1170_v56 = vsub.f32 %v1162_v50, %v1168_v55 }
 0x5c4   :  { %v1173_v57 = vmul.f32 1.442695, %v1170_v56 }
 0x5c6   :  { %12047 = vpow2.f32 %v1173_v57 }
 0x5cf   :  { %v12046_v58 = vpop.eup %12045 }
 0x5d0   :  { %v1175_v59 = vsel %vm417_vm6, %v12046_v58, 0.0 }
 0x5d1   :  { %1176 = vadd.xlane.f32.xlu0 %v1175_v59 }
 0x5d3   :  { %v12048_v60 = vpop.eup %12047 }
 0x5d4   :  { %v1178_v61 = vsel %vm417_vm6, %v12048_v60, 0.0 }
 0x5d5   :  { %1179 = vadd.xlane.f32.xlu1 %v1178_v61 }
 0x65a   :  { %v1177_v63 = vpop.xlane.xlu0 %1176 }
 0x65b   :  { %12049 = vrcp.f32 %v1177_v63 }
 0x65e   :  { %v1180_v0 = vpop.xlane.xlu1 %1179 }
 0x65f   :  { %12051 = vrcp.f32 %v1180_v0 }
 0x668   :  { %v12050_v1 = vpop.eup %12049 }
 0x669   :  { %v1182_v2 = vmul.f32 %v12050_v1, %v12046_v58 }
 0x66b   :  { %11402 = vmatmul.mubr.msk.f32.vlgmr.msra.gmra.mxu0 %vm417_vm6, %v1182_v2  ;;  %v9913_v2 = vld [vmem:[%s14376_s2 + $0x78] sm:$0xff] }
 0x66c   :  { %v12052_v3 = vpop.eup %12051  ;;  %11410 = vmatpush3.msra.mxu0 %v9872_v9  ;;  %v9912_v9 = vld [vmem:[%s14376_s2 + $0x70] sm:$0xff] }
 0x66d   :  { %v1184_v4 = vmul.f32 %v12052_v3, %v12048_v60  ;;  %11419 = vmatprep.subr.mxu0 %v9880_v10 }
 0x66f   :  { %11407 = vmatmul.mubr.msk.f32.vlgmr.msra.gmra.mxu1 %vm417_vm6, %v1184_v4 }
 0x670   :  { %11416 = vmatprep.mubr.msk.f32.mxu1 %vm417_vm6, %v12475_v22  ;;  %11415 = vmatpush3.msra.mxu1 %v742_v62  ;;  %v9895_v22 = vld [vmem:[%s14352_s5 + $0x50] sm:$0xff] }
 0x671   :  { %11430 = vmatprep.subr.mxu1 %v9888_v5 }
 0x673   :  { %11417 = vmatmul.mubr.msk.f32.vlgmr.msra.gmra.mxu1 %vm417_vm6, %v12473_v19 }
 0x674   :  { %11431 = vmatpush3.msra.mxu1 %v9888_v5  ;;  %11438 = vmatprep.mubr.msk.f32.mxu1 %vm80_vm0, %v12351_v16 }
 0x675   :  { %11432 = vmatprep.subr.mxu1 %v9887_v6 }
 0x676   :  { %11433 = vmatpush3.msra.mxu1 %v9887_v6 }
 0x677   :  { %11434 = vmatprep.subr.mxu1 %v9886_v7 }
 0x678   :  { %11435 = vmatpush3.msra.mxu1 %v9886_v7 }
 0x679   :  { %11436 = vmatprep.subr.mxu1 %v9885_v8 }
 0x67a   :  { %11437 = vmatpush3.msra.mxu1 %v9885_v8 }
 0x67b   :  { %11439 = vmatmul.mubr.msk.f32.vlgmr.msra.gmra.mxu1 %vm80_vm0, %v12361_v20  ;;  %11452 = vmatprep.subr.mxu1 %v12139_v24 }
 0x67c   :  { %11454 = vmatprep.mubr.msk.f32.mxu1 %vm12140_vm5, %v12139_v24 }
 0x72b   :  { %v1254_v11 = vpop.f32.mrf.mxu0 }
 0x72c   :  { %11411 = vmatprep.mubr.msk.f32.mxu0 %vm417_vm6, %v1254_v11  ;;  %v9910_v11 = vld [vmem:[%s14376_s2 + $0x60] sm:$0xff] }
 0x72d   :  { %v11403_v12 = vpop.f32.mrf.mxu0 }
 0x72e   :  { %v9929_v12 = vld [vmem:[%s14352_s5 + $0x78] sm:$0xff] }
 0x72f   :  { %v1327_v13 = vpop.f32.mrf.mxu1 }
 0x730   :  { %11412 = vmatmul.mubr.msk.f32.vlgmr.msra.gmra.mxu0 %vm417_vm6, %v1327_v13  ;;  %v9928_v13 = vld [vmem:[%s14352_s5 + $0x70] sm:$0xff] }
 0x731   :  { %11420 = vmatpush3.msra.mxu0 %v9880_v10  ;;  %v11408_v15 = vpop.f32.mrf.mxu1  ;;  %11427 = vmatprep.mubr.msk.f32.mxu0 %vm80_vm0, %v12351_v16  ;;  %v9911_v10 = vld [vmem:[%s14376_s2 + $0x68] sm:$0xff] }
 0x732   :  { %11421 = vmatprep.subr.mxu0 %v9879_v14  ;;  %v9926_v15 = vld [vmem:[%s14352_s5 + $0x60] sm:$0xff] }
 0x733   :  { %11422 = vmatpush3.msra.mxu0 %v9879_v14  ;;  %v12549_v19 = vpop.f32.mrf.mxu1  ;;  %v9927_v14 = vld [vmem:[%s14352_s5 + $0x68] sm:$0xff] }
 0x734   :  { %11423 = vmatprep.subr.mxu0 %v9878_v17 }
 0x735   :  { %11424 = vmatpush3.msra.mxu0 %v9878_v17  ;;  %v12559_v23 = vpop.f32.mrf.mxu1  ;;  %v9907_v17 = vld [vmem:[%s14356_s9 + $0x10] sm:$0xff] }
 0x736   :  { %11425 = vmatprep.subr.mxu0 %v9877_v18 }
 0x737   :  { %11426 = vmatpush3.msra.mxu0 %v9877_v18  ;;  %v9921_v18 = vld [vmem:[%s14351_s4 + $0x78] sm:$0xff] }
 0x738   :  { %11428 = vmatmul.mubr.msk.f32.vlgmr.msra.gmra.mxu0 %vm80_vm0, %v12361_v20  ;;  %11441 = vmatprep.subr.mxu0 %v9896_v21 }
 0x739   :  { %11442 = vmatpush3.msra.mxu0 %v9896_v21  ;;  %11449 = vmatprep.mubr.msk.f32.mxu0 %vm80_vm0, %v12351_v16 }
 0x73a   :  { %11443 = vmatprep.subr.mxu0 %v9895_v22 }
 0x73b   :  { %v11440_v27 = vpop.f32.mrf.mxu1  ;;  %11444 = vmatpush3.msra.mxu0 %v9895_v22 }
 0x73c   :  { %v1668_v29 = vadd.f32 %v11440_v27, %v9890_v25  ;;  %11445 = vmatprep.subr.mxu0 %v9894_v26 }
 0x73d   :  { %v1662_v30 = vpop.f32.mrf.mxu1  ;;  %11446 = vmatpush3.msra.mxu0 %v9894_v26  ;;  %v9920_v26 = vld [vmem:[%s14351_s4 + $0x70] sm:$0xff] }
 0x73e   :  { %v1663_v31 = vadd.f32 %v9890_v25, %v1662_v30  ;;  %11447 = vmatprep.subr.mxu0 %v9893_v28 }
 0x73f   :  { %11448 = vmatpush3.msra.mxu0 %v9893_v28  ;;  %v9919_v28 = vld [vmem:[%s14351_s4 + $0x68] sm:$0xff] }
 0x740   :  { %11450 = vmatmul.mubr.msk.f32.vlgmr.msra.gmra.mxu0 %vm80_vm0, %v12361_v20  ;;  %11453 = vmatpush3.xpose.msk.msra.mxu1 %vm417_vm6, %v1663_v31 }
 0x741   :  { %11457 = vmatprep.subr.mxu1 %v12139_v24  ;;  %11462 = vmatprep.subr.mxu0 %v12139_v24 }
 0x742   :  { %11464 = vmatprep.mubr.msk.f32.mxu0 %vm12140_vm5, %v12139_v24 }
 0x7f0   :  { %v12579_v32 = vpop.f32.mrf.mxu0 }
 0x7f2   :  { %v12581_v33 = vpop.f32.mrf.mxu0 }
 0x7f8   :  { %v11429_v34 = vpop.f32.mrf.mxu0 }
 0x7f9   :  { %v1580_v39 = vadd.f32 %v11429_v34, %v9882_v35  ;;  %v9931_v34 = vld [vmem:[%s14355_s8 + $0x3] ss:$0 sm:$0xff] }
 0x7fa   :  { %v1574_v36 = vpop.f32.mrf.mxu0 }
 0x7fb   :  { %v1575_v37 = vadd.f32 %v9882_v35, %v1574_v36 }
 0x7fd   :  { %11455 = vmatmul.mubr.msk.f32.vlgmr.msra.gmra.mxu1 %vm417_vm6, %v1575_v37 }
 0x7fe   :  { %11458 = vmatpush3.xpose.msk.msra.mxu1 %vm417_vm6, %v1668_v29  ;;  %11459 = vmatprep.mubr.msk.f32.mxu1 %vm12140_vm5, %v12139_v24  ;;  %v9918_v29 = vld [vmem:[%s14351_s4 + $0x60] sm:$0xff] }
 0x7ff   :  { %11467 = vmatprep.subr.mxu1 %v12139_v24 }
 0x800   :  { %v11451_v40 = vpop.f32.mrf.mxu0 }
 0x801   :  { %v1756_v42 = vadd.f32 %v11451_v40, %v9898_v38  ;;  %11460 = vmatmul.mubr.msk.f32.vlgmr.msra.gmra.mxu1 %vm417_vm6, %v1580_v39  ;;  %v1492_v39 = vadd.f32 %v12549_v19, %v12579_v32  ;;  %v9915_v19 = vld [vmem:[%s14353_s6 + $0x3] ss:$0 sm:$0xff] }
 0x802   :  { %v1750_v43 = vpop.f32.mrf.mxu0  ;;  %11469 = vmatprep.mubr.msk.f32.mxu1 %vm12140_vm5, %v12139_v24 }
 0x803   :  { %v1751_v44 = vadd.f32 %v9898_v38, %v1750_v43  ;;  %11468 = vmatpush3.msra.mxu1 %v1756_v42  ;;  %v1487_v42 = vadd.f32 %v12559_v23, %v12581_v33 }
 0x804   :  { %11477 = vmatprep.subr.mxu1 %v9913_v2 }
 0x805   :  { %11463 = vmatpush3.msra.mxu0 %v1751_v44 }
 0x806   :  { %11472 = vmatprep.subr.mxu0 %v9907_v17 }
 0x8bd   :  { %v1831_v45 = vpop.f32.mrf.mxu1 }
 0x8be   :  { %v1911_v46 = vmul.f32 0.35355338, %v1831_v45 }
 0x8bf   :  { %v11456_v47 = vpop.f32.mrf.mxu1 }
 0x8c0   :  { %v1913_v48 = vadd.f32 %v1911_v46, %v12409_v49  ;;  %v9923_v47 = vld [vmem:[%s14354_s7 + $0x3] ss:$0 sm:$0xff] }
 0x8c1   :  { %v1907_v50 = vpop.f32.mrf.mxu1 }
 0x8c2   :  { %v1912_v51 = vmul.f32 0.35355338, %v1907_v50  ;;  %v1915_v52 = vsel %vm417_vm6, %v1913_v48, -inf }
 0x8c3   :  { %1916 = vmax.xlane.f32.xlu0 %v1915_v52  ;;  %v11461_v53 = vpop.f32.mrf.mxu1 }
 0x8c4   :  { %v1914_v54 = vadd.f32 %v1912_v51, %v12409_v49 }
 0x8c6   :  { %v1918_v55 = vsel %vm417_vm6, %v1914_v54, -inf }
 0x8c7   :  { %1919 = vmax.xlane.f32.xlu1 %v1918_v55 }
 0x94c   :  { %v1917_v56 = vpop.xlane.xlu0 %1916 }
 0x94d   :  { %v1921_v57 = vsub.f32 %v1913_v48, %v1917_v56 }
 0x94f   :  { %v1923_v58 = vmul.f32 1.442695, %v1921_v57 }
 0x950   :  { %v1920_v59 = vpop.xlane.xlu1 %1919 }
 0x951   :  { %12053 = vpow2.f32 %v1923_v58  ;;  %v1922_v60 = vsub.f32 %v1914_v54, %v1920_v59 }
 0x953   :  { %v1925_v61 = vmul.f32 1.442695, %v1922_v60 }
 0x955   :  { %12055 = vpow2.f32 %v1925_v61 }
 0x95e   :  { %v12054_v62 = vpop.eup %12053 }
 0x95f   :  { %v1927_v63 = vsel %vm417_vm6, %v12054_v62, 0.0 }
 0x960   :  { %1928 = vadd.xlane.f32.xlu0 %v1927_v63 }
 0x962   :  { %v12056_v0 = vpop.eup %12055 }
 0x963   :  { %v1930_v1 = vsel %vm417_vm6, %v12056_v0, 0.0 }
 0x964   :  { %1931 = vadd.xlane.f32.xlu1 %v1930_v1 }
 0x9e9   :  { %v1929_v3 = vpop.xlane.xlu0 %1928 }
 0x9ea   :  { %12057 = vrcp.f32 %v1929_v3 }
 0x9ed   :  { %v1932_v4 = vpop.xlane.xlu1 %1931 }
 0x9ee   :  { %12059 = vrcp.f32 %v1932_v4 }
 0x9f7   :  { %v12058_v5 = vpop.eup %12057 }
 0x9f8   :  { %v1934_v6 = vmul.f32 %v12058_v5, %v12054_v62 }
 0x9fa   :  { %11465 = vmatmul.mubr.msk.f32.vlgmr.msra.gmra.mxu0 %vm417_vm6, %v1934_v6 }
 0x9fb   :  { %v12060_v7 = vpop.eup %12059  ;;  %11473 = vmatpush3.msra.mxu0 %v9907_v17 }
 0x9fc   :  { %v1936_v8 = vmul.f32 %v12060_v7, %v12056_v0  ;;  %11488 = vmatprep.subr.mxu0 %v9921_v18 }
 0x9fe   :  { %11470 = vmatmul.mubr.msk.f32.vlgmr.msra.gmra.mxu1 %vm417_vm6, %v1936_v8 }
 0x9ff   :  { %11478 = vmatpush3.msra.mxu1 %v9913_v2  ;;  %11485 = vmatprep.mubr.msk.f32.mxu1 %vm80_vm0, %v12351_v16 }
 0xa00   :  { %11479 = vmatprep.subr.mxu1 %v9912_v9 }
 0xa01   :  { %11480 = vmatpush3.msra.mxu1 %v9912_v9 }
 0xa02   :  { %11481 = vmatprep.subr.mxu1 %v9911_v10 }
 0xa03   :  { %11482 = vmatpush3.msra.mxu1 %v9911_v10 }
 0xa04   :  { %11483 = vmatprep.subr.mxu1 %v9910_v11 }
 0xa05   :  { %11484 = vmatpush3.msra.mxu1 %v9910_v11 }
 0xa06   :  { %11486 = vmatmul.mubr.msk.f32.vlgmr.msra.gmra.mxu1 %vm80_vm0, %v12361_v20  ;;  %11499 = vmatprep.subr.mxu1 %v9929_v12 }
 0xa07   :  { %11500 = vmatpush3.msra.mxu1 %v9929_v12  ;;  %11507 = vmatprep.mubr.msk.f32.mxu1 %vm80_vm0, %v12351_v16 }
 0xa08   :  { %11501 = vmatprep.subr.mxu1 %v9928_v13 }
 0xa09   :  { %11502 = vmatpush3.msra.mxu1 %v9928_v13  ;;  %v9940_v13 = vld [vmem:[%s14356_s9 + $0x18] sm:$0xff] }
 0xa0a   :  { %11503 = vmatprep.subr.mxu1 %v9927_v14 }
 0xa0b   :  { %11504 = vmatpush3.msra.mxu1 %v9927_v14 }
 0xa0c   :  { %11505 = vmatprep.subr.mxu1 %v9926_v15 }
 0xa0d   :  { %11506 = vmatpush3.msra.mxu1 %v9926_v15 }
 0xa0e   :  { %11508 = vmatmul.mubr.msk.f32.vlgmr.msra.gmra.mxu1 %vm80_vm0, %v12361_v20  ;;  %11520 = vmatprep.subr.mxu1 %v12139_v24 }
 0xa0f   :  { %11522 = vmatprep.mubr.msk.f32.mxu1 %vm12140_vm5, %v12139_v24 }
 0xaba   :  { %v2006_v21 = vpop.f32.mrf.mxu0 }
 0xabb   :  { %11474 = vmatprep.mubr.msk.f32.mxu0 %vm417_vm6, %v2006_v21 }
 0xabc   :  { %v11466_v22 = vpop.f32.mrf.mxu0 }
 0xabd   :  { %v9943_v22 = vld [vmem:[%s14357_s10] ss:$0 sm:$0xff] }
 0xabe   :  { %v2079_v25 = vpop.f32.mrf.mxu1 }
 0xabf   :  { %11475 = vmatmul.mubr.msk.f32.vlgmr.msra.gmra.mxu0 %vm417_vm6, %v2079_v25 }
 0xac0   :  { %11489 = vmatpush3.msra.mxu0 %v9921_v18  ;;  %v11471_v27 = vpop.f32.mrf.mxu1  ;;  %11496 = vmatprep.mubr.msk.f32.mxu0 %vm80_vm0, %v12351_v16 }
 0xac1   :  { %11490 = vmatprep.subr.mxu0 %v9920_v26 }
 0xac2   :  { %11491 = vmatpush3.msra.mxu0 %v9920_v26 }
 0xac3   :  { %11492 = vmatprep.subr.mxu0 %v9919_v28 }
 0xac4   :  { %11493 = vmatpush3.msra.mxu0 %v9919_v28 }
 0xac5   :  { %11494 = vmatprep.subr.mxu0 %v9918_v29 }
 0xac6   :  { %11495 = vmatpush3.msra.mxu0 %v9918_v29  ;;  %v11487_v30 = vpop.f32.mrf.mxu1 }
 0xac7   :  { %11497 = vmatmul.mubr.msk.f32.vlgmr.msra.gmra.mxu0 %vm80_vm0, %v12361_v20  ;;  %11510 = vmatprep.subr.mxu0 %v12139_v24  ;;  %v2253_v33 = vadd.f32 %v11487_v30, %v9915_v19 }
 0xac8   :  { %11512 = vmatprep.mubr.msk.f32.mxu0 %vm12140_vm5, %v12139_v24  ;;  %v2247_v31 = vpop.f32.mrf.mxu1 }
 0xac9   :  { %v2248_v32 = vadd.f32 %v9915_v19, %v2247_v31 }
 0xace   :  { %v11509_v35 = vpop.f32.mrf.mxu1 }
 0xacf   :  { %v2429_v36 = vadd.f32 %v11509_v35, %v9931_v34 }
 0xad0   :  { %v2423_v37 = vpop.f32.mrf.mxu1 }
 0xad1   :  { %v2424_v38 = vadd.f32 %v9931_v34, %v2423_v37 }
 0xad3   :  { %11521 = vmatpush3.msra.mxu1 %v2424_v38 }
 0xad4   :  { %11530 = vmatprep.subr.mxu1 %v9940_v13 }
 0xb7f   :  { %v11476_v40 = vpop.f32.mrf.mxu0 }
 0xb80   :  { %v12671_v43 = vadd.f32 %v11476_v40, %v1492_v39 }
 0xb81   :  { %v2157_v44 = vpop.f32.mrf.mxu0 }
 0xb82   :  { %v12673_v45 = vadd.f32 %v2157_v44, %v1487_v42 }
 0xb87   :  { %v11498_v46 = vpop.f32.mrf.mxu0 }
 0xb88   :  { %v2341_v23 = vadd.f32 %v11498_v46, %v9923_v47  ;;  %v2922_v46 = vld [vmem:[%s14360_s13 + $0xc0] sm:$0xff] }
 0xb89   :  { %v2335_v48 = vpop.f32.mrf.mxu0 }
 0xb8a   :  { %v2336_v50 = vadd.f32 %v9923_v47, %v2335_v48  ;;  %v2915_v47 = vld [vmem:[%s14360_s13 + $0x88] sm:$0xff] }
 0xb8c   :  { %11511 = vmatpush3.xpose.msk.msra.mxu0 %vm417_vm6, %v2336_v50  ;;  %v2923_v50 = vld [vmem:[%s14360_s13 + $0xc8] sm:$0xff] }
 0xb8d   :  { %11515 = vmatprep.subr.mxu0 %v12139_v24 }
 0xb8f   :  { %11513 = vmatmul.mubr.msk.f32.vlgmr.msra.gmra.mxu0 %vm417_vm6, %v2248_v32  ;;  %v9964_v32 = vcombine.low %v2915_v47, %v2923_v50 }
 0xb90   :  { %11516 = vmatpush3.xpose.msk.msra.mxu0 %vm417_vm6, %v2341_v23  ;;  %11517 = vmatprep.mubr.msk.f32.mxu0 %vm12140_vm5, %v12139_v24  ;;  %v9965_v23 = vcombine.high %v2915_v47, %v2923_v50  ;;  %v2928_v50 = vld [vmem:[%s14360_s13 + $0xf0] sm:$0xff] }
 0xb91   :  { %11525 = vmatprep.subr.mxu0 %v12139_v24 }
 0xb93   :  { %11518 = vmatmul.mubr.msk.f32.vlgmr.msra.gmra.mxu0 %vm417_vm6, %v2253_v33  ;;  %v2898_v33 = vld [vmem:[%s14360_s13] sm:$0xff] }
 0xb94   :  { %11526 = vmatpush3.msra.mxu0 %v2429_v36  ;;  %11527 = vmatprep.mubr.msk.f32.mxu0 %vm12140_vm5, %v12139_v24 }
 0xc4f   :  { %v2504_v51 = vpop.f32.mrf.mxu0 }
 0xc50   :  { %v2584_v52 = vmul.f32 0.35355338, %v2504_v51  ;;  %v2906_v51 = vld [vmem:[%s14360_s13 + $0x40] sm:$0xff] }
 0xc51   :  { %v11514_v53 = vpop.f32.mrf.mxu0 }
 0xc52   :  { %v2586_v54 = vadd.f32 %v2584_v52, %v12409_v49  ;;  %v2899_v52 = vld [vmem:[%s14360_s13 + $0x8] sm:$0xff]  ;;  %v9947_v53 = vcombine.high %v2898_v33, %v2906_v51 }
 0xc53   :  { %v2580_v55 = vpop.f32.mrf.mxu0 }
 0xc54   :  { %v2585_v56 = vmul.f32 0.35355338, %v2580_v55  ;;  %v2588_v57 = vsel %vm417_vm6, %v2586_v54, -inf  ;;  %v9946_v55 = vcombine.low %v2898_v33, %v2906_v51 }
 0xc55   :  { %2589 = vmax.xlane.f32.xlu0 %v2588_v57  ;;  %v11519_v58 = vpop.f32.mrf.mxu0 }
 0xc56   :  { %v2587_v59 = vadd.f32 %v2585_v56, %v12409_v49  ;;  %v2916_v58 = vld [vmem:[%s14360_s13 + $0x90] sm:$0xff] }
 0xc58   :  { %v2591_v60 = vsel %vm417_vm6, %v2587_v59, -inf }
 0xc59   :  { %2592 = vmax.xlane.f32.xlu1 %v2591_v60  ;;  %v2917_v60 = vld [vmem:[%s14360_s13 + $0x98] sm:$0xff] }
 0xcde   :  { %v2590_v61 = vpop.xlane.xlu0 %2589 }
 0xcdf   :  { %v2594_v62 = vsub.f32 %v2586_v54, %v2590_v61  ;;  %v2907_v54 = vld [vmem:[%s14360_s13 + $0x48] sm:$0xff] }
 0xce0   :  { %v9948_v56 = vcombine.low %v2899_v52, %v2907_v54  ;;  %v9949_v57 = vcombine.high %v2899_v52, %v2907_v54  ;;  %v2912_v54 = vld [vmem:[%s14360_s13 + $0x70] sm:$0xff] }
 0xce1   :  { %v2596_v63 = vmul.f32 1.442695, %v2594_v62  ;;  %v2925_v62 = vld [vmem:[%s14360_s13 + $0xd8] sm:$0xff] }
 0xce2   :  { %v2593_v0 = vpop.xlane.xlu1 %2592 }
 0xce3   :  { %12061 = vpow2.f32 %v2596_v63  ;;  %v2595_v1 = vsub.f32 %v2587_v59, %v2593_v0  ;;  %v2924_v59 = vld [vmem:[%s14360_s13 + $0xd0] sm:$0xff]  ;;  %v12141_v63 = vmov 0  }
 0xce4   :  { %v9967_v61 = vcombine.high %v2916_v58, %v2924_v59  ;;  %v9966_v0 = vcombine.low %v2916_v58, %v2924_v59 }
 0xce5   :  { %v2598_v2 = vmul.f32 1.442695, %v2595_v1  ;;  %v9968_v1 = vcombine.low %v2917_v60, %v2925_v62 }
 0xce7   :  { %12063 = vpow2.f32 %v2598_v2  ;;  %v9969_v2 = vcombine.high %v2917_v60, %v2925_v62 }
 0xcf0   :  { %v12062_v3 = vpop.eup %12061 }
 0xcf1   :  { %v2600_v4 = vsel %vm417_vm6, %v12062_v3, 0.0 }
 0xcf2   :  { %2601 = vadd.xlane.f32.xlu0 %v2600_v4 }
 0xcf4   :  { %v12064_v5 = vpop.eup %12063 }
 0xcf5   :  { %v2603_v6 = vsel %vm417_vm6, %v12064_v5, 0.0 }
 0xcf6   :  { %2604 = vadd.xlane.f32.xlu1 %v2603_v6 }
 0xd7b   :  { %v2602_v7 = vpop.xlane.xlu0 %2601 }
 0xd7c   :  { %12065 = vrcp.f32 %v2602_v7 }
 0xd7f   :  { %v2605_v8 = vpop.xlane.xlu1 %2604 }
 0xd80   :  { %12067 = vrcp.f32 %v2605_v8 }
 0xd89   :  { %v12066_v9 = vpop.eup %12065 }
 0xd8a   :  { %v2607_v10 = vmul.f32 %v12066_v9, %v12062_v3 }
 0xd8c   :  { %11523 = vmatmul.mubr.msk.f32.vlgmr.msra.gmra.mxu1 %vm417_vm6, %v2607_v10  ;;  %v9944_v10 = vld [vmem:[%s14358_s11] ss:$0 sm:$0xff] }
 0xd8d   :  { %v12068_v11 = vpop.eup %12067  ;;  %11531 = vmatpush3.msra.mxu1 %v9940_v13 }
 0xd8e   :  { %v2609_v12 = vmul.f32 %v12068_v11, %v12064_v5  ;;  %3232 = vmatprep.subr.bf16.mxu1 %v9965_v23 }
 0xd90   :  { %11528 = vmatmul.mubr.msk.f32.vlgmr.msra.gmra.mxu0 %vm417_vm6, %v2609_v12 }
 0xd91   :  { %3209 = vmatprep.mubr.bf16.mxu0 %v12141_v63 }
 0xe4c   :  { %v2679_v14 = vpop.f32.mrf.mxu1 }
 0xe4d   :  { %11532 = vmatprep.mubr.msk.f32.mxu1 %vm417_vm6, %v2679_v14 }
 0xe4e   :  { %v11524_v15 = vpop.f32.mrf.mxu1 }
 0xe4f   :  { %v9945_v15 = vld [vmem:[%s14359_s12] ss:$0 sm:$0xff] }
 0xe50   :  { %v2752_v17 = vpop.f32.mrf.mxu0 }
 0xe51   :  { %11533 = vmatmul.mubr.msk.f32.vlgmr.msra.gmra.mxu1 %vm417_vm6, %v2752_v17 }
 0xe52   :  { %v11529_v18 = vpop.f32.mrf.mxu0  ;;  %3233 = vmatpush1.bf16.msra.mxu1 %v9964_v32  ;;  %3252 = vmatprep.mubr.bf16.mxu1 %v12141_v63  ;;  %v2929_v32 = vld [vmem:[%s14360_s13 + $0xf8] sm:$0xff] }
 0xe53   :  { %3234 = vmatprep.subr.bf16.mxu1 %v9949_v57  ;;  %v2900_v18 = vld [vmem:[%s14360_s13 + $0x10] sm:$0xff] }
 0xe56   :  { %3235 = vmatpush1.bf16.msra.mxu1 %v9948_v56  ;;  %v2913_v56 = vld [vmem:[%s14360_s13 + $0x78] sm:$0xff] }
 0xe57   :  { %3318 = vmatprep.subr.bf16.mxu1 %v9969_v2  ;;  %v11775_v2 = vld [vmem:[%s14362_s15 + $0x38] sm:$0xff]  }
 0xf11   :  { %v11534_v21 = vpop.f32.mrf.mxu1 }
 0xf12   :  { %v2840_v25 = vadd.f32 %v11534_v21, %v12671_v43  ;;  %v2908_v21 = vld [vmem:[%s14360_s13 + $0x50] sm:$0xff] }
 0xf13   :  { %v2830_v26 = vpop.f32.mrf.mxu1 }
 0xf14   :  { %v2849_v27 = vadd.f32 %v9943_v22, %v2840_v25  ;;  %v2839_v28 = vadd.f32 %v2830_v26, %v12673_v45  ;;  %v2909_v25 = vld [vmem:[%s14360_s13 + $0x58] sm:$0xff] }
 0xf16   :  { %v2848_v29 = vadd.f32 %v9943_v22, %v2839_v28  ;;  %v2851_v30 = vadd.f32 %v2849_v27, %v12361_v20  ;;  %v2901_v22 = vld [vmem:[%s14360_s13 + $0x18] sm:$0xff] }
 0xf18   :  { %v2857_v31 = vsel %vm80_vm0, %v2851_v30, 0.0  ;;  %v2850_v34 = vadd.f32 %v2848_v29, %v12351_v16  ;;  %v2914_v16 = vld [vmem:[%s14360_s13 + $0x80] sm:$0xff]  ;;  %v9951_v29 = vcombine.high %v2900_v18, %v2908_v21 }
 0xf19   :  { %2858 = vadd.xlane.f32.xlu1 %v2857_v31  ;;  %v9963_v48 = vcombine.high %v2914_v16, %v2922_v46  ;;  %v9962_v19 = vcombine.low %v2914_v16, %v2922_v46  ;;  %v2918_v31 = vld [vmem:[%s14360_s13 + $0xa0] sm:$0xff] }
 0xf1a   :  { %v2854_v35 = vsel %vm80_vm0, %v2850_v34, 0.0 }
 0xf1b   :  { %2855 = vadd.xlane.f32.xlu0 %v2854_v35  ;;  %3189 = vmatprep.subr.bf16.mxu0 %v9963_v48  ;;  %v2919_v35 = vld [vmem:[%s14360_s13 + $0xa8] sm:$0xff]  ;;  %v2920_v48 = vld [vmem:[%s14360_s13 + $0xb0] sm:$0xff] }
 0xf1c   :  { %3190 = vmatpush1.bf16.msra.mxu0 %v9962_v19  ;;  %v2921_v19 = vld [vmem:[%s14360_s13 + $0xb8] sm:$0xff]  ;;  %v9975_v51 = vcombine.high %v2920_v48, %v2928_v50  ;;  %v9974_v57 = vcombine.low %v2920_v48, %v2928_v50 }
 0xf1d   :  { %3191 = vmatprep.subr.bf16.mxu0 %v9947_v53  ;;  %v9977_v52 = vcombine.high %v2921_v19, %v2929_v32  ;;  %v2904_v53 = vld [vmem:[%s14360_s13 + $0x30] sm:$0xff]  ;;  %v9976_v58 = vcombine.low %v2921_v19, %v2929_v32 }
 0xf1e   :  { %v9959_v59 = vcombine.high %v2904_v53, %v2912_v54 }
 0xf20   :  { %3192 = vmatpush1.bf16.msra.mxu0 %v9946_v55  ;;  %v2905_v55 = vld [vmem:[%s14360_s13 + $0x38] sm:$0xff] }
 0xf21   :  { %3275 = vmatprep.subr.bf16.mxu0 %v9967_v61  ;;  %v9961_v60 = vcombine.high %v2905_v55, %v2913_v56  ;;  %v9958_v61 = vcombine.low %v2904_v53, %v2912_v54  ;;  %v9960_v62 = vcombine.low %v2905_v55, %v2913_v56  ;;  %v12977_v54 = vsub.s32 5, %v12405_v41 }
 0xf22   :  { %v12980_v55 = vsub.s32 7, %v12405_v41 }
 0xfa2   :  { %v2859_v36 = vpop.xlane.xlu1 %2858 }
 0xfa3   :  { %v2862_v37 = vmul.f32 0.03125, %v2859_v36  ;;  %v2927_v36 = vld [vmem:[%s14360_s13 + $0xe8] sm:$0xff] }
 0xfa4   :  { %v2856_v38 = vpop.xlane.xlu0 %2855  ;;  %v9972_v16 = vcombine.low %v2919_v35, %v2927_v36 }
 0xfa5   :  { %v2864_v39 = vsub.f32 %v2851_v30, %v2862_v37  ;;  %v2861_v40 = vmul.f32 0.03125, %v2856_v38  ;;  %v9953_v30 = vcombine.high %v2901_v22, %v2909_v25  ;;  %v9950_v37 = vcombine.low %v2900_v18, %v2908_v21  ;;  %v11790_v18 = vld [vmem:[%s14362_s15 + $0xd8] sm:$0xff]  }
 0xfa6   :  { %v9952_v38 = vcombine.low %v2901_v22, %v2909_v25  ;;  %v11791_v21 = vld [vmem:[%s14362_s15 + $0x18] sm:$0xff]   ;;  %v11793_v25 = vld [vmem:[%s14362_s15 + $0x50] sm:$0xff]  }
 0xfa7   :  { %v2863_v42 = vsub.f32 %v2850_v34, %v2861_v40  ;;  %v2866_v43 = vmul.f32 %v2864_v39, %v2864_v39  ;;  %v2926_v34 = vld [vmem:[%s14360_s13 + $0xe0] sm:$0xff]  ;;  %v9973_v40 = vcombine.high %v2919_v35, %v2927_v36  ;;  %v11792_v22 = vld [vmem:[%s14362_s15 + $0x98] sm:$0xff]   ;;  %v11799_v35 = vld [vmem:[%s14362_s15 + $0x8] sm:$0xff]  }
 0xfa8   :  { %v11800_v36 = vld [vmem:[%s14362_s15 + $0x88] sm:$0xff]  }
 0xfa9   :  { %v2870_v44 = vsel %vm80_vm0, %v2866_v43, 0.0  ;;  %v2865_v45 = vmul.f32 %v2863_v42, %v2863_v42  ;;  %v2910_v43 = vld [vmem:[%s14360_s13 + $0x60] sm:$0xff] }
 0xfaa   :  { %2871 = vadd.xlane.f32.xlu1 %v2870_v44  ;;  %v2903_v44 = vld [vmem:[%s14360_s13 + $0x28] sm:$0xff] }
 0xfab   :  { %v2867_v20 = vsel %vm80_vm0, %v2865_v45, 0.0  ;;  %v2911_v45 = vld [vmem:[%s14360_s13 + $0x68] sm:$0xff] }
 0xfac   :  { %2868 = vadd.xlane.f32.xlu0 %v2867_v20  ;;  %v9970_v20 = vcombine.low %v2918_v31, %v2926_v34  ;;  %v9957_v47 = vcombine.high %v2903_v44, %v2911_v45  ;;  %v9956_v33 = vcombine.low %v2903_v44, %v2911_v45  ;;  %v12952_v44 = vsub.s32 1, %v12405_v41 }
 0xfad   :  { %v12955_v45 = vsub.s32 3, %v12405_v41 }
0x1033   :  { %v2872_v3 = vpop.xlane.xlu1 %2871 }
0x1034   :  { %v2874_v4 = vmul.f32 0.03125, %v2872_v3  ;;  %v11776_v3 = vld [vmem:[%s14362_s15 + $0xb8] sm:$0xff]  }
0x1035   :  { %v2869_v5 = vpop.xlane.xlu0 %2868 }
0x1036   :  { %v2876_v6 = vadd.f32 1e-05, %v2874_v4  ;;  %v2873_v7 = vmul.f32 0.03125, %v2869_v5  ;;  %v11777_v4 = vld [vmem:[%s14362_s15 + $0x70] sm:$0xff]  }
0x1037   :  { %v11778_v5 = vld [vmem:[%s14362_s15 + $0xf0] sm:$0xff]  }
0x1038   :  { %12069 = vrsqrt.f32 %v2876_v6  ;;  %v2875_v8 = vadd.f32 1e-05, %v2873_v7  ;;  %v11779_v6 = vld [vmem:[%s14362_s15 + $0x30] sm:$0xff]  }
0x1039   :  { %v11780_v7 = vld [vmem:[%s14362_s15 + $0xb0] sm:$0xff]  }
0x103a   :  { %12071 = vrsqrt.f32 %v2875_v8  ;;  %v11781_v8 = vld [vmem:[%s14362_s15 + $0x68] sm:$0xff]  }
0x1045   :  { %v12070_v9 = vpop.eup %12069 }
0x1046   :  { %v2880_v11 = vmul.f32 %v12070_v9, %v2864_v39  ;;  %v9971_v39 = vcombine.high %v2918_v31, %v2926_v34  ;;  %v11782_v9 = vld [vmem:[%s14362_s15 + $0xe8] sm:$0xff]  }
0x1047   :  { %v12072_v12 = vpop.eup %12071  ;;  %v11797_v31 = vld [vmem:[%s14362_s15 + $0x48] sm:$0xff]  }
0x1048   :  { %v2888_v13 = vmul.f32 %v9944_v10, %v2880_v11  ;;  %v2879_v14 = vmul.f32 %v12072_v12, %v2863_v42  ;;  %v2902_v42 = vld [vmem:[%s14360_s13 + $0x20] sm:$0xff]  ;;  %v11784_v11 = vld [vmem:[%s14362_s15 + $0xa8] sm:$0xff]  }
0x1049   :  { %v9955_v46 = vcombine.high %v2902_v42, %v2910_v43  ;;  %v9954_v23 = vcombine.low %v2902_v42, %v2910_v43  ;;  %v11785_v12 = vld [vmem:[%s14362_s15 + $0x60] sm:$0xff]   ;;  %v11798_v34 = vld [vmem:[%s14362_s15 + $0xc8] sm:$0xff]   ;;  %v11805_v42 = vld [vmem:[%s14362_s15 + $0x178] sm:$0xff]  }
0x104a   :  { %v2887_v17 = vmul.f32 %v9944_v10, %v2879_v14  ;;  %v12771_v26 = vadd.f32 %v9945_v15, %v2888_v13  ;;  %v11783_v10 = vld [vmem:[%s14362_s15 + $0x28] sm:$0xff]   ;;  %v11786_v13 = vld [vmem:[%s14362_s15 + $0xe0] sm:$0xff]   ;;  %v11806_v43 = vld [vmem:[%s14362_s15 + $0x1f8] sm:$0xff]  }
0x104b   :  { %v11787_v14 = vld [vmem:[%s14362_s15 + $0x20] sm:$0xff]  }
0x104c   :  { %v12773_v27 = vadd.f32 %v9945_v15, %v2887_v17  ;;  %v11788_v15 = vld [vmem:[%s14362_s15 + $0xa0] sm:$0xff]   ;;  %v11789_v17 = vld [vmem:[%s14362_s15 + $0x58] sm:$0xff]  }
0x104e   :  { %v12777_v28 = vpack.c.bf16 %v12771_v26, %v12773_v27 }
0x1050   :  { %9978 = vmatmul.mubr.msk.bf16.vlgmr.msra.gmra.mxu0 %vm80_vm0, %v12777_v28  ;;  %9979 = vmatmul.mubr.msk.bf16.vlgmr.msra.gmra.mxu1 %vm80_vm0, %v12777_v28 }
0x1051   :  { %3276 = vmatpush1.bf16.msra.mxu0 %v9966_v0  ;;  %3319 = vmatpush1.bf16.msra.mxu1 %v9968_v1  ;;  %v11773_v0 = vld [vmem:[%s14362_s15 + $0x78] sm:$0xff]  }
0x1052   :  { %3277 = vmatprep.subr.bf16.mxu0 %v9951_v29  ;;  %3320 = vmatprep.subr.bf16.mxu1 %v9953_v30  ;;  %v11774_v1 = vld [vmem:[%s14362_s15 + $0xf8] sm:$0xff]   ;;  %v11795_v29 = vld [vmem:[%s14362_s15 + $0x10] sm:$0xff]  }
0x1053   :  { %3295 = vmatprep.mubr.bf16.mxu0 %v12141_v63  ;;  %3338 = vmatprep.mubr.bf16.mxu1 %v12141_v63  ;;  %v11796_v30 = vld [vmem:[%s14362_s15 + $0x90] sm:$0xff]  }
0x1055   :  { %3278 = vmatpush1.bf16.msra.mxu0 %v9950_v37  ;;  %3321 = vmatpush1.bf16.msra.mxu1 %v9952_v38  ;;  %v11801_v37 = vld [vmem:[%s14362_s15 + $0x40] sm:$0xff]  }
0x1056   :  { %3361 = vmatprep.subr.bf16.mxu0 %v9971_v39  ;;  %3404 = vmatprep.subr.bf16.mxu1 %v9973_v40  ;;  %v11802_v38 = vld [vmem:[%s14362_s15 + $0xc0] sm:$0xff]  }
0x1057   :  { %v11803_v39 = vld [vmem:[%s14362_s15] sm:$0xff]  }
0x1058   :  { %9980 = vmatmul.mubr.msk.bf16.vlgmr.msra.gmra.mxu0 %vm80_vm0, %v12777_v28  ;;  %9981 = vmatmul.mubr.msk.bf16.vlgmr.msra.gmra.mxu1 %vm80_vm0, %v12777_v28  ;;  %v11804_v40 = vld [vmem:[%s14362_s15 + $0x80] sm:$0xff]  }
0x1059   :  { %3362 = vmatpush1.bf16.msra.mxu0 %v9970_v20  ;;  %3405 = vmatpush1.bf16.msra.mxu1 %v9972_v16  ;;  %v12958_v20 = vsub.s32 0, %v12405_v41  ;;  %v12961_v16 = vsub.s32 2, %v12405_v41 }
0x105a   :  { %3363 = vmatprep.subr.bf16.mxu0 %v9955_v46  ;;  %3406 = vmatprep.subr.bf16.mxu1 %v9957_v47  ;;  %v12966_v46 = vld [vmem:[%s14361_s14] sm:$0xff] }
0x105b   :  { %3381 = vmatprep.mubr.bf16.mxu0 %v12141_v63  ;;  %3424 = vmatprep.mubr.bf16.mxu1 %v12141_v63  ;;  %v2941_v50 = vrot.slane %v12966_v46, %v12952_v44  ;;  %v2949_v19 = vrot.slane %v12966_v46, %v12955_v45  ;;  %v2937_v32 = vrot.slane %v12966_v46, %v12958_v20 }
0x105d   :  { %3364 = vmatpush1.bf16.msra.mxu0 %v9954_v23  ;;  %3407 = vmatpush1.bf16.msra.mxu1 %v9956_v33  ;;  %v2945_v23 = vrot.slane %v12966_v46, %v12961_v16 }
0x105e   :  { %3447 = vmatprep.subr.bf16.mxu0 %v9975_v51  ;;  %3490 = vmatprep.subr.bf16.mxu1 %v9977_v52 }
0x1060   :  { %9982 = vmatmul.mubr.msk.bf16.vlgmr.msra.gmra.mxu0 %vm80_vm0, %v12777_v28  ;;  %9983 = vmatmul.mubr.msk.bf16.vlgmr.msra.gmra.mxu1 %vm80_vm0, %v12777_v28 }
0x1061   :  { %3448 = vmatpush1.bf16.msra.mxu0 %v9974_v57  ;;  %3491 = vmatpush1.bf16.msra.mxu1 %v9976_v58 }
0x1062   :  { %3449 = vmatprep.subr.bf16.mxu0 %v9959_v59  ;;  %3492 = vmatprep.subr.bf16.mxu1 %v9961_v60 }
0x1063   :  { %3467 = vmatprep.mubr.bf16.mxu0 %v12141_v63  ;;  %3510 = vmatprep.mubr.bf16.mxu1 %v12141_v63 }
0x1065   :  { %3450 = vmatpush1.bf16.msra.mxu0 %v9958_v61  ;;  %3493 = vmatpush1.bf16.msra.mxu1 %v9960_v62 }
0x1066   :  { %10835 = vmatprep.subr.bf16.mxu0 %v11773_v0  ;;  %10857 = vmatprep.subr.bf16.mxu1 %v11774_v1 }
0x1068   :  { %9984 = vmatmul.mubr.msk.bf16.vlgmr.msra.gmra.mxu0 %vm80_vm0, %v12777_v28  ;;  %9985 = vmatmul.mubr.msk.bf16.vlgmr.msra.gmra.mxu1 %vm80_vm0, %v12777_v28  ;;  %v11794_v28 = vld [vmem:[%s14362_s15 + $0xd0] sm:$0xff]  }
0x1069   :  { %10836 = vmatpush3.bf16.msra.mxu0 %v11775_v2  ;;  %10858 = vmatpush3.bf16.msra.mxu1 %v11776_v3 }
0x106a   :  { %10837 = vmatprep.subr.bf16.mxu0 %v11777_v4  ;;  %10859 = vmatprep.subr.bf16.mxu1 %v11778_v5 }
0x106d   :  { %10838 = vmatpush3.bf16.msra.mxu0 %v11779_v6  ;;  %10860 = vmatpush3.bf16.msra.mxu1 %v11780_v7  ;;  %v2957_v7 = vrot.slane %v12966_v46, %v12977_v54 }
0x106e   :  { %10839 = vmatprep.subr.bf16.mxu0 %v11781_v8  ;;  %10861 = vmatprep.subr.bf16.mxu1 %v11782_v9  ;;  %v2965_v8 = vrot.slane %v12966_v46, %v12980_v55 }
0x1071   :  { %10840 = vmatpush3.bf16.msra.mxu0 %v11783_v10  ;;  %10862 = vmatpush3.bf16.msra.mxu1 %v11784_v11 }
0x1072   :  { %10841 = vmatprep.subr.bf16.mxu0 %v11785_v12  ;;  %10863 = vmatprep.subr.bf16.mxu1 %v11786_v13 }
0x1075   :  { %10842 = vmatpush3.bf16.msra.mxu0 %v11787_v14  ;;  %10864 = vmatpush3.bf16.msra.mxu1 %v11788_v15 }
0x1076   :  { %10843 = vmatprep.subr.bf16.mxu0 %v11789_v17  ;;  %10865 = vmatprep.subr.bf16.mxu1 %v11790_v18 }
0x1079   :  { %10844 = vmatpush3.bf16.msra.mxu0 %v11791_v21  ;;  %10866 = vmatpush3.bf16.msra.mxu1 %v11792_v22  ;;  %v11807_v22 = vld [vmem:[%s14362_s15 + $0x138] sm:$0xff]  }
0x107a   :  { %10845 = vmatprep.subr.bf16.mxu0 %v11793_v25  ;;  %10867 = vmatprep.subr.bf16.mxu1 %v11794_v28  ;;  %v11808_v25 = vld [vmem:[%s14362_s15 + $0x1b8] sm:$0xff]  }
0x107d   :  { %10846 = vmatpush3.bf16.msra.mxu0 %v11795_v29  ;;  %10868 = vmatpush3.bf16.msra.mxu1 %v11796_v30 }
0x107e   :  { %10847 = vmatprep.subr.bf16.mxu0 %v11797_v31  ;;  %10869 = vmatprep.subr.bf16.mxu1 %v11798_v34  ;;  %v11809_v34 = vld [vmem:[%s14362_s15 + $0x170] sm:$0xff]  }
0x1081   :  { %10848 = vmatpush3.bf16.msra.mxu0 %v11799_v35  ;;  %10870 = vmatpush3.bf16.msra.mxu1 %v11800_v36  ;;  %v11810_v35 = vld [vmem:[%s14362_s15 + $0x1f0] sm:$0xff]  }
0x1082   :  { %10849 = vmatprep.subr.bf16.mxu0 %v11801_v37  ;;  %10871 = vmatprep.subr.bf16.mxu1 %v11802_v38 }
0x1085   :  { %10850 = vmatpush3.bf16.msra.mxu0 %v11803_v39  ;;  %10872 = vmatpush3.bf16.msra.mxu1 %v11804_v40 }
0x1086   :  { %10879 = vmatprep.subr.bf16.mxu0 %v11805_v42  ;;  %10901 = vmatprep.subr.bf16.mxu1 %v11806_v43  ;;  %v11811_v43 = vld [vmem:[%s14362_s15 + $0x130] sm:$0xff]  }
0x1110   :  { %v3211_v47 = vpop.f32.mrf.mxu0  ;;  %v3254_v48 = vpop.f32.mrf.mxu1 }
0x1111   :  { %v3212_v60 = vadd.f32 %v3211_v47, %v2937_v32  ;;  %v3255_v61 = vadd.f32 %v3254_v48, %v2945_v23  ;;  %v11812_v47 = vld [vmem:[%s14362_s15 + $0x1b0] sm:$0xff]   ;;  %v11813_v48 = vld [vmem:[%s14362_s15 + $0x168] sm:$0xff]  }
0x1112   :  { %v3213_v33 = vpop.f32.mrf.mxu0  ;;  %v3256_v51 = vpop.f32.mrf.mxu1 }
0x1113   :  { %v3214_v56 = vadd.f32 %v3213_v33, %v2941_v50  ;;  %v3257_v57 = vadd.f32 %v3256_v51, %v2949_v19  ;;  %v3521_v13 = vmax.f32 %v3212_v60, 0.0  ;;  %v3523_v14 = vmax.f32 %v3255_v61, 0.0  ;;  %v11814_v33 = vld [vmem:[%s14362_s15 + $0x1e8] sm:$0xff]   ;;  %v11819_v60 = vld [vmem:[%s14362_s15 + $0x120] sm:$0xff]  }
0x1114   :  { %v3215_v52 = vpop.f32.mrf.mxu0  ;;  %v3258_v53 = vpop.f32.mrf.mxu1 }
0x1115   :  { %v3216_v58 = vadd.f32 %v3215_v52, %v2937_v32  ;;  %v3259_v59 = vadd.f32 %v3258_v53, %v2945_v23  ;;  %v3522_v9 = vmax.f32 %v3214_v56, 0.0  ;;  %v3524_v10 = vmax.f32 %v3257_v57, 0.0  ;;  %v11815_v53 = vld [vmem:[%s14362_s15 + $0x128] sm:$0xff]   ;;  %v11817_v57 = vld [vmem:[%s14362_s15 + $0x160] sm:$0xff]  }
0x1116   :  { %v3217_v62 = vpop.f32.mrf.mxu0  ;;  %v3260_v0 = vpop.f32.mrf.mxu1  ;;  %v11816_v56 = vld [vmem:[%s14362_s15 + $0x1a8] sm:$0xff]  }
0x1117   :  { %v3218_v1 = vadd.f32 %v3217_v62, %v2941_v50  ;;  %v3261_v2 = vadd.f32 %v3260_v0, %v2949_v19  ;;  %v3537_v3 = vmax.f32 %v3216_v58, 0.0  ;;  %v3539_v4 = vmax.f32 %v3259_v59, 0.0  ;;  %v11818_v58 = vld [vmem:[%s14362_s15 + $0x1e0] sm:$0xff]   ;;  %v11821_v0 = vld [vmem:[%s14362_s15 + $0x158] sm:$0xff]  }
0x1118   :  { %v12982_v5 = vpop.f32.mrf.mxu0  ;;  %v12984_v6 = vpop.f32.mrf.mxu1  ;;  %v11820_v62 = vld [vmem:[%s14362_s15 + $0x1a0] sm:$0xff]  }
0x1119   :  { %v3538_v11 = vmax.f32 %v3218_v1, 0.0  ;;  %v3540_v12 = vmax.f32 %v3261_v2, 0.0  ;;  %v3553_v28 = vpack.c.bf16 %v3537_v3, %v3521_v13  ;;  %v3555_v29 = vpack.c.bf16 %v3539_v4, %v3523_v14  ;;  %v11822_v1 = vld [vmem:[%s14362_s15 + $0x1d8] sm:$0xff]   ;;  %v11827_v13 = vld [vmem:[%s14362_s15 + $0x110] sm:$0xff]  }
0x111a   :  { %v3299_v15 = vpop.f32.mrf.mxu0  ;;  %v3342_v17 = vpop.f32.mrf.mxu1  ;;  %v11823_v3 = vld [vmem:[%s14362_s15 + $0x118] sm:$0xff]  }
0x111b   :  { %v3554_v18 = vpack.c.bf16 %v3538_v11, %v3522_v9  ;;  %v3556_v21 = vpack.c.bf16 %v3540_v12, %v3524_v10  ;;  %v3300_v36 = vadd.f32 %v3299_v15, %v2957_v7  ;;  %v3343_v37 = vadd.f32 %v3342_v17, %v2965_v8  ;;  %v11826_v9 = vld [vmem:[%s14362_s15 + $0x1d0] sm:$0xff]   ;;  %v11830_v17 = vld [vmem:[%s14362_s15 + $0x1c8] sm:$0xff]  }
0x111c   :  { %v12996_v30 = vpop.f32.mrf.mxu0  ;;  %v12998_v31 = vpop.f32.mrf.mxu1  ;;  %v13059_v10 = vsub.s32 4, %v12405_v41  ;;  %v13062_v11 = vsub.s32 6, %v12405_v41  ;;  %v11828_v15 = vld [vmem:[%s14362_s15 + $0x190] sm:$0xff]   ;;  %v11829_v41 = vld [vmem:[%s14362_s15 + $0x148] sm:$0xff]  }
0x111d   :  { %4632 = vmatprep.mubr.bf16.mxu0 %v3554_v18  ;;  %4673 = vmatprep.mubr.bf16.mxu1 %v3556_v21  ;;  %v3526_v50 = vmax.f32 %v3300_v36, 0.0  ;;  %v3528_v19 = vmax.f32 %v3343_v37, 0.0  ;;  %v11833_v36 = vld [vmem:[%s14362_s15 + $0x140] sm:$0xff]  }
0x111e   :  { %v3303_v38 = vpop.f32.mrf.mxu0  ;;  %v3346_v39 = vpop.f32.mrf.mxu1  ;;  %4633 = vmatmul.mubr.bf16.vlgmr.msra.gmra.mxu0 %v3553_v28  ;;  %4674 = vmatmul.mubr.bf16.vlgmr.msra.gmra.mxu1 %v3555_v29  ;;  %v2953_v18 = vrot.slane %v12966_v46, %v13059_v10  ;;  %v2961_v21 = vrot.slane %v12966_v46, %v13062_v11  ;;  %v11831_v28 = vld [vmem:[%s14362_s15 + $0x108] sm:$0xff]  }
0x111f   :  { %v3304_v40 = vadd.f32 %v3303_v38, %v2957_v7  ;;  %v3347_v42 = vadd.f32 %v3346_v39, %v2965_v8  ;;  %10880 = vmatpush3.bf16.msra.mxu0 %v11807_v22  ;;  %10902 = vmatpush3.bf16.msra.mxu1 %v11808_v25  ;;  %v11824_v7 = vld [vmem:[%s14362_s15 + $0x198] sm:$0xff]   ;;  %v11825_v8 = vld [vmem:[%s14362_s15 + $0x150] sm:$0xff]   ;;  %v13087_v22 = vld [vmem:[%s14361_s14 + $0x8] sm:$0xff] }
0x1120   :  { %10881 = vmatprep.subr.bf16.mxu0 %v11809_v34  ;;  %10903 = vmatprep.subr.bf16.mxu1 %v11810_v35  ;;  %v13030_v59 = vpop.f32.mrf.mxu0  ;;  %v13035_v61 = vpop.f32.mrf.mxu1  ;;  %v3302_v29 = vadd.f32 %v12996_v30, %v2953_v18  ;;  %v2973_v34 = vrot.slane %v13087_v22, %v12952_v44  ;;  %v11832_v46 = vld [vmem:[%s14362_s15 + $0x188] sm:$0xff]   ;;  %v3345_v37 = vadd.f32 %v12998_v31, %v2961_v21  ;;  %v11834_v30 = vld [vmem:[%s14362_s15 + $0x1c0] sm:$0xff]  }
0x1121   :  { %v3542_v32 = vmax.f32 %v3304_v40, 0.0  ;;  %v3544_v23 = vmax.f32 %v3347_v42, 0.0  ;;  %v2981_v38 = vrot.slane %v13087_v22, %v12955_v45  ;;  %v3298_v39 = vadd.f32 %v12982_v5, %v2953_v18  ;;  %v11837_v5 = vld [vmem:[%s14362_s15 + $0x278] sm:$0xff]  }
0x1122   :  { %v3385_v2 = vpop.f32.mrf.mxu0  ;;  %v3428_v4 = vpop.f32.mrf.mxu1  ;;  %v3341_v42 = vadd.f32 %v12984_v6, %v2961_v21  ;;  %v3541_v31 = vmax.f32 %v3302_v29, 0.0  ;;  %v11851_v21 = vld [vmem:[%s14362_s15 + $0x220] sm:$0xff]   ;;  %v11853_v29 = vld [vmem:[%s14362_s15 + $0x258] sm:$0xff]  }
0x1123   :  { %v3558_v51 = vpack.c.bf16 %v3542_v32, %v3526_v50  ;;  %v3560_v52 = vpack.c.bf16 %v3544_v23, %v3528_v19  ;;  %10882 = vmatpush3.bf16.msra.mxu0 %v11811_v43  ;;  %10904 = vmatpush3.bf16.msra.mxu1 %v11812_v47  ;;  %v11835_v47 = vld [vmem:[%s14362_s15 + $0x100] sm:$0xff]   ;;  %v3543_v19 = vmax.f32 %v3345_v37, 0.0  ;;  %v3429_v6 = vadd.f32 %v3428_v4, %v2981_v38  ;;  %v11838_v32 = vld [vmem:[%s14362_s15 + $0x2f8] sm:$0xff]   ;;  %v11843_v4 = vld [vmem:[%s14362_s15 + $0x230] sm:$0xff]  }
0x1124   :  { %10883 = vmatprep.subr.bf16.mxu0 %v11813_v48  ;;  %10905 = vmatprep.subr.bf16.mxu1 %v11814_v33  ;;  %v13064_v12 = vpop.f32.mrf.mxu0  ;;  %v13069_v14 = vpop.f32.mrf.mxu1  ;;  %v3386_v48 = vadd.f32 %v3385_v2, %v2973_v34  ;;  %v11836_v50 = vld [vmem:[%s14362_s15 + $0x180] sm:$0xff]   ;;  %v3525_v23 = vmax.f32 %v3298_v39, 0.0  ;;  %v11842_v2 = vld [vmem:[%s14362_s15 + $0x2f0] sm:$0xff]   ;;  %v11856_v37 = vld [vmem:[%s14362_s15 + $0x298] sm:$0xff]  }
0x1125   :  { %4714 = vmatprep.mubr.bf16.mxu0 %v3558_v51  ;;  %4755 = vmatprep.mubr.bf16.mxu1 %v3560_v52  ;;  %v3527_v51 = vmax.f32 %v3341_v42, 0.0 }
0x1126   :  { %v3389_v25 = vpop.f32.mrf.mxu0  ;;  %v3432_v35 = vpop.f32.mrf.mxu1 }
0x1127   :  { %10884 = vmatpush3.bf16.msra.mxu0 %v11815_v53  ;;  %10906 = vmatpush3.bf16.msra.mxu1 %v11816_v56  ;;  %v3390_v40 = vadd.f32 %v3389_v25, %v2973_v34  ;;  %v3433_v43 = vadd.f32 %v3432_v35, %v2981_v38  ;;  %v11839_v53 = vld [vmem:[%s14362_s15 + $0x238] sm:$0xff]   ;;  %v3557_v56 = vpack.c.bf16 %v3541_v31, %v3525_v23  ;;  %v11857_v38 = vld [vmem:[%s14362_s15 + $0x250] sm:$0xff]   ;;  %v11862_v31 = vld [vmem:[%s14362_s15 + $0x2c8] sm:$0xff]  }
0x1128   :  { %10885 = vmatprep.subr.bf16.mxu0 %v11817_v57  ;;  %10907 = vmatprep.subr.bf16.mxu1 %v11818_v58  ;;  %v3530_v57 = vmax.f32 %v3386_v48, 0.0  ;;  %v11840_v58 = vld [vmem:[%s14362_s15 + $0x2b8] sm:$0xff]   ;;  %v13157_v18 = vpop.f32.mrf.mxu0  ;;  %v13162_v25 = vpop.f32.mrf.mxu1  ;;  %v2969_v48 = vrot.slane %v13087_v22, %v12958_v20 }
0x1129   :  { %v3546_v33 = vmax.f32 %v3390_v40, 0.0  ;;  %v3548_v52 = vmax.f32 %v3433_v43, 0.0  ;;  %v11854_v34 = vld [vmem:[%s14362_s15 + $0x2d8] sm:$0xff]   ;;  %v11859_v40 = vld [vmem:[%s14362_s15 + $0x210] sm:$0xff]  }
0x112a   :  { %v3471_v35 = vpop.f32.mrf.mxu0  ;;  %v11860_v43 = vld [vmem:[%s14362_s15 + $0x290] sm:$0xff]  }
0x112b   :  { %10886 = vmatpush3.bf16.msra.mxu0 %v11819_v60  ;;  %10908 = vmatpush3.bf16.msra.mxu1 %v11820_v62  ;;  %v3559_v60 = vpack.c.bf16 %v3543_v19, %v3527_v51  ;;  %v3532_v62 = vmax.f32 %v3429_v6, 0.0  ;;  %v11863_v19 = vld [vmem:[%s14362_s15 + $0x208] sm:$0xff]   ;;  %v3388_v6 = vadd.f32 %v13064_v12, %v2969_v48  ;;  %v11865_v51 = vld [vmem:[%s14362_s15 + $0x240] sm:$0xff]  }
0x112c   :  { %10887 = vmatprep.subr.bf16.mxu0 %v11821_v0  ;;  %10909 = vmatprep.subr.bf16.mxu1 %v11822_v1  ;;  %v11841_v0 = vld [vmem:[%s14362_s15 + $0x270] sm:$0xff]   ;;  %v3562_v1 = vpack.c.bf16 %v3546_v33, %v3530_v57  ;;  %v13185_v39 = vpop.f32.mrf.mxu0  ;;  %v11864_v33 = vld [vmem:[%s14362_s15 + $0x288] sm:$0xff]   ;;  %v11866_v12 = vld [vmem:[%s14362_s15 + $0x2c0] sm:$0xff]  }
0x112f   :  { %10888 = vmatpush3.bf16.msra.mxu0 %v11823_v3  ;;  %10910 = vmatpush3.bf16.msra.mxu1 %v11824_v7  ;;  %v3564_v3 = vpack.c.bf16 %v3548_v52, %v3532_v62  ;;  %v11844_v7 = vld [vmem:[%s14362_s15 + $0x2b0] sm:$0xff]   ;;  %v11867_v62 = vld [vmem:[%s14362_s15 + $0x200] sm:$0xff]  }
0x1130   :  { %10889 = vmatprep.subr.bf16.mxu0 %v11825_v8  ;;  %10911 = vmatprep.subr.bf16.mxu1 %v11826_v9  ;;  %v11845_v8 = vld [vmem:[%s14362_s15 + $0x268] sm:$0xff]  }
0x1131   :  { %v11846_v9 = vld [vmem:[%s14362_s15 + $0x2e8] sm:$0xff]  }
0x1133   :  { %10890 = vmatpush3.bf16.msra.mxu0 %v11827_v13  ;;  %10912 = vmatpush3.bf16.msra.mxu1 %v11828_v15  ;;  %v11847_v13 = vld [vmem:[%s14362_s15 + $0x228] sm:$0xff]  }
0x1134   :  { %10891 = vmatprep.subr.bf16.mxu0 %v11829_v41  ;;  %10913 = vmatprep.subr.bf16.mxu1 %v11830_v17  ;;  %v11848_v15 = vld [vmem:[%s14362_s15 + $0x2a8] sm:$0xff]   ;;  %v11849_v41 = vld [vmem:[%s14362_s15 + $0x260] sm:$0xff]  }
0x1135   :  { %v11850_v17 = vld [vmem:[%s14362_s15 + $0x2e0] sm:$0xff]  }
0x1137   :  { %10892 = vmatpush3.bf16.msra.mxu0 %v11831_v28  ;;  %10914 = vmatpush3.bf16.msra.mxu1 %v11832_v46  ;;  %v11852_v28 = vld [vmem:[%s14362_s15 + $0x2a0] sm:$0xff]   ;;  %v11855_v46 = vld [vmem:[%s14362_s15 + $0x218] sm:$0xff]  }
0x1138   :  { %10893 = vmatprep.subr.bf16.mxu0 %v11833_v36  ;;  %10915 = vmatprep.subr.bf16.mxu1 %v11834_v30  ;;  %v3514_v36 = vpop.f32.mrf.mxu1  ;;  %v11858_v30 = vld [vmem:[%s14362_s15 + $0x2d0] sm:$0xff]  }
0x113a   :  { %v13190_v42 = vpop.f32.mrf.mxu1 }
0x113b   :  { %10894 = vmatpush3.bf16.msra.mxu0 %v11835_v47  ;;  %10916 = vmatpush3.bf16.msra.mxu1 %v11836_v50  ;;  %v11861_v47 = vld [vmem:[%s14362_s15 + $0x248] sm:$0xff]   ;;  %v2977_v50 = vrot.slane %v13087_v22, %v12961_v16 }
0x113c   :  { %10923 = vmatprep.subr.bf16.mxu0 %v11837_v5  ;;  %10945 = vmatprep.subr.bf16.mxu1 %v11838_v32  ;;  %v3475_v5 = vpop.f32.mrf.mxu0  ;;  %v2989_v32 = vrot.slane %v13087_v22, %v12977_v54  ;;  %v3518_v23 = vpop.f32.mrf.mxu1 }
0x113d   :  { %v3431_v52 = vadd.f32 %v13069_v14, %v2977_v50  ;;  %v3545_v14 = vmax.f32 %v3388_v6, 0.0  ;;  %v11887_v6 = vld [vmem:[%s14362_s15 + $0x318] sm:$0xff]  }
0x113e   :  { %4715 = vmatmul.mubr.bf16.vlgmr.msra.gmra.mxu0 %v3557_v56  ;;  %4756 = vmatmul.mubr.bf16.vlgmr.msra.gmra.mxu1 %v3559_v60  ;;  %v3384_v56 = vadd.f32 %v13030_v59, %v2969_v48  ;;  %v3476_v57 = vadd.f32 %v3475_v5, %v2989_v32  ;;  %v11869_v59 = vld [vmem:[%s14362_s15 + $0x378] sm:$0xff]   ;;  %v11883_v48 = vld [vmem:[%s14362_s15 + $0x320] sm:$0xff]  }
0x113f   :  { %10924 = vmatpush3.bf16.msra.mxu0 %v11839_v53  ;;  %4796 = vmatprep.mubr.bf16.mxu0 %v3562_v1  ;;  %v2997_v53 = vrot.slane %v13087_v22, %v12980_v55  ;;  %v11868_v1 = vld [vmem:[%s14362_s15 + $0x280] sm:$0xff]   ;;  %v11885_v5 = vld [vmem:[%s14362_s15 + $0x358] sm:$0xff]  }
0x1140   :  { %10946 = vmatpush3.bf16.msra.mxu1 %v11840_v58  ;;  %4837 = vmatprep.mubr.bf16.mxu1 %v3564_v3  ;;  %v3427_v58 = vadd.f32 %v13035_v61, %v2977_v50  ;;  %v11870_v3 = vld [vmem:[%s14362_s15 + $0x3f8] sm:$0xff]   ;;  %v11884_v50 = vld [vmem:[%s14362_s15 + $0x3a0] sm:$0xff]  }
0x1141   :  { %10925 = vmatprep.subr.bf16.mxu0 %v11841_v0  ;;  %10947 = vmatprep.subr.bf16.mxu1 %v11842_v2  ;;  %v3519_v60 = vadd.f32 %v3518_v23, %v2997_v53  ;;  %v3472_v0 = vadd.f32 %v3471_v35, %v2989_v32  ;;  %v3547_v2 = vmax.f32 %v3431_v52, 0.0  ;;  %v3515_v61 = vadd.f32 %v3514_v36, %v2997_v53  ;;  %v11874_v35 = vld [vmem:[%s14362_s15 + $0x3f0] sm:$0xff]   ;;  %v11888_v32 = vld [vmem:[%s14362_s15 + $0x398] sm:$0xff]   ;;  %v11893_v53 = vld [vmem:[%s14362_s15 + $0x348] sm:$0xff]  }
0x1142   :  { %v11875_v36 = vld [vmem:[%s14362_s15 + $0x330] sm:$0xff]  }
0x1143   :  { %10926 = vmatpush3.bf16.msra.mxu0 %v11843_v4  ;;  %v3529_v4 = vmax.f32 %v3384_v56, 0.0  ;;  %v11889_v23 = vld [vmem:[%s14362_s15 + $0x350] sm:$0xff]   ;;  %v2985_v56 = vrot.slane %v13087_v22, %v13059_v10 }
0x1144   :  { %10948 = vmatpush3.bf16.msra.mxu1 %v11844_v7  ;;  %10927 = vmatprep.subr.bf16.mxu0 %v11845_v8  ;;  %v3550_v7 = vmax.f32 %v3476_v57, 0.0  ;;  %v3531_v8 = vmax.f32 %v3427_v58, 0.0  ;;  %v11892_v52 = vld [vmem:[%s14362_s15 + $0x390] sm:$0xff]   ;;  %v2993_v57 = vrot.slane %v13087_v22, %v13062_v11  ;;  %v11895_v58 = vld [vmem:[%s14362_s15 + $0x308] sm:$0xff]   ;;  %v11898_v22 = vld [vmem:[%s14362_s15 + $0x3c0] sm:$0xff]  }
0x1145   :  { %10949 = vmatprep.subr.bf16.mxu1 %v11846_v9  ;;  %v3552_v9 = vmax.f32 %v3519_v60, 0.0  ;;  %v3474_v60 = vadd.f32 %v13185_v39, %v2985_v56 }
0x1146   :  { %v3513_v39 = vadd.f32 %v13162_v25, %v2993_v57 }
0x1147   :  { %10928 = vmatpush3.bf16.msra.mxu0 %v11847_v13  ;;  %v11871_v13 = vld [vmem:[%s14362_s15 + $0x338] sm:$0xff]  }
0x1148   :  { %10950 = vmatpush3.bf16.msra.mxu1 %v11848_v15  ;;  %10929 = vmatprep.subr.bf16.mxu0 %v11849_v41  ;;  %v3561_v15 = vpack.c.bf16 %v3545_v14, %v3529_v4  ;;  %v3534_v41 = vmax.f32 %v3472_v0, 0.0  ;;  %v11897_v14 = vld [vmem:[%s14362_s15 + $0x340] sm:$0xff]   ;;  %v3517_v0 = vadd.f32 %v13190_v42, %v2993_v57  ;;  %v3535_v4 = vmax.f32 %v3513_v39, 0.0 }
0x1149   :  { %10951 = vmatprep.subr.bf16.mxu1 %v11850_v17  ;;  %v11872_v17 = vld [vmem:[%s14362_s15 + $0x3b8] sm:$0xff]   ;;  %v11900_v42 = vld [vmem:[%s14362_s15 + $0x380] sm:$0xff]  }
0x114b   :  { %10930 = vmatpush3.bf16.msra.mxu0 %v11851_v21  ;;  %v3563_v21 = vpack.c.bf16 %v3547_v2, %v3531_v8  ;;  %v3549_v2 = vmax.f32 %v3474_v60, 0.0 }
0x114c   :  { %10952 = vmatpush3.bf16.msra.mxu1 %v11852_v28  ;;  %10931 = vmatprep.subr.bf16.mxu0 %v11853_v29  ;;  %v3536_v28 = vmax.f32 %v3515_v61, 0.0  ;;  %v11873_v29 = vld [vmem:[%s14362_s15 + $0x370] sm:$0xff]   ;;  %v3551_v61 = vmax.f32 %v3517_v0, 0.0 }
0x114d   :  { %10953 = vmatprep.subr.bf16.mxu1 %v11854_v34  ;;  %v3566_v34 = vpack.c.bf16 %v3550_v7, %v3534_v41 }
0x114e   :  { %v3567_v25 = vpack.c.bf16 %v3551_v61, %v3535_v4 }
0x114f   :  { %10932 = vmatpush3.bf16.msra.mxu0 %v11855_v46  ;;  %v3568_v46 = vpack.c.bf16 %v3552_v9, %v3536_v28 }
0x1150   :  { %10954 = vmatpush3.bf16.msra.mxu1 %v11856_v37  ;;  %10933 = vmatprep.subr.bf16.mxu0 %v11857_v38  ;;  %v11876_v37 = vld [vmem:[%s14362_s15 + $0x3b0] sm:$0xff]   ;;  %v11877_v38 = vld [vmem:[%s14362_s15 + $0x368] sm:$0xff]  }
0x1151   :  { %10955 = vmatprep.subr.bf16.mxu1 %v11858_v30  ;;  %v11878_v30 = vld [vmem:[%s14362_s15 + $0x3e8] sm:$0xff]  }
0x1153   :  { %10934 = vmatpush3.bf16.msra.mxu0 %v11859_v40  ;;  %v11879_v40 = vld [vmem:[%s14362_s15 + $0x328] sm:$0xff]  }
0x1154   :  { %10956 = vmatpush3.bf16.msra.mxu1 %v11860_v43  ;;  %10935 = vmatprep.subr.bf16.mxu0 %v11861_v47  ;;  %v11880_v43 = vld [vmem:[%s14362_s15 + $0x3a8] sm:$0xff]   ;;  %v11881_v47 = vld [vmem:[%s14362_s15 + $0x360] sm:$0xff]  }
0x1155   :  { %10957 = vmatprep.subr.bf16.mxu1 %v11862_v31  ;;  %v11882_v31 = vld [vmem:[%s14362_s15 + $0x3e0] sm:$0xff]  }
0x1157   :  { %10936 = vmatpush3.bf16.msra.mxu0 %v11863_v19  ;;  %v11886_v19 = vld [vmem:[%s14362_s15 + $0x3d8] sm:$0xff]  }
0x1158   :  { %10958 = vmatpush3.bf16.msra.mxu1 %v11864_v33  ;;  %10937 = vmatprep.subr.bf16.mxu0 %v11865_v51  ;;  %v11890_v33 = vld [vmem:[%s14362_s15 + $0x3d0] sm:$0xff]  }
0x1159   :  { %10959 = vmatprep.subr.bf16.mxu1 %v11866_v12  ;;  %v11891_v51 = vld [vmem:[%s14362_s15 + $0x310] sm:$0xff]   ;;  %v11894_v12 = vld [vmem:[%s14362_s15 + $0x3c8] sm:$0xff]  }
0x115b   :  { %10938 = vmatpush3.bf16.msra.mxu0 %v11867_v62  ;;  %v11896_v62 = vld [vmem:[%s14362_s15 + $0x388] sm:$0xff]  }
0x115c   :  { %10960 = vmatpush3.bf16.msra.mxu1 %v11868_v1  ;;  %10967 = vmatprep.subr.bf16.mxu0 %v11869_v59  ;;  %v3470_v1 = vadd.f32 %v13157_v18, %v2985_v56  ;;  %v11899_v59 = vld [vmem:[%s14362_s15 + $0x300] sm:$0xff]  }
0x115d   :  { %10989 = vmatprep.subr.bf16.mxu1 %v11870_v3 }
0x115e   :  { %4797 = vmatmul.mubr.bf16.vlgmr.msra.gmra.mxu0 %v3561_v15  ;;  %v3533_v3 = vmax.f32 %v3470_v1, 0.0 }
0x115f   :  { %4838 = vmatmul.mubr.bf16.vlgmr.msra.gmra.mxu1 %v3563_v21  ;;  %10968 = vmatpush3.bf16.msra.mxu0 %v11871_v13 }
0x1160   :  { %4878 = vmatprep.mubr.bf16.mxu0 %v3566_v34  ;;  %10990 = vmatpush3.bf16.msra.mxu1 %v11872_v17  ;;  %v3565_v18 = vpack.c.bf16 %v3549_v2, %v3533_v3 }
0x1161   :  { %4919 = vmatprep.mubr.bf16.mxu1 %v3568_v46  ;;  %10969 = vmatprep.subr.bf16.mxu0 %v11873_v29 }
0x1162   :  { %10991 = vmatprep.subr.bf16.mxu1 %v11874_v35 }
0x1163   :  { %10970 = vmatpush3.bf16.msra.mxu0 %v11875_v36 }
0x1164   :  { %10992 = vmatpush3.bf16.msra.mxu1 %v11876_v37  ;;  %10971 = vmatprep.subr.bf16.mxu0 %v11877_v38 }
0x1165   :  { %10993 = vmatprep.subr.bf16.mxu1 %v11878_v30  ;;  %v9986_v30 = vld [vmem:[%s14363_s16] ss:$0 sm:$0xff] }
0x1167   :  { %10972 = vmatpush3.bf16.msra.mxu0 %v11879_v40 }
0x1168   :  { %10994 = vmatpush3.bf16.msra.mxu1 %v11880_v43  ;;  %10973 = vmatprep.subr.bf16.mxu0 %v11881_v47 }
0x1169   :  { %10995 = vmatprep.subr.bf16.mxu1 %v11882_v31 }
0x116b   :  { %10974 = vmatpush3.bf16.msra.mxu0 %v11883_v48 }
0x116c   :  { %10996 = vmatpush3.bf16.msra.mxu1 %v11884_v50  ;;  %10975 = vmatprep.subr.bf16.mxu0 %v11885_v5 }
0x116d   :  { %10997 = vmatprep.subr.bf16.mxu1 %v11886_v19 }
0x116f   :  { %10976 = vmatpush3.bf16.msra.mxu0 %v11887_v6 }
0x1170   :  { %10998 = vmatpush3.bf16.msra.mxu1 %v11888_v32  ;;  %10977 = vmatprep.subr.bf16.mxu0 %v11889_v23 }
0x1171   :  { %10999 = vmatprep.subr.bf16.mxu1 %v11890_v33 }
0x1173   :  { %10978 = vmatpush3.bf16.msra.mxu0 %v11891_v51 }
0x1174   :  { %11000 = vmatpush3.bf16.msra.mxu1 %v11892_v52  ;;  %10979 = vmatprep.subr.bf16.mxu0 %v11893_v53 }
0x1175   :  { %11001 = vmatprep.subr.bf16.mxu1 %v11894_v12 }
0x1177   :  { %10980 = vmatpush3.bf16.msra.mxu0 %v11895_v58 }
0x1178   :  { %11002 = vmatpush3.bf16.msra.mxu1 %v11896_v62  ;;  %10981 = vmatprep.subr.bf16.mxu0 %v11897_v14 }
0x1179   :  { %11003 = vmatprep.subr.bf16.mxu1 %v11898_v22 }
0x117b   :  { %10982 = vmatpush3.bf16.msra.mxu0 %v11899_v59 }
0x117c   :  { %11004 = vmatpush3.bf16.msra.mxu1 %v11900_v42 }
0x117e   :  { %4879 = vmatmul.mubr.bf16.vlgmr.msra.gmra.mxu0 %v3565_v18 }
0x117f   :  { %4920 = vmatmul.mubr.bf16.vlgmr.msra.gmra.mxu1 %v3567_v25 }
0x11de   :  { %v10851_v7 = vpop.f32.mrf.mxu0  ;;  %v10873_v8 = vpop.f32.mrf.mxu1 }
0x11e0   :  { %v10852_v9 = vpop.f32.mrf.mxu0  ;;  %v10874_v13 = vpop.f32.mrf.mxu1 }
0x11e1   :  { %v10853_v38 = vadd.f32 %v10852_v9, %v10851_v7  ;;  %v10875_v5 = vadd.f32 %v10874_v13, %v10873_v8 }
0x11e2   :  { %v10854_v15 = vpop.f32.mrf.mxu0  ;;  %v10876_v41 = vpop.f32.mrf.mxu1 }
0x11e3   :  { %v4635_v47 = vadd.f32 %v10853_v38, %v9986_v30 }
0x11e4   :  { %v10855_v17 = vpop.f32.mrf.mxu0  ;;  %v10877_v28 = vpop.f32.mrf.mxu1 }
0x11e5   :  { %v10856_v31 = vadd.f32 %v10855_v17, %v10854_v15  ;;  %v4676_v6 = vadd.f32 %v10875_v5, %v4635_v47  ;;  %v10878_v51 = vadd.f32 %v10877_v28, %v10876_v41 }
0x11e7   :  { %v4638_v32 = vadd.f32 %v10856_v31, %v9986_v30 }
0x11e9   :  { %v4679_v12 = vadd.f32 %v10878_v51, %v4638_v32  ;;  %v10127_v51 = vld [vmem:[%s14351_s4 + $0x90] sm:$0xff] }
0x11fe   :  { %v10895_v21 = vpop.f32.mrf.mxu0  ;;  %v10917_v29 = vpop.f32.mrf.mxu1 }
0x1200   :  { %v10896_v34 = vpop.f32.mrf.mxu0  ;;  %v10918_v35 = vpop.f32.mrf.mxu1 }
0x1201   :  { %v10897_v19 = vadd.f32 %v10896_v34, %v10895_v21  ;;  %v10919_v56 = vadd.f32 %v10918_v35, %v10917_v29 }
0x1202   :  { %v10898_v46 = vpop.f32.mrf.mxu0  ;;  %v10920_v36 = vpop.f32.mrf.mxu1 }
0x1203   :  { %v4717_v52 = vadd.f32 %v10897_v19, %v4676_v6 }
0x1204   :  { %v10899_v37 = vpop.f32.mrf.mxu0  ;;  %v10921_v43 = vpop.f32.mrf.mxu1 }
0x1205   :  { %v10900_v53 = vadd.f32 %v10899_v37, %v10898_v46  ;;  %v4758_v62 = vadd.f32 %v10919_v56, %v4717_v52  ;;  %v10922_v0 = vadd.f32 %v10921_v43, %v10920_v36  ;;  %v10118_v52 = vld [vmem:[%s14376_s2 + $0x88] sm:$0xff]  ;;  %v10125_v56 = vld [vmem:[%s14351_s4 + $0x80] sm:$0xff] }
0x1207   :  { %v4720_v14 = vadd.f32 %v10900_v53, %v4679_v12  ;;  %v10126_v53 = vld [vmem:[%s14351_s4 + $0x88] sm:$0xff]  ;;  %v10117_v12 = vld [vmem:[%s14376_s2 + $0x80] sm:$0xff] }
0x1209   :  { %v4761_v2 = vadd.f32 %v10922_v0, %v4720_v14 }
0x121e   :  { %v10939_v40 = vpop.f32.mrf.mxu0 }
0x121f   :  { %v10961_v48 = vpop.f32.mrf.mxu1 }
0x1220   :  { %v10940_v50 = vpop.f32.mrf.mxu0 }
0x1221   :  { %v10962_v23 = vpop.f32.mrf.mxu1  ;;  %v10941_v57 = vadd.f32 %v10940_v50, %v10939_v40 }
0x1222   :  { %v10942_v33 = vpop.f32.mrf.mxu0  ;;  %v10963_v42 = vadd.f32 %v10962_v23, %v10961_v48  ;;  %v10128_v23 = vld [vmem:[%s14351_s4 + $0x98] sm:$0xff] }
0x1223   :  { %v10964_v58 = vpop.f32.mrf.mxu1  ;;  %v4799_v22 = vadd.f32 %v10941_v57, %v4758_v62  ;;  %11546 = vmatprep.subr.mxu1 %v10128_v23  ;;  %v10136_v57 = vld [vmem:[%s14352_s5 + $0x98] sm:$0xff] }
0x1224   :  { %v10943_v60 = vpop.f32.mrf.mxu0  ;;  %11547 = vmatpush3.msra.mxu1 %v10128_v23 }
0x1225   :  { %v10944_v1 = vadd.f32 %v10943_v60, %v10942_v33  ;;  %v10965_v39 = vpop.f32.mrf.mxu1  ;;  %v4840_v4 = vadd.f32 %v10963_v42, %v4799_v22  ;;  %v10119_v33 = vld [vmem:[%s14376_s2 + $0x90] sm:$0xff]  ;;  %11548 = vmatprep.subr.mxu1 %v10127_v51 }
0x1226   :  { %v10966_v9 = vadd.f32 %v10965_v39, %v10964_v58  ;;  %11549 = vmatpush3.msra.mxu1 %v10127_v51  ;;  %v10115_v39 = vld [vmem:[%s14364_s17] ss:$0 sm:$0xff] }
0x1227   :  { %v4802_v18 = vadd.f32 %v10944_v1, %v4761_v2  ;;  %11550 = vmatprep.subr.mxu1 %v10126_v53  ;;  %v10116_v2 = vld [vmem:[%s14365_s18] ss:$0 sm:$0xff] }
0x1228   :  { %11551 = vmatpush3.msra.mxu1 %v10126_v53 }
0x1229   :  { %v4843_v21 = vadd.f32 %v10966_v9, %v4802_v18  ;;  %11552 = vmatprep.subr.mxu1 %v10125_v56  ;;  %v10133_v9 = vld [vmem:[%s14352_s5 + $0x80] sm:$0xff] }
0x122a   :  { %11553 = vmatpush3.msra.mxu1 %v10125_v56 }
0x122b   :  { %11568 = vmatprep.subr.mxu1 %v12139_v24 }
0x123e   :  { %v10983_v59 = vpop.f32.mrf.mxu0 }
0x123f   :  { %v11005_v61 = vpop.f32.mrf.mxu1 }
0x1240   :  { %v10984_v3 = vpop.f32.mrf.mxu0 }
0x1241   :  { %v10985_v25 = vadd.f32 %v10984_v3, %v10983_v59  ;;  %v11006_v7 = vpop.f32.mrf.mxu1 }
0x1242   :  { %v10986_v8 = vpop.f32.mrf.mxu0  ;;  %v11007_v15 = vadd.f32 %v11006_v7, %v11005_v61  ;;  %v10135_v7 = vld [vmem:[%s14352_s5 + $0x90] sm:$0xff] }
0x1243   :  { %v4881_v13 = vadd.f32 %v10985_v25, %v4840_v4  ;;  %v11008_v41 = vpop.f32.mrf.mxu1 }
0x1244   :  { %v10987_v17 = vpop.f32.mrf.mxu0 }
0x1245   :  { %v4922_v28 = vadd.f32 %v11007_v15, %v4881_v13  ;;  %v10988_v29 = vadd.f32 %v10987_v17, %v10986_v8  ;;  %v11009_v34 = vpop.f32.mrf.mxu1  ;;  %v10134_v8 = vld [vmem:[%s14352_s5 + $0x88] sm:$0xff] }
0x1246   :  { %v11010_v46 = vadd.f32 %v11009_v34, %v11008_v41  ;;  %v10130_v41 = vld [vmem:[%s14354_s7 + $0x4] ss:$0 sm:$0xff] }
0x1247   :  { %v4884_v35 = vadd.f32 %v10988_v29, %v4843_v21  ;;  %v4928_v36 = vadd.f32 %v4922_v28, %v12773_v27  ;;  %v10122_v29 = vld [vmem:[%s14353_s6 + $0x4] ss:$0 sm:$0xff] }
0x1249   :  { %v4925_v37 = vadd.f32 %v11010_v46, %v4884_v35  ;;  %v4932_v38 = vsel %vm80_vm0, %v4928_v36, 0.0 }
0x124a   :  { %4933 = vadd.xlane.f32.xlu0 %v4932_v38 }
0x124b   :  { %v4929_v30 = vadd.f32 %v4925_v37, %v12771_v26  ;;  %v10120_v26 = vld [vmem:[%s14376_s2 + $0x98] sm:$0xff] }
0x124c   :  { %11535 = vmatprep.subr.mxu0 %v10120_v26 }
0x124d   :  { %v4935_v40 = vsel %vm80_vm0, %v4929_v30, 0.0  ;;  %11536 = vmatpush3.msra.mxu0 %v10120_v26 }
0x124e   :  { %4936 = vadd.xlane.f32.xlu1 %v4935_v40  ;;  %11537 = vmatprep.subr.mxu0 %v10119_v33 }
0x124f   :  { %11538 = vmatpush3.msra.mxu0 %v10119_v33 }
0x1250   :  { %11539 = vmatprep.subr.mxu0 %v10118_v52 }
0x1251   :  { %11540 = vmatpush3.msra.mxu0 %v10118_v52 }
0x1252   :  { %11541 = vmatprep.subr.mxu0 %v10117_v12 }
0x1253   :  { %11542 = vmatpush3.msra.mxu0 %v10117_v12 }
0x1254   :  { %11557 = vmatprep.subr.mxu0 %v10136_v57 }
0x12d3   :  { %v4934_v43 = vpop.xlane.xlu0 %4933 }
0x12d4   :  { %v4938_v47 = vmul.f32 0.03125, %v4934_v43 }
0x12d6   :  { %v4940_v31 = vsub.f32 %v4928_v36, %v4938_v47  ;;  %v10138_v36 = vld [vmem:[%s14355_s8 + $0x4] ss:$0 sm:$0xff] }
0x12d7   :  { %v4937_v48 = vpop.xlane.xlu1 %4936 }
0x12d8   :  { %v4939_v50 = vmul.f32 0.03125, %v4937_v48  ;;  %v4942_v5 = vmul.f32 %v4940_v31, %v4940_v31 }
0x12da   :  { %v4941_v19 = vsub.f32 %v4929_v30, %v4939_v50  ;;  %v4944_v6 = vsel %vm80_vm0, %v4942_v5, 0.0 }
0x12db   :  { %4945 = vadd.xlane.f32.xlu0 %v4944_v6 }
0x12dc   :  { %v4943_v27 = vmul.f32 %v4941_v19, %v4941_v19 }
0x12de   :  { %v4947_v32 = vsel %vm80_vm0, %v4943_v27, 0.0 }
0x12df   :  { %4948 = vadd.xlane.f32.xlu1 %v4947_v32 }
0x1364   :  { %v4946_v58 = vpop.xlane.xlu0 %4945 }
0x1365   :  { %v4950_v60 = vmul.f32 0.03125, %v4946_v58 }
0x1367   :  { %v4952_v62 = vadd.f32 1e-05, %v4950_v60  ;;  %v10151_v60 = vld [vmem:[%s14376_s2 + $0xb8] sm:$0xff] }
0x1368   :  { %v4949_v14 = vpop.xlane.xlu1 %4948 }
0x1369   :  { %12073 = vrsqrt.f32 %v4952_v62  ;;  %v4951_v0 = vmul.f32 0.03125, %v4949_v14  ;;  %v10159_v62 = vld [vmem:[%s14351_s4 + $0xb8] sm:$0xff] }
0x136b   :  { %v4953_v22 = vadd.f32 1e-05, %v4951_v0 }
0x136d   :  { %12075 = vrsqrt.f32 %v4953_v22 }
0x1376   :  { %v12074_v1 = vpop.eup %12073 }
0x1377   :  { %v4956_v59 = vmul.f32 %v12074_v1, %v4940_v31 }
0x1379   :  { %v4964_v42 = vmul.f32 %v10115_v39, %v4956_v59 }
0x137a   :  { %v12076_v61 = vpop.eup %12075 }
0x137b   :  { %v13378_v3 = vadd.f32 %v10116_v2, %v4964_v42  ;;  %v4957_v4 = vmul.f32 %v12076_v61, %v4941_v19  ;;  %v10148_v61 = vld [vmem:[%s14376_s2 + $0xa0] sm:$0xff] }
0x137d   :  { %v4965_v18 = vmul.f32 %v10115_v39, %v4957_v4  ;;  %11543 = vmatprep.mubr.msk.f32.mxu0 %vm80_vm0, %v13378_v3  ;;  %11554 = vmatprep.mubr.msk.f32.mxu1 %vm80_vm0, %v13378_v3  ;;  %v10150_v39 = vld [vmem:[%s14376_s2 + $0xb0] sm:$0xff] }
0x137e   :  { %v10158_v4 = vld [vmem:[%s14351_s4 + $0xb0] sm:$0xff] }
0x137f   :  { %v13384_v25 = vadd.f32 %v10116_v2, %v4965_v18  ;;  %v10149_v2 = vld [vmem:[%s14376_s2 + $0xa8] sm:$0xff] }
0x1380   :  { %v10157_v18 = vld [vmem:[%s14351_s4 + $0xa8] sm:$0xff] }
0x1381   :  { %11544 = vmatmul.mubr.msk.f32.vlgmr.msra.gmra.mxu0 %vm80_vm0, %v13384_v25  ;;  %11555 = vmatmul.mubr.msk.f32.vlgmr.msra.gmra.mxu1 %vm80_vm0, %v13384_v25 }
0x1382   :  { %11558 = vmatpush3.msra.mxu0 %v10136_v57  ;;  %11565 = vmatprep.mubr.msk.f32.mxu0 %vm80_vm0, %v13378_v3 }
0x1383   :  { %11559 = vmatprep.subr.mxu0 %v10135_v7  ;;  %11570 = vmatprep.mubr.msk.f32.mxu1 %vm12140_vm5, %v12139_v24 }
0x1384   :  { %11560 = vmatpush3.msra.mxu0 %v10135_v7  ;;  %v10167_v7 = vld [vmem:[%s14352_s5 + $0xb8] sm:$0xff] }
0x1385   :  { %11561 = vmatprep.subr.mxu0 %v10134_v8 }
0x1386   :  { %11562 = vmatpush3.msra.mxu0 %v10134_v8  ;;  %v10156_v8 = vld [vmem:[%s14351_s4 + $0xa0] sm:$0xff] }
0x1387   :  { %11563 = vmatprep.subr.mxu0 %v10133_v9 }
0x1388   :  { %11564 = vmatpush3.msra.mxu0 %v10133_v9  ;;  %v10166_v9 = vld [vmem:[%s14352_s5 + $0xb0] sm:$0xff] }
0x1389   :  { %11566 = vmatmul.mubr.msk.f32.vlgmr.msra.gmra.mxu0 %vm80_vm0, %v13384_v25  ;;  %11578 = vmatprep.subr.mxu0 %v12139_v24 }
0x138a   :  { %11580 = vmatprep.mubr.msk.f32.mxu0 %vm12140_vm5, %v12139_v24 }
0x1441   :  { %v11545_v13 = vpop.f32.mrf.mxu0  ;;  %v11556_v15 = vpop.f32.mrf.mxu1 }
0x1442   :  { %v5153_v35 = vadd.f32 %v11556_v15, %v10130_v41  ;;  %v5065_v37 = vadd.f32 %v11545_v13, %v10122_v29  ;;  %v10165_v13 = vld [vmem:[%s14352_s5 + $0xa8] sm:$0xff]  ;;  %v10164_v15 = vld [vmem:[%s14352_s5 + $0xa0] sm:$0xff] }
0x1443   :  { %v5147_v17 = vpop.f32.mrf.mxu1  ;;  %v5059_v21 = vpop.f32.mrf.mxu0 }
0x1444   :  { %v5148_v28 = vadd.f32 %v10130_v41, %v5147_v17  ;;  %v5060_v34 = vadd.f32 %v10122_v29, %v5059_v21 }
0x1446   :  { %11569 = vmatpush3.xpose.msk.msra.mxu1 %vm417_vm6, %v5148_v28 }
0x1447   :  { %11573 = vmatprep.subr.mxu1 %v12139_v24 }
0x1449   :  { %v11567_v46 = vpop.f32.mrf.mxu0  ;;  %11571 = vmatmul.mubr.msk.f32.vlgmr.msra.gmra.mxu1 %vm417_vm6, %v5060_v34 }
0x144a   :  { %11574 = vmatpush3.xpose.msk.msra.mxu1 %vm417_vm6, %v5153_v35  ;;  %11575 = vmatprep.mubr.msk.f32.mxu1 %vm12140_vm5, %v12139_v24  ;;  %v5241_v30 = vadd.f32 %v11567_v46, %v10138_v36  ;;  %v10161_v35 = vld [vmem:[%s14354_s7 + $0x5] ss:$0 sm:$0xff] }
0x144b   :  { %v5235_v38 = vpop.f32.mrf.mxu0  ;;  %11583 = vmatprep.subr.mxu1 %v12139_v24 }
0x144c   :  { %v5236_v40 = vadd.f32 %v10138_v36, %v5235_v38  ;;  %v10153_v38 = vld [vmem:[%s14353_s6 + $0x5] ss:$0 sm:$0xff] }
0x144d   :  { %11576 = vmatmul.mubr.msk.f32.vlgmr.msra.gmra.mxu1 %vm417_vm6, %v5065_v37 }
0x144e   :  { %11579 = vmatpush3.msra.mxu0 %v5236_v40  ;;  %11584 = vmatpush3.msra.mxu1 %v5241_v30 }
0x144f   :  { %11585 = vmatprep.mubr.msk.f32.mxu1 %vm12140_vm5, %v12139_v24  ;;  %11588 = vmatprep.subr.mxu0 %v10151_v60 }
0x1450   :  { %11599 = vmatprep.subr.mxu1 %v10159_v62 }
0x1509   :  { %v5316_v43 = vpop.f32.mrf.mxu1 }
0x150a   :  { %v5396_v47 = vmul.f32 0.35355338, %v5316_v43 }
0x150b   :  { %v11572_v31 = vpop.f32.mrf.mxu1 }
0x150c   :  { %v5398_v48 = vadd.f32 %v5396_v47, %v12409_v49  ;;  %v10169_v47 = vld [vmem:[%s14355_s8 + $0x5] ss:$0 sm:$0xff] }
0x150d   :  { %v5392_v50 = vpop.f32.mrf.mxu1 }
0x150e   :  { %v5397_v5 = vmul.f32 0.35355338, %v5392_v50  ;;  %v5400_v19 = vsel %vm417_vm6, %v5398_v48, -inf }
0x150f   :  { %5401 = vmax.xlane.f32.xlu1 %v5400_v19  ;;  %v11577_v6 = vpop.f32.mrf.mxu1 }
0x1510   :  { %v5399_v27 = vadd.f32 %v5397_v5, %v12409_v49 }
0x1512   :  { %v5403_v32 = vsel %vm417_vm6, %v5399_v27, -inf }
0x1513   :  { %5404 = vmax.xlane.f32.xlu0 %v5403_v32 }
0x1598   :  { %v5402_v26 = vpop.xlane.xlu1 %5401 }
0x1599   :  { %v5406_v23 = vsub.f32 %v5398_v48, %v5402_v26 }
0x159b   :  { %v5408_v33 = vmul.f32 1.442695, %v5406_v23 }
0x159c   :  { %v5405_v51 = vpop.xlane.xlu0 %5404 }
0x159d   :  { %12077 = vpow2.f32 %v5408_v33  ;;  %v5407_v52 = vsub.f32 %v5399_v27, %v5405_v51 }
0x159f   :  { %v5410_v53 = vmul.f32 1.442695, %v5407_v52 }
0x15a1   :  { %12079 = vpow2.f32 %v5410_v53 }
0x15aa   :  { %v12078_v12 = vpop.eup %12077 }
0x15ab   :  { %v5412_v56 = vsel %vm417_vm6, %v12078_v12, 0.0 }
0x15ac   :  { %5413 = vadd.xlane.f32.xlu1 %v5412_v56 }
0x15ae   :  { %v12080_v57 = vpop.eup %12079 }
0x15af   :  { %v5415_v58 = vsel %vm417_vm6, %v12080_v57, 0.0 }
0x15b0   :  { %5416 = vadd.xlane.f32.xlu0 %v5415_v58 }
0x1635   :  { %v5414_v14 = vpop.xlane.xlu1 %5413 }
0x1636   :  { %12081 = vrcp.f32 %v5414_v14 }
0x1639   :  { %v5417_v0 = vpop.xlane.xlu0 %5416 }
0x163a   :  { %12083 = vrcp.f32 %v5417_v0 }
0x1643   :  { %v12082_v22 = vpop.eup %12081 }
0x1644   :  { %v5419_v1 = vmul.f32 %v12082_v22, %v12078_v12 }
0x1646   :  { %11581 = vmatmul.mubr.msk.f32.vlgmr.msra.gmra.mxu0 %vm417_vm6, %v5419_v1 }
0x1647   :  { %v12084_v59 = vpop.eup %12083  ;;  %11589 = vmatpush3.msra.mxu0 %v10151_v60  ;;  %11596 = vmatprep.mubr.msk.f32.mxu0 %vm80_vm0, %v13378_v3 }
0x1648   :  { %11590 = vmatprep.subr.mxu0 %v10150_v39  ;;  %v5421_v42 = vmul.f32 %v12084_v59, %v12080_v57 }
0x1649   :  { %11591 = vmatpush3.msra.mxu0 %v10150_v39  ;;  %v10147_v39 = vld [vmem:[%s14356_s9 + $0x20] sm:$0xff] }
0x164a   :  { %11592 = vmatprep.subr.mxu0 %v10149_v2  ;;  %11586 = vmatmul.mubr.msk.f32.vlgmr.msra.gmra.mxu1 %vm417_vm6, %v5421_v42 }
0x164b   :  { %11593 = vmatpush3.msra.mxu0 %v10149_v2  ;;  %11600 = vmatpush3.msra.mxu1 %v10159_v62 }
0x164c   :  { %11594 = vmatprep.subr.mxu0 %v10148_v61  ;;  %11601 = vmatprep.subr.mxu1 %v10158_v4 }
0x164d   :  { %11607 = vmatprep.mubr.msk.f32.mxu1 %vm80_vm0, %v13378_v3  ;;  %11595 = vmatpush3.msra.mxu0 %v10148_v61 }
0x164e   :  { %11602 = vmatpush3.msra.mxu1 %v10158_v4  ;;  %11597 = vmatmul.mubr.msk.f32.vlgmr.msra.gmra.mxu0 %vm80_vm0, %v13384_v25 }
0x164f   :  { %11603 = vmatprep.subr.mxu1 %v10157_v18  ;;  %11610 = vmatprep.subr.mxu0 %v10167_v7 }
0x1650   :  { %11604 = vmatpush3.msra.mxu1 %v10157_v18  ;;  %11611 = vmatpush3.msra.mxu0 %v10167_v7  ;;  %v10194_v7 = vld [vmem:[%s14351_s4 + $0xd8] sm:$0xff] }
0x1651   :  { %11618 = vmatprep.mubr.msk.f32.mxu0 %vm80_vm0, %v13378_v3  ;;  %11605 = vmatprep.subr.mxu1 %v10156_v8 }
0x1652   :  { %11612 = vmatprep.subr.mxu0 %v10166_v9  ;;  %11606 = vmatpush3.msra.mxu1 %v10156_v8  ;;  %v10193_v8 = vld [vmem:[%s14351_s4 + $0xd0] sm:$0xff] }
0x1653   :  { %11613 = vmatpush3.msra.mxu0 %v10166_v9  ;;  %11608 = vmatmul.mubr.msk.f32.vlgmr.msra.gmra.mxu1 %vm80_vm0, %v13384_v25  ;;  %v10192_v9 = vld [vmem:[%s14351_s4 + $0xc8] sm:$0xff] }
0x1654   :  { %11614 = vmatprep.subr.mxu0 %v10165_v13  ;;  %11621 = vmatprep.subr.mxu1 %v12139_v24 }
0x1655   :  { %11615 = vmatpush3.msra.mxu0 %v10165_v13  ;;  %11623 = vmatprep.mubr.msk.f32.mxu1 %vm12140_vm5, %v12139_v24  ;;  %v10191_v13 = vld [vmem:[%s14351_s4 + $0xc0] sm:$0xff] }
0x1656   :  { %11616 = vmatprep.subr.mxu0 %v10164_v15 }
0x1657   :  { %11617 = vmatpush3.msra.mxu0 %v10164_v15  ;;  %v10178_v15 = vld [vmem:[%s14356_s9 + $0x28] sm:$0xff] }
0x1658   :  { %11619 = vmatmul.mubr.msk.f32.vlgmr.msra.gmra.mxu0 %vm80_vm0, %v13384_v25  ;;  %11631 = vmatprep.subr.mxu0 %v12139_v24 }
0x1659   :  { %11633 = vmatprep.mubr.msk.f32.mxu0 %vm12140_vm5, %v12139_v24 }
0x1706   :  { %v13489_v41 = vpop.f32.mrf.mxu0 }
0x1708   :  { %v11582_v17 = vpop.f32.mrf.mxu0 }
0x170a   :  { %v13491_v21 = vpop.f32.mrf.mxu1 }
0x170c   :  { %v11587_v28 = vpop.f32.mrf.mxu1 }
0x170e   :  { %v11598_v29 = vpop.f32.mrf.mxu0 }
0x170f   :  { %v5655_v50 = vadd.f32 %v11598_v29, %v10153_v38  ;;  %v10185_v29 = vld [vmem:[%s14376_s2 + $0xd0] sm:$0xff] }
0x1710   :  { %v5649_v36 = vpop.f32.mrf.mxu0 }
0x1711   :  { %v5650_v40 = vadd.f32 %v10153_v38, %v5649_v36  ;;  %v10201_v38 = vld [vmem:[%s14352_s5 + $0xd0] sm:$0xff] }
0x1713   :  { %v11609_v34 = vpop.f32.mrf.mxu1 }
0x1714   :  { %v5743_v43 = vadd.f32 %v11609_v34, %v10161_v35 }
0x1715   :  { %v5737_v46 = vpop.f32.mrf.mxu1 }
0x1716   :  { %v5738_v37 = vadd.f32 %v10161_v35, %v5737_v46  ;;  %v10184_v35 = vld [vmem:[%s14376_s2 + $0xc8] sm:$0xff]  ;;  %v10183_v46 = vld [vmem:[%s14376_s2 + $0xc0] sm:$0xff] }
0x1718   :  { %v11620_v30 = vpop.f32.mrf.mxu0  ;;  %11622 = vmatpush3.xpose.msk.msra.mxu1 %vm417_vm6, %v5738_v37  ;;  %v10202_v37 = vld [vmem:[%s14352_s5 + $0xd8] sm:$0xff] }
0x1719   :  { %11626 = vmatprep.subr.mxu1 %v12139_v24  ;;  %v5831_v5 = vadd.f32 %v11620_v30, %v10169_v47 }
0x171a   :  { %v5825_v31 = vpop.f32.mrf.mxu0 }
0x171b   :  { %v5826_v48 = vadd.f32 %v10169_v47, %v5825_v31  ;;  %11624 = vmatmul.mubr.msk.f32.vlgmr.msra.gmra.mxu1 %vm417_vm6, %v5650_v40  ;;  %v10196_v40 = vld [vmem:[%s14354_s7 + $0x6] ss:$0 sm:$0xff] }
0x171c   :  { %11627 = vmatpush3.xpose.msk.msra.mxu1 %vm417_vm6, %v5743_v43  ;;  %11628 = vmatprep.mubr.msk.f32.mxu1 %vm12140_vm5, %v12139_v24  ;;  %v10200_v43 = vld [vmem:[%s14352_s5 + $0xc8] sm:$0xff]  ;;  %v10199_v31 = vld [vmem:[%s14352_s5 + $0xc0] sm:$0xff] }
0x171d   :  { %11632 = vmatpush3.msra.mxu0 %v5826_v48  ;;  %11636 = vmatprep.subr.mxu1 %v12139_v24 }
0x171e   :  { %11641 = vmatprep.subr.mxu0 %v10178_v15 }
0x171f   :  { %11629 = vmatmul.mubr.msk.f32.vlgmr.msra.gmra.mxu1 %vm417_vm6, %v5655_v50 }
0x1720   :  { %11637 = vmatpush3.msra.mxu1 %v5831_v5  ;;  %11638 = vmatprep.mubr.msk.f32.mxu1 %vm12140_vm5, %v12139_v24 }
0x1721   :  { %11646 = vmatprep.subr.mxu1 %v10147_v39 }
0x17db   :  { %v5906_v19 = vpop.f32.mrf.mxu1 }
0x17dc   :  { %v5986_v6 = vmul.f32 0.35355338, %v5906_v19 }
0x17dd   :  { %v11625_v27 = vpop.f32.mrf.mxu1 }
0x17de   :  { %v5988_v32 = vadd.f32 %v5986_v6, %v12409_v49 }
0x17df   :  { %v5982_v26 = vpop.f32.mrf.mxu1 }
0x17e0   :  { %v5987_v23 = vmul.f32 0.35355338, %v5982_v26  ;;  %v5990_v33 = vsel %vm417_vm6, %v5988_v32, -inf }
0x17e1   :  { %5991 = vmax.xlane.f32.xlu0 %v5990_v33  ;;  %v11630_v51 = vpop.f32.mrf.mxu1  ;;  %v10204_v33 = vld [vmem:[%s14355_s8 + $0x6] ss:$0 sm:$0xff] }
0x17e2   :  { %v5989_v52 = vadd.f32 %v5987_v23, %v12409_v49 }
0x17e4   :  { %v5993_v53 = vsel %vm417_vm6, %v5989_v52, -inf }
0x17e5   :  { %5994 = vmax.xlane.f32.xlu1 %v5993_v53 }
0x186a   :  { %v5992_v12 = vpop.xlane.xlu0 %5991 }
0x186b   :  { %v5996_v56 = vsub.f32 %v5988_v32, %v5992_v12  ;;  %v10188_v32 = vld [vmem:[%s14353_s6 + $0x6] ss:$0 sm:$0xff] }
0x186d   :  { %v5998_v57 = vmul.f32 1.442695, %v5996_v56 }
0x186e   :  { %v5995_v58 = vpop.xlane.xlu1 %5994 }
0x186f   :  { %12085 = vpow2.f32 %v5998_v57  ;;  %v5997_v60 = vsub.f32 %v5989_v52, %v5995_v58 }
0x1871   :  { %v6000_v62 = vmul.f32 1.442695, %v5997_v60 }
0x1873   :  { %12087 = vpow2.f32 %v6000_v62 }
0x187c   :  { %v12086_v14 = vpop.eup %12085 }
0x187d   :  { %v6002_v0 = vsel %vm417_vm6, %v12086_v14, 0.0 }
0x187e   :  { %6003 = vadd.xlane.f32.xlu0 %v6002_v0 }
0x1880   :  { %v12088_v22 = vpop.eup %12087 }
0x1881   :  { %v6005_v1 = vsel %vm417_vm6, %v12088_v22, 0.0 }
0x1882   :  { %6006 = vadd.xlane.f32.xlu1 %v6005_v1 }
0x1907   :  { %v6004_v59 = vpop.xlane.xlu0 %6003 }
0x1908   :  { %12089 = vrcp.f32 %v6004_v59 }
0x190b   :  { %v6007_v2 = vpop.xlane.xlu1 %6006 }
0x190c   :  { %12091 = vrcp.f32 %v6007_v2 }
0x1915   :  { %v12090_v42 = vpop.eup %12089 }
0x1916   :  { %v6009_v61 = vmul.f32 %v12090_v42, %v12086_v14 }
0x1918   :  { %11634 = vmatmul.mubr.msk.f32.vlgmr.msra.gmra.mxu0 %vm417_vm6, %v6009_v61 }
0x1919   :  { %v12092_v4 = vpop.eup %12091  ;;  %11642 = vmatpush3.msra.mxu0 %v10178_v15 }
0x191a   :  { %v6011_v18 = vmul.f32 %v12092_v4, %v12088_v22 }
0x191c   :  { %11639 = vmatmul.mubr.msk.f32.vlgmr.msra.gmra.mxu1 %vm417_vm6, %v6011_v18 }
0x191d   :  { %11648 = vmatprep.mubr.msk.f32.mxu1 %vm417_vm6, %v13489_v41  ;;  %11647 = vmatpush3.msra.mxu1 %v10147_v39  ;;  %v10186_v41 = vld [vmem:[%s14376_s2 + $0xd8] sm:$0xff] }
0x191e   :  { %11662 = vmatprep.subr.mxu1 %v10194_v7  ;;  %11651 = vmatprep.subr.mxu0 %v10186_v41 }
0x1920   :  { %11649 = vmatmul.mubr.msk.f32.vlgmr.msra.gmra.mxu1 %vm417_vm6, %v13491_v21 }
0x1921   :  { %11663 = vmatpush3.msra.mxu1 %v10194_v7  ;;  %11670 = vmatprep.mubr.msk.f32.mxu1 %vm80_vm0, %v13378_v3 }
0x1922   :  { %11664 = vmatprep.subr.mxu1 %v10193_v8 }
0x1923   :  { %11665 = vmatpush3.msra.mxu1 %v10193_v8 }
0x1924   :  { %11666 = vmatprep.subr.mxu1 %v10192_v9 }
0x1925   :  { %11667 = vmatpush3.msra.mxu1 %v10192_v9 }
0x1926   :  { %11668 = vmatprep.subr.mxu1 %v10191_v13 }
0x1927   :  { %11669 = vmatpush3.msra.mxu1 %v10191_v13 }
0x1928   :  { %11671 = vmatmul.mubr.msk.f32.vlgmr.msra.gmra.mxu1 %vm80_vm0, %v13384_v25  ;;  %11684 = vmatprep.subr.mxu1 %v12139_v24 }
0x1929   :  { %11686 = vmatprep.mubr.msk.f32.mxu1 %vm12140_vm5, %v12139_v24 }
0x19d8   :  { %v6081_v17 = vpop.f32.mrf.mxu0 }
0x19d9   :  { %11643 = vmatprep.mubr.msk.f32.mxu0 %vm417_vm6, %v6081_v17 }
0x19da   :  { %v11635_v21 = vpop.f32.mrf.mxu0 }
0x19dc   :  { %v6154_v28 = vpop.f32.mrf.mxu1 }
0x19dd   :  { %11644 = vmatmul.mubr.msk.f32.vlgmr.msra.gmra.mxu0 %vm417_vm6, %v6154_v28 }
0x19de   :  { %11652 = vmatpush3.msra.mxu0 %v10186_v41  ;;  %v11640_v34 = vpop.f32.mrf.mxu1  ;;  %11659 = vmatprep.mubr.msk.f32.mxu0 %vm80_vm0, %v13378_v3  ;;  %v10219_v41 = vld [vmem:[%s14376_s2 + $0xf8] sm:$0xff] }
0x19df   :  { %11653 = vmatprep.subr.mxu0 %v10185_v29 }
0x19e0   :  { %11654 = vmatpush3.msra.mxu0 %v10185_v29  ;;  %v13565_v36 = vpop.f32.mrf.mxu1 }
0x19e1   :  { %11655 = vmatprep.subr.mxu0 %v10184_v35 }
0x19e2   :  { %11656 = vmatpush3.msra.mxu0 %v10184_v35  ;;  %v13575_v30 = vpop.f32.mrf.mxu1 }
0x19e3   :  { %11657 = vmatprep.subr.mxu0 %v10183_v46 }
0x19e4   :  { %11658 = vmatpush3.msra.mxu0 %v10183_v46  ;;  %v10218_v46 = vld [vmem:[%s14376_s2 + $0xf0] sm:$0xff] }
0x19e5   :  { %11660 = vmatmul.mubr.msk.f32.vlgmr.msra.gmra.mxu0 %vm80_vm0, %v13384_v25  ;;  %11673 = vmatprep.subr.mxu0 %v10202_v37 }
0x19e6   :  { %11674 = vmatpush3.msra.mxu0 %v10202_v37  ;;  %11681 = vmatprep.mubr.msk.f32.mxu0 %vm80_vm0, %v13378_v3  ;;  %v10217_v37 = vld [vmem:[%s14376_s2 + $0xe8] sm:$0xff] }
0x19e7   :  { %11675 = vmatprep.subr.mxu0 %v10201_v38 }
0x19e8   :  { %v11672_v47 = vpop.f32.mrf.mxu1  ;;  %11676 = vmatpush3.msra.mxu0 %v10201_v38  ;;  %v10216_v38 = vld [vmem:[%s14376_s2 + $0xe0] sm:$0xff] }
0x19e9   :  { %v6495_v48 = vadd.f32 %v11672_v47, %v10196_v40  ;;  %11677 = vmatprep.subr.mxu0 %v10200_v43  ;;  %v10233_v47 = vld [vmem:[%s14352_s5 + $0xe8] sm:$0xff] }
0x19ea   :  { %v6489_v50 = vpop.f32.mrf.mxu1  ;;  %11678 = vmatpush3.msra.mxu0 %v10200_v43  ;;  %v10234_v43 = vld [vmem:[%s14352_s5 + $0xf0] sm:$0xff] }
0x19eb   :  { %v6490_v5 = vadd.f32 %v10196_v40, %v6489_v50  ;;  %11679 = vmatprep.subr.mxu0 %v10199_v31  ;;  %v10235_v40 = vld [vmem:[%s14352_s5 + $0xf8] sm:$0xff] }
0x19ec   :  { %11680 = vmatpush3.msra.mxu0 %v10199_v31  ;;  %v10232_v31 = vld [vmem:[%s14352_s5 + $0xe0] sm:$0xff]  ;;  %v10227_v50 = vld [vmem:[%s14351_s4 + $0xf8] sm:$0xff]  ;;  %s12142_s5 = smov [#allocation2]  }
0x19ed   :  { %11682 = vmatmul.mubr.msk.f32.vlgmr.msra.gmra.mxu0 %vm80_vm0, %v13384_v25  ;;  %11685 = vmatpush3.xpose.msk.msra.mxu1 %vm417_vm6, %v6490_v5  ;;  %s9816_s21 = sshll.u32 %s12142_s5, 4  ;;  %s9817_s21 = int_to_ptr.vmem [resolvable:$true] %s9816_s21 }
0x19ee   :  { %11689 = vmatprep.subr.mxu1 %v12139_v24  ;;  %11694 = vmatprep.subr.mxu0 %v12139_v24  ;;  %s12117_s1 = scalar_lea.vmem %s9817_s21, 256  ;;  %p12122_p1 = scmp.lt.s32.totalorder %s9817_s21, %s9817_s21 }
0x19ef   :  { %11696 = vmatprep.mubr.msk.f32.mxu0 %vm12140_vm5, %v12139_v24  ;;  %p12118_p0 = scmp.ne.s32.totalorder %s9817_s21, %s12117_s1  ;;  %p12123_p2 = scmp.lt.s32.totalorder %s12117_s1, %s12117_s1 }
0x19f1   :  { %p12124_p3 = por %p12123_p2, %p12122_p1 }
0x19f3   :  { %p12125_p4 = pnand %p12124_p3, %p12118_p0 }
0x1a9d   :  { %v13595_v19 = vpop.f32.mrf.mxu0 }
0x1a9f   :  { %v13597_v6 = vpop.f32.mrf.mxu0 }
0x1aa5   :  { %v11661_v27 = vpop.f32.mrf.mxu0 }
0x1aa6   :  { %v6407_v51 = vadd.f32 %v11661_v27, %v10188_v32 }
0x1aa7   :  { %v6401_v26 = vpop.f32.mrf.mxu0 }
0x1aa8   :  { %v6402_v23 = vadd.f32 %v10188_v32, %v6401_v26  ;;  %v10226_v26 = vld [vmem:[%s14351_s4 + $0xf0] sm:$0xff] }
0x1aaa   :  { %11687 = vmatmul.mubr.msk.f32.vlgmr.msra.gmra.mxu1 %vm417_vm6, %v6402_v23 }
0x1aab   :  { %11690 = vmatpush3.xpose.msk.msra.mxu1 %vm417_vm6, %v6495_v48  ;;  %11691 = vmatprep.mubr.msk.f32.mxu1 %vm12140_vm5, %v12139_v24  ;;  %v10213_v48 = vld [vmem:[%s14356_s9 + $0x30] sm:$0xff] }
0x1aac   :  { %11699 = vmatprep.subr.mxu1 %v12139_v24 }
0x1aad   :  { %v11683_v52 = vpop.f32.mrf.mxu0 }
0x1aae   :  { %v6583_v53 = vadd.f32 %v11683_v52, %v10204_v33  ;;  %11692 = vmatmul.mubr.msk.f32.vlgmr.msra.gmra.mxu1 %vm417_vm6, %v6407_v51  ;;  %v10224_v51 = vld [vmem:[%s14351_s4 + $0xe0] sm:$0xff] }
0x1aaf   :  { %v6577_v12 = vpop.f32.mrf.mxu0  ;;  %11701 = vmatprep.mubr.msk.f32.mxu1 %vm12140_vm5, %v12139_v24 }
0x1ab0   :  { %v6578_v56 = vadd.f32 %v10204_v33, %v6577_v12  ;;  %11700 = vmatpush3.msra.mxu1 %v6583_v53  ;;  %v10225_v33 = vld [vmem:[%s14351_s4 + $0xe8] sm:$0xff]  ;;  %v10237_v12 = vld [vmem:[%s14355_s8 + $0x7] ss:$0 sm:$0xff] }
0x1ab1   :  { %11709 = vmatprep.subr.mxu1 %v10219_v41 }
0x1ab2   :  { %11695 = vmatpush3.msra.mxu0 %v6578_v56 }
0x1ab3   :  { %11704 = vmatprep.subr.mxu0 %v10213_v48 }
0x1b6a   :  { %v6658_v57 = vpop.f32.mrf.mxu1 }
0x1b6b   :  { %v6738_v58 = vmul.f32 0.35355338, %v6658_v57 }
0x1b6c   :  { %v11688_v60 = vpop.f32.mrf.mxu1 }
0x1b6d   :  { %v6740_v62 = vadd.f32 %v6738_v58, %v12409_v49 }
0x1b6e   :  { %v6734_v14 = vpop.f32.mrf.mxu1 }
0x1b6f   :  { %v6739_v0 = vmul.f32 0.35355338, %v6734_v14  ;;  %v6742_v22 = vsel %vm417_vm6, %v6740_v62, -inf }
0x1b70   :  { %6743 = vmax.xlane.f32.xlu0 %v6742_v22  ;;  %v11693_v1 = vpop.f32.mrf.mxu1 }
0x1b71   :  { %v6741_v39 = vadd.f32 %v6739_v0, %v12409_v49  ;;  %v6314_v0 = vadd.f32 %v13575_v30, %v13597_v6 }
0x1b73   :  { %v6745_v59 = vsel %vm417_vm6, %v6741_v39, -inf }
0x1b74   :  { %6746 = vmax.xlane.f32.xlu1 %v6745_v59 }
0x1bf9   :  { %v6744_v2 = vpop.xlane.xlu0 %6743 }
0x1bfa   :  { %v6748_v42 = vsub.f32 %v6740_v62, %v6744_v2  ;;  %v6319_v62 = vadd.f32 %v13565_v36, %v13595_v19  ;;  %v10229_v2 = vld [vmem:[%s14354_s7 + $0x7] ss:$0 sm:$0xff] }
0x1bfb   :  { %v10221_v36 = vld [vmem:[%s14353_s6 + $0x7] ss:$0 sm:$0xff] }
0x1bfc   :  { %v6750_v61 = vmul.f32 1.442695, %v6748_v42 }
0x1bfd   :  { %v6747_v4 = vpop.xlane.xlu1 %6746 }
0x1bfe   :  { %12093 = vpow2.f32 %v6750_v61  ;;  %v6749_v18 = vsub.f32 %v6741_v39, %v6747_v4 }
0x1c00   :  { %v6752_v7 = vmul.f32 1.442695, %v6749_v18 }
0x1c02   :  { %12095 = vpow2.f32 %v6752_v7 }
0x1c0b   :  { %v12094_v8 = vpop.eup %12093 }
0x1c0c   :  { %v6754_v9 = vsel %vm417_vm6, %v12094_v8, 0.0 }
0x1c0d   :  { %6755 = vadd.xlane.f32.xlu0 %v6754_v9 }
0x1c0f   :  { %v12096_v13 = vpop.eup %12095 }
0x1c10   :  { %v6757_v15 = vsel %vm417_vm6, %v12096_v13, 0.0 }
0x1c11   :  { %6758 = vadd.xlane.f32.xlu1 %v6757_v15 }
0x1c96   :  { %v6756_v17 = vpop.xlane.xlu0 %6755 }
0x1c97   :  { %12097 = vrcp.f32 %v6756_v17 }
0x1c9a   :  { %v6759_v21 = vpop.xlane.xlu1 %6758 }
0x1c9b   :  { %12099 = vrcp.f32 %v6759_v21 }
0x1ca4   :  { %v12098_v28 = vpop.eup %12097 }
0x1ca5   :  { %v6761_v29 = vmul.f32 %v12098_v28, %v12094_v8 }
0x1ca7   :  { %11697 = vmatmul.mubr.msk.f32.vlgmr.msra.gmra.mxu0 %vm417_vm6, %v6761_v29 }
0x1ca8   :  { %v12100_v34 = vpop.eup %12099  ;;  %11705 = vmatpush3.msra.mxu0 %v10213_v48 }
0x1ca9   :  { %v6763_v35 = vmul.f32 %v12100_v34, %v12096_v13  ;;  %11720 = vmatprep.subr.mxu0 %v10227_v50 }
0x1cab   :  { %11702 = vmatmul.mubr.msk.f32.vlgmr.msra.gmra.mxu1 %vm417_vm6, %v6763_v35 }
0x1cac   :  { %11710 = vmatpush3.msra.mxu1 %v10219_v41  ;;  %11717 = vmatprep.mubr.msk.f32.mxu1 %vm80_vm0, %v13378_v3 }
0x1cad   :  { %11711 = vmatprep.subr.mxu1 %v10218_v46 }
0x1cae   :  { %11712 = vmatpush3.msra.mxu1 %v10218_v46 }
0x1caf   :  { %11713 = vmatprep.subr.mxu1 %v10217_v37 }
0x1cb0   :  { %11714 = vmatpush3.msra.mxu1 %v10217_v37 }
0x1cb1   :  { %11715 = vmatprep.subr.mxu1 %v10216_v38 }
0x1cb2   :  { %11716 = vmatpush3.msra.mxu1 %v10216_v38 }
0x1cb3   :  { %11718 = vmatmul.mubr.msk.f32.vlgmr.msra.gmra.mxu1 %vm80_vm0, %v13384_v25  ;;  %11731 = vmatprep.subr.mxu1 %v10235_v40 }
0x1cb4   :  { %11732 = vmatpush3.msra.mxu1 %v10235_v40  ;;  %11739 = vmatprep.mubr.msk.f32.mxu1 %vm80_vm0, %v13378_v3 }
0x1cb5   :  { %11733 = vmatprep.subr.mxu1 %v10234_v43 }
0x1cb6   :  { %11734 = vmatpush3.msra.mxu1 %v10234_v43 }
0x1cb7   :  { %11735 = vmatprep.subr.mxu1 %v10233_v47 }
0x1cb8   :  { %11736 = vmatpush3.msra.mxu1 %v10233_v47 }
0x1cb9   :  { %11737 = vmatprep.subr.mxu1 %v10232_v31 }
0x1cba   :  { %11738 = vmatpush3.msra.mxu1 %v10232_v31 }
0x1cbb   :  { %11740 = vmatmul.mubr.msk.f32.vlgmr.msra.gmra.mxu1 %vm80_vm0, %v13384_v25  ;;  %11752 = vmatprep.subr.mxu1 %v12139_v24 }
0x1cbc   :  { %11754 = vmatprep.mubr.msk.f32.mxu1 %vm12140_vm5, %v12139_v24 }
0x1d67   :  { %v6833_v5 = vpop.f32.mrf.mxu0 }
0x1d68   :  { %11706 = vmatprep.mubr.msk.f32.mxu0 %vm417_vm6, %v6833_v5 }
0x1d69   :  { %v11698_v27 = vpop.f32.mrf.mxu0 }
0x1d6a   :  { %v10246_v27 = vld [vmem:[%s14356_s9 + $0x38] sm:$0xff] }
0x1d6b   :  { %v6906_v32 = vpop.f32.mrf.mxu1 }
0x1d6c   :  { %11707 = vmatmul.mubr.msk.f32.vlgmr.msra.gmra.mxu0 %vm417_vm6, %v6906_v32 }
0x1d6d   :  { %11721 = vmatpush3.msra.mxu0 %v10227_v50  ;;  %v11703_v23 = vpop.f32.mrf.mxu1  ;;  %11728 = vmatprep.mubr.msk.f32.mxu0 %vm80_vm0, %v13378_v3 }
0x1d6e   :  { %11722 = vmatprep.subr.mxu0 %v10226_v26 }
0x1d6f   :  { %11723 = vmatpush3.msra.mxu0 %v10226_v26 }
0x1d70   :  { %11724 = vmatprep.subr.mxu0 %v10225_v33 }
0x1d71   :  { %11725 = vmatpush3.msra.mxu0 %v10225_v33 }
0x1d72   :  { %11726 = vmatprep.subr.mxu0 %v10224_v51 }
0x1d73   :  { %11727 = vmatpush3.msra.mxu0 %v10224_v51  ;;  %v11719_v52 = vpop.f32.mrf.mxu1 }
0x1d74   :  { %11729 = vmatmul.mubr.msk.f32.vlgmr.msra.gmra.mxu0 %vm80_vm0, %v13384_v25  ;;  %11742 = vmatprep.subr.mxu0 %v12139_v24  ;;  %v7080_v6 = vadd.f32 %v11719_v52, %v10221_v36  ;;  %v10250_v52 = vld [vmem:[%s14357_s10 + $0x1] ss:$0 sm:$0xff] }
0x1d75   :  { %11744 = vmatprep.mubr.msk.f32.mxu0 %vm12140_vm5, %v12139_v24  ;;  %v7074_v53 = vpop.f32.mrf.mxu1 }
0x1d76   :  { %v7075_v19 = vadd.f32 %v10221_v36, %v7074_v53 }
0x1d7b   :  { %v11741_v56 = vpop.f32.mrf.mxu1 }
0x1d7c   :  { %v7256_v57 = vadd.f32 %v11741_v56, %v10237_v12 }
0x1d7d   :  { %v7250_v58 = vpop.f32.mrf.mxu1 }
0x1d7e   :  { %v7251_v60 = vadd.f32 %v10237_v12, %v7250_v58 }
0x1d80   :  { %11753 = vmatpush3.msra.mxu1 %v7251_v60 }
0x1d81   :  { %11762 = vmatprep.subr.mxu1 %v10246_v27 }
0x1e2c   :  { %v11708_v14 = vpop.f32.mrf.mxu0 }
0x1e2d   :  { %v13687_v22 = vadd.f32 %v11708_v14, %v6319_v62 }
0x1e2e   :  { %v6984_v1 = vpop.f32.mrf.mxu0 }
0x1e2f   :  { %v13689_v39 = vadd.f32 %v6984_v1, %v6314_v0 }
0x1e34   :  { %v11730_v59 = vpop.f32.mrf.mxu0 }
0x1e35   :  { %v7168_v30 = vadd.f32 %v11730_v59, %v10229_v2 }
0x1e36   :  { %v7162_v42 = vpop.f32.mrf.mxu0 }
0x1e37   :  { %v7163_v61 = vadd.f32 %v10229_v2, %v7162_v42 }
0x1e39   :  { %11743 = vmatpush3.xpose.msk.msra.mxu0 %vm417_vm6, %v7163_v61 }
0x1e3a   :  { %11747 = vmatprep.subr.mxu0 %v12139_v24 }
0x1e3c   :  { %11745 = vmatmul.mubr.msk.f32.vlgmr.msra.gmra.mxu0 %vm417_vm6, %v7075_v19 }
0x1e3d   :  { %11748 = vmatpush3.xpose.msk.msra.mxu0 %vm417_vm6, %v7168_v30  ;;  %11749 = vmatprep.mubr.msk.f32.mxu0 %vm12140_vm5, %v12139_v24  ;;  %v10279_v30 = vld [vmem:[%s14360_s13 + $0x1c0] sm:$0xff] }
0x1e3e   :  { %11757 = vmatprep.subr.mxu0 %v12139_v24 }
0x1e40   :  { %11750 = vmatmul.mubr.msk.f32.vlgmr.msra.gmra.mxu0 %vm417_vm6, %v7080_v6  ;;  %v10272_v6 = vld [vmem:[%s14360_s13 + $0x188] sm:$0xff] }
0x1e41   :  { %11758 = vmatpush3.msra.mxu0 %v7256_v57  ;;  %11759 = vmatprep.mubr.msk.f32.mxu0 %vm12140_vm5, %v12139_v24 }
0x1efc   :  { %v7331_v4 = vpop.f32.mrf.mxu0 }
0x1efd   :  { %v7411_v18 = vmul.f32 0.35355338, %v7331_v4 }
0x1efe   :  { %v11746_v7 = vpop.f32.mrf.mxu0 }
0x1eff   :  { %v7413_v8 = vadd.f32 %v7411_v18, %v12409_v49  ;;  %v10280_v18 = vld [vmem:[%s14360_s13 + $0x1c8] sm:$0xff] }
0x1f00   :  { %v7407_v9 = vpop.f32.mrf.mxu0 }
0x1f01   :  { %v7412_v13 = vmul.f32 0.35355338, %v7407_v9  ;;  %v7415_v15 = vsel %vm417_vm6, %v7413_v8, -inf  ;;  %v10308_v9 = vcombine.high %v10272_v6, %v10280_v18 }
0x1f02   :  { %7416 = vmax.xlane.f32.xlu0 %v7415_v15  ;;  %v11751_v41 = vpop.f32.mrf.mxu0  ;;  %v10263_v15 = vld [vmem:[%s14360_s13 + $0x140] sm:$0xff] }
0x1f03   :  { %v7414_v17 = vadd.f32 %v7412_v13, %v12409_v49  ;;  %v10255_v13 = vld [vmem:[%s14360_s13 + $0x100] sm:$0xff]  ;;  %v10256_v41 = vld [vmem:[%s14360_s13 + $0x108] sm:$0xff] }
0x1f05   :  { %v7418_v21 = vsel %vm417_vm6, %v7414_v17, -inf }
0x1f06   :  { %7419 = vmax.xlane.f32.xlu1 %v7418_v21  ;;  %v10264_v21 = vld [vmem:[%s14360_s13 + $0x148] sm:$0xff] }
0x1f8b   :  { %v7417_v28 = vpop.xlane.xlu0 %7416 }
0x1f8c   :  { %v7421_v29 = vsub.f32 %v7413_v8, %v7417_v28  ;;  %v10307_v8 = vcombine.low %v10272_v6, %v10280_v18  ;;  %v10289_v28 = vcombine.low %v10255_v13, %v10263_v15  ;;  %v10260_v6 = vld [vmem:[%s14360_s13 + $0x128] sm:$0xff] }
0x1f8e   :  { %v7423_v34 = vmul.f32 1.442695, %v7421_v29  ;;  %v10291_v29 = vcombine.low %v10256_v41, %v10264_v21 }
0x1f8f   :  { %v7420_v24 = vpop.xlane.xlu1 %7419 }
0x1f90   :  { %12101 = vpow2.f32 %v7423_v34  ;;  %v7422_v35 = vsub.f32 %v7414_v17, %v7420_v24  ;;  %v10290_v17 = vcombine.high %v10255_v13, %v10263_v15  ;;  %v10292_v34 = vcombine.high %v10256_v41, %v10264_v21  ;;  %v10273_v24 = vld [vmem:[%s14360_s13 + $0x190] sm:$0xff]  ;;  %v10278_v41 = vld [vmem:[%s14360_s13 + $0x1b8] sm:$0xff] }
0x1f91   :  { %v10277_v13 = vld [vmem:[%s14360_s13 + $0x1b0] sm:$0xff] }
0x1f92   :  { %v7425_v46 = vmul.f32 1.442695, %v7422_v35  ;;  %v10281_v35 = vld [vmem:[%s14360_s13 + $0x1d0] sm:$0xff] }
0x1f93   :  { %v10285_v15 = vld [vmem:[%s14360_s13 + $0x1f0] sm:$0xff] }
0x1f94   :  { %12103 = vpow2.f32 %v7425_v46  ;;  %v10274_v46 = vld [vmem:[%s14360_s13 + $0x198] sm:$0xff] }
0x1f9d   :  { %v12102_v37 = vpop.eup %12101 }
0x1f9e   :  { %v7427_v38 = vsel %vm417_vm6, %v12102_v37, 0.0 }
0x1f9f   :  { %7428 = vadd.xlane.f32.xlu0 %v7427_v38  ;;  %v10282_v38 = vld [vmem:[%s14360_s13 + $0x1d8] sm:$0xff] }
0x1fa1   :  { %v12104_v40 = vpop.eup %12103 }
0x1fa2   :  { %v7430_v43 = vsel %vm417_vm6, %v12104_v40, 0.0 }
0x1fa3   :  { %7431 = vadd.xlane.f32.xlu1 %v7430_v43  ;;  %v10311_v43 = vcombine.low %v10274_v46, %v10282_v38 }
0x2028   :  { %v7429_v49 = vpop.xlane.xlu0 %7428 }
0x2029   :  { %12105 = vrcp.f32 %v7429_v49  ;;  %v10312_v49 = vcombine.high %v10274_v46, %v10282_v38  ;;  %v10262_v46 = vld [vmem:[%s14360_s13 + $0x138] sm:$0xff]  ;;  %v10317_v38 = vcombine.low %v10277_v13, %v10285_v15 }
0x202c   :  { %v7432_v47 = vpop.xlane.xlu1 %7431 }
0x202d   :  { %12107 = vrcp.f32 %v7432_v47 }
0x2036   :  { %v12106_v31 = vpop.eup %12105 }
0x2037   :  { %v7434_v48 = vmul.f32 %v12106_v31, %v12102_v37  ;;  %v10310_v37 = vcombine.high %v10273_v24, %v10281_v35 }
0x2039   :  { %11755 = vmatmul.mubr.msk.f32.vlgmr.msra.gmra.mxu1 %vm417_vm6, %v7434_v48 }
0x203a   :  { %v12108_v50 = vpop.eup %12107  ;;  %11763 = vmatpush3.msra.mxu1 %v10246_v27 }
0x203b   :  { %v7436_v5 = vmul.f32 %v12108_v50, %v12104_v40  ;;  %8063 = vmatprep.subr.bf16.mxu1 %v10308_v9  ;;  %v10309_v40 = vcombine.low %v10273_v24, %v10281_v35  ;;  %v10261_v24 = vld [vmem:[%s14360_s13 + $0x130] sm:$0xff] }
0x203c   :  { %v10269_v35 = vld [vmem:[%s14360_s13 + $0x170] sm:$0xff] }
0x203d   :  { %11760 = vmatmul.mubr.msk.f32.vlgmr.msra.gmra.mxu0 %vm417_vm6, %v7436_v5 }
0x203e   :  { %8040 = vmatprep.mubr.bf16.mxu0 %v12141_v63 }
0x20f9   :  { %v7506_v32 = vpop.f32.mrf.mxu1 }
0x20fa   :  { %11764 = vmatprep.mubr.msk.f32.mxu1 %vm417_vm6, %v7506_v32 }
0x20fb   :  { %v11756_v26 = vpop.f32.mrf.mxu1 }
0x20fc   :  { %v10253_v26 = vld [vmem:[%s14358_s11 + $0x1] ss:$0 sm:$0xff] }
0x20fd   :  { %v7579_v23 = vpop.f32.mrf.mxu0 }
0x20fe   :  { %11765 = vmatmul.mubr.msk.f32.vlgmr.msra.gmra.mxu1 %vm417_vm6, %v7579_v23 }
0x20ff   :  { %v11761_v33 = vpop.f32.mrf.mxu0  ;;  %8083 = vmatprep.mubr.bf16.mxu1 %v12141_v63  ;;  %8064 = vmatpush1.bf16.msra.mxu1 %v10307_v8 }
0x2100   :  { %8065 = vmatprep.subr.bf16.mxu1 %v10292_v34 }
0x2103   :  { %8066 = vmatpush1.bf16.msra.mxu1 %v10291_v29  ;;  %v10318_v29 = vcombine.high %v10277_v13, %v10285_v15 }
0x2104   :  { %8149 = vmatprep.subr.bf16.mxu1 %v10312_v49 }
0x21be   :  { %v11766_v51 = vpop.f32.mrf.mxu1 }
0x21bf   :  { %v7667_v53 = vadd.f32 %v11766_v51, %v13687_v22 }
0x21c0   :  { %v7657_v12 = vpop.f32.mrf.mxu1 }
0x21c1   :  { %v7677_v56 = vadd.f32 %v10250_v52, %v7667_v53  ;;  %v7666_v57 = vadd.f32 %v7657_v12, %v13689_v39  ;;  %v10254_v53 = vld [vmem:[%s14359_s12 + $0x1] ss:$0 sm:$0xff] }
0x21c3   :  { %v7676_v58 = vadd.f32 %v10250_v52, %v7666_v57  ;;  %v7679_v60 = vadd.f32 %v7677_v56, %v13384_v25  ;;  %v10257_v56 = vld [vmem:[%s14360_s13 + $0x110] sm:$0xff] }
0x21c4   :  { %v10265_v57 = vld [vmem:[%s14360_s13 + $0x150] sm:$0xff] }
0x21c5   :  { %v7687_v62 = vsel %vm80_vm0, %v7679_v60, 0.0  ;;  %v7678_v14 = vadd.f32 %v7676_v58, %v13378_v3  ;;  %v10271_v3 = vld [vmem:[%s14360_s13 + $0x180] sm:$0xff]  ;;  %v10258_v58 = vld [vmem:[%s14360_s13 + $0x118] sm:$0xff] }
0x21c6   :  { %7688 = vadd.xlane.f32.xlu1 %v7687_v62  ;;  %v10306_v4 = vcombine.high %v10271_v3, %v10279_v30  ;;  %v10305_v7 = vcombine.low %v10271_v3, %v10279_v30  ;;  %v10259_v3 = vld [vmem:[%s14360_s13 + $0x120] sm:$0xff] }
0x21c7   :  { %v7684_v0 = vsel %vm80_vm0, %v7678_v14, 0.0  ;;  %v10267_v30 = vld [vmem:[%s14360_s13 + $0x160] sm:$0xff] }
0x21c8   :  { %7685 = vadd.xlane.f32.xlu0 %v7684_v0  ;;  %8020 = vmatprep.subr.bf16.mxu0 %v10306_v4  ;;  %v10268_v4 = vld [vmem:[%s14360_s13 + $0x168] sm:$0xff]  ;;  %v10298_v8 = vcombine.high %v10259_v3, %v10267_v30  ;;  %v10297_v21 = vcombine.low %v10259_v3, %v10267_v30  ;;  %v11929_v3 = vld [vmem:[%s14362_s15 + $0x440] sm:$0xff]  }
0x21c9   :  { %8021 = vmatpush1.bf16.msra.mxu0 %v10305_v7  ;;  %v10300_v9 = vcombine.high %v10260_v6, %v10268_v4  ;;  %v11930_v30 = vld [vmem:[%s14362_s15 + $0x4c0] sm:$0xff]  }
0x21ca   :  { %8022 = vmatprep.subr.bf16.mxu0 %v10290_v17  ;;  %v10286_v17 = vld [vmem:[%s14360_s13 + $0x1f8] sm:$0xff] }
0x21cb   :  { %v10320_v34 = vcombine.high %v10278_v41, %v10286_v17 }
0x21cd   :  { %8023 = vmatpush1.bf16.msra.mxu0 %v10289_v28  ;;  %v10299_v28 = vcombine.low %v10260_v6, %v10268_v4  ;;  %v11931_v6 = vld [vmem:[%s14362_s15 + $0x400] sm:$0xff]  }
0x21ce   :  { %8106 = vmatprep.subr.bf16.mxu0 %v10310_v37  ;;  %v10270_v37 = vld [vmem:[%s14360_s13 + $0x178] sm:$0xff]  ;;  %v11932_v4 = vld [vmem:[%s14362_s15 + $0x480] sm:$0xff]  }
0x21cf   :  { %v10304_v49 = vcombine.high %v10262_v46, %v10270_v37 }
0x224f   :  { %v7689_v1 = vpop.xlane.xlu1 %7688 }
0x2250   :  { %v7691_v59 = vmul.f32 0.03125, %v7689_v1  ;;  %v10294_v1 = vcombine.high %v10257_v56, %v10265_v57 }
0x2251   :  { %v7686_v2 = vpop.xlane.xlu0 %7685 }
0x2252   :  { %v7693_v42 = vsub.f32 %v7679_v60, %v7691_v59  ;;  %v7690_v22 = vmul.f32 0.03125, %v7686_v2  ;;  %v10266_v60 = vld [vmem:[%s14360_s13 + $0x158] sm:$0xff]  ;;  %v10275_v2 = vld [vmem:[%s14360_s13 + $0x1a0] sm:$0xff] }
0x2253   :  { %v10296_v59 = vcombine.high %v10258_v58, %v10266_v60 }
0x2254   :  { %v7692_v61 = vsub.f32 %v7678_v14, %v7690_v22  ;;  %v7695_v36 = vmul.f32 %v7693_v42, %v7693_v42  ;;  %v10276_v22 = vld [vmem:[%s14360_s13 + $0x1a8] sm:$0xff] }
0x2256   :  { %v7699_v39 = vsel %vm80_vm0, %v7695_v36, 0.0  ;;  %v7694_v19 = vmul.f32 %v7692_v61, %v7692_v61  ;;  %v10293_v36 = vcombine.low %v10257_v56, %v10265_v57  ;;  %v11914_v56 = vld [vmem:[%s14362_s15 + $0x4e0] sm:$0xff]  }
0x2257   :  { %7700 = vadd.xlane.f32.xlu1 %v7699_v39  ;;  %v10295_v39 = vcombine.low %v10258_v58, %v10266_v60  ;;  %v11915_v57 = vld [vmem:[%s14362_s15 + $0x420] sm:$0xff]   ;;  %v11917_v60 = vld [vmem:[%s14362_s15 + $0x458] sm:$0xff]  }
0x2258   :  { %v7696_v25 = vsel %vm80_vm0, %v7694_v19, 0.0  ;;  %v11916_v58 = vld [vmem:[%s14362_s15 + $0x4a0] sm:$0xff]  }
0x2259   :  { %7697 = vadd.xlane.f32.xlu0 %v7696_v25 }
0x22e0   :  { %v7701_v47 = vpop.xlane.xlu1 %7700 }
0x22e1   :  { %v7703_v31 = vmul.f32 0.03125, %v7701_v47  ;;  %v10301_v47 = vcombine.low %v10261_v24, %v10269_v35 }
0x22e2   :  { %v7698_v48 = vpop.xlane.xlu0 %7697 }
0x22e3   :  { %v7705_v50 = vadd.f32 1e-05, %v7703_v31  ;;  %v7702_v5 = vmul.f32 0.03125, %v7698_v48  ;;  %v10303_v31 = vcombine.low %v10262_v46, %v10270_v37  ;;  %v11901_v48 = vld [vmem:[%s14362_s15 + $0x478] sm:$0xff]  }
0x22e5   :  { %12109 = vrsqrt.f32 %v7705_v50  ;;  %v7704_v27 = vadd.f32 1e-05, %v7702_v5  ;;  %v11902_v50 = vld [vmem:[%s14362_s15 + $0x4f8] sm:$0xff]  }
0x22e6   :  { %v11903_v5 = vld [vmem:[%s14362_s15 + $0x438] sm:$0xff]  }
0x22e7   :  { %12111 = vrsqrt.f32 %v7704_v27  ;;  %v11904_v27 = vld [vmem:[%s14362_s15 + $0x4b8] sm:$0xff]  }
0x22f2   :  { %v12110_v32 = vpop.eup %12109 }
0x22f3   :  { %v7709_v23 = vmul.f32 %v12110_v32, %v7693_v42  ;;  %v10283_v42 = vld [vmem:[%s14360_s13 + $0x1e0] sm:$0xff]  ;;  %v11905_v32 = vld [vmem:[%s14362_s15 + $0x470] sm:$0xff]  }
0x22f4   :  { %v12112_v33 = vpop.eup %12111  ;;  %v10314_v19 = vcombine.high %v10275_v2, %v10283_v42  ;;  %v10313_v18 = vcombine.low %v10275_v2, %v10283_v42  ;;  %v11921_v2 = vld [vmem:[%s14362_s15 + $0x450] sm:$0xff]  }
0x22f5   :  { %v7717_v51 = vmul.f32 %v10253_v26, %v7709_v23  ;;  %v7708_v52 = vmul.f32 %v12112_v33, %v7692_v61  ;;  %v10284_v61 = vld [vmem:[%s14360_s13 + $0x1e8] sm:$0xff]  ;;  %v11908_v23 = vld [vmem:[%s14362_s15 + $0x4b0] sm:$0xff]  }
0x22f6   :  { %v10316_v25 = vcombine.high %v10276_v22, %v10284_v61  ;;  %v10315_v7 = vcombine.low %v10276_v22, %v10284_v61  ;;  %v11909_v33 = vld [vmem:[%s14362_s15 + $0x468] sm:$0xff]   ;;  %v11922_v42 = vld [vmem:[%s14362_s15 + $0x4d0] sm:$0xff]  }
0x22f7   :  { %v7716_v12 = vmul.f32 %v10253_v26, %v7708_v52  ;;  %v13787_v62 = vadd.f32 %v10254_v53, %v7717_v51  ;;  %v11907_v26 = vld [vmem:[%s14362_s15 + $0x430] sm:$0xff]   ;;  %v11910_v51 = vld [vmem:[%s14362_s15 + $0x4e8] sm:$0xff]  }
0x22f8   :  { %v11911_v52 = vld [vmem:[%s14362_s15 + $0x428] sm:$0xff]   ;;  %v11923_v22 = vld [vmem:[%s14362_s15 + $0x410] sm:$0xff]  }
0x22f9   :  { %v13789_v14 = vadd.f32 %v10254_v53, %v7716_v12  ;;  %v11912_v53 = vld [vmem:[%s14362_s15 + $0x4a8] sm:$0xff]   ;;  %v11913_v12 = vld [vmem:[%s14362_s15 + $0x460] sm:$0xff]   ;;  %v11924_v61 = vld [vmem:[%s14362_s15 + $0x490] sm:$0xff]  }
0x22fb   :  { %v13793_v0 = vpack.c.bf16 %v13787_v62, %v13789_v14 }
0x22fd   :  { %10321 = vmatmul.mubr.msk.bf16.vlgmr.msra.gmra.mxu0 %vm80_vm0, %v13793_v0  ;;  %10322 = vmatmul.mubr.msk.bf16.vlgmr.msra.gmra.mxu1 %vm80_vm0, %v13793_v0 }
0x22fe   :  { %8107 = vmatpush1.bf16.msra.mxu0 %v10309_v40  ;;  %8150 = vmatpush1.bf16.msra.mxu1 %v10311_v43  ;;  %v10319_v40 = vcombine.low %v10278_v41, %v10286_v17  ;;  %v10302_v43 = vcombine.high %v10261_v24, %v10269_v35 }
0x22ff   :  { %8108 = vmatprep.subr.bf16.mxu0 %v10294_v1  ;;  %8151 = vmatprep.subr.bf16.mxu1 %v10296_v59  ;;  %v11919_v1 = vld [vmem:[%s14362_s15 + $0x418] sm:$0xff]  }
0x2300   :  { %8126 = vmatprep.mubr.bf16.mxu0 %v12141_v63  ;;  %8169 = vmatprep.mubr.bf16.mxu1 %v12141_v63  ;;  %v11920_v59 = vld [vmem:[%s14362_s15 + $0x498] sm:$0xff]  }
0x2302   :  { %8109 = vmatpush1.bf16.msra.mxu0 %v10293_v36  ;;  %8152 = vmatpush1.bf16.msra.mxu1 %v10295_v39  ;;  %v11925_v36 = vld [vmem:[%s14362_s15 + $0x448] sm:$0xff]  }
0x2303   :  { %8192 = vmatprep.subr.bf16.mxu0 %v10314_v19  ;;  %8235 = vmatprep.subr.bf16.mxu1 %v10316_v25  ;;  %v11926_v39 = vld [vmem:[%s14362_s15 + $0x4c8] sm:$0xff]  }
0x2304   :  { %v11927_v19 = vld [vmem:[%s14362_s15 + $0x408] sm:$0xff]  }
0x2305   :  { %10323 = vmatmul.mubr.msk.bf16.vlgmr.msra.gmra.mxu0 %vm80_vm0, %v13793_v0  ;;  %10324 = vmatmul.mubr.msk.bf16.vlgmr.msra.gmra.mxu1 %vm80_vm0, %v13793_v0  ;;  %v11928_v25 = vld [vmem:[%s14362_s15 + $0x488] sm:$0xff]  }
0x2306   :  { %8193 = vmatpush1.bf16.msra.mxu0 %v10313_v18  ;;  %8236 = vmatpush1.bf16.msra.mxu1 %v10315_v7  ;;  %v11933_v18 = vld [vmem:[%s14362_s15 + $0x578] sm:$0xff]  }
0x2307   :  { %8194 = vmatprep.subr.bf16.mxu0 %v10298_v8  ;;  %8237 = vmatprep.subr.bf16.mxu1 %v10300_v9  ;;  %v11934_v7 = vld [vmem:[%s14362_s15 + $0x5f8] sm:$0xff]   ;;  %v13970_v8 = vld [vmem:[%s14361_s14 + $0x10] sm:$0xff] }
0x2308   :  { %8212 = vmatprep.mubr.bf16.mxu0 %v12141_v63  ;;  %8255 = vmatprep.mubr.bf16.mxu1 %v12141_v63  ;;  %v7772_v15 = vrot.slane %v13970_v8, %v12952_v44  ;;  %v7780_v41 = vrot.slane %v13970_v8, %v12955_v45  ;;  %v7768_v17 = vrot.slane %v13970_v8, %v12958_v20 }
0x230a   :  { %8195 = vmatpush1.bf16.msra.mxu0 %v10297_v21  ;;  %8238 = vmatpush1.bf16.msra.mxu1 %v10299_v28  ;;  %v7776_v21 = vrot.slane %v13970_v8, %v12961_v16 }
0x230b   :  { %8278 = vmatprep.subr.bf16.mxu0 %v10318_v29  ;;  %8321 = vmatprep.subr.bf16.mxu1 %v10320_v34 }
0x230d   :  { %10325 = vmatmul.mubr.msk.bf16.vlgmr.msra.gmra.mxu0 %vm80_vm0, %v13793_v0  ;;  %10326 = vmatmul.mubr.msk.bf16.vlgmr.msra.gmra.mxu1 %vm80_vm0, %v13793_v0 }
0x230e   :  { %8279 = vmatpush1.bf16.msra.mxu0 %v10317_v38  ;;  %8322 = vmatpush1.bf16.msra.mxu1 %v10319_v40 }
0x230f   :  { %8280 = vmatprep.subr.bf16.mxu0 %v10302_v43  ;;  %8323 = vmatprep.subr.bf16.mxu1 %v10304_v49 }
0x2310   :  { %8298 = vmatprep.mubr.bf16.mxu0 %v12141_v63  ;;  %8341 = vmatprep.mubr.bf16.mxu1 %v12141_v63  ;;  %v11906_v63 = vld [vmem:[%s14362_s15 + $0x4f0] sm:$0xff]  }
0x2312   :  { %8281 = vmatpush1.bf16.msra.mxu0 %v10301_v47  ;;  %8324 = vmatpush1.bf16.msra.mxu1 %v10303_v31 }
0x2313   :  { %11127 = vmatprep.subr.bf16.mxu0 %v11901_v48  ;;  %11149 = vmatprep.subr.bf16.mxu1 %v11902_v50 }
0x2315   :  { %10327 = vmatmul.mubr.msk.bf16.vlgmr.msra.gmra.mxu0 %vm80_vm0, %v13793_v0  ;;  %10328 = vmatmul.mubr.msk.bf16.vlgmr.msra.gmra.mxu1 %vm80_vm0, %v13793_v0  ;;  %v11918_v0 = vld [vmem:[%s14362_s15 + $0x4d8] sm:$0xff]  }
0x2316   :  { %11128 = vmatpush3.bf16.msra.mxu0 %v11903_v5  ;;  %11150 = vmatpush3.bf16.msra.mxu1 %v11904_v27 }
0x2317   :  { %11129 = vmatprep.subr.bf16.mxu0 %v11905_v32  ;;  %11151 = vmatprep.subr.bf16.mxu1 %v11906_v63  ;;  %v7788_v63 = vrot.slane %v13970_v8, %v12977_v54 }
0x231a   :  { %11130 = vmatpush3.bf16.msra.mxu0 %v11907_v26  ;;  %11152 = vmatpush3.bf16.msra.mxu1 %v11908_v23  ;;  %v7796_v26 = vrot.slane %v13970_v8, %v12980_v55 }
0x231b   :  { %11131 = vmatprep.subr.bf16.mxu0 %v11909_v33  ;;  %11153 = vmatprep.subr.bf16.mxu1 %v11910_v51 }
0x231e   :  { %11132 = vmatpush3.bf16.msra.mxu0 %v11911_v52  ;;  %11154 = vmatpush3.bf16.msra.mxu1 %v11912_v53 }
0x231f   :  { %11133 = vmatprep.subr.bf16.mxu0 %v11913_v12  ;;  %11155 = vmatprep.subr.bf16.mxu1 %v11914_v56 }
0x2322   :  { %11134 = vmatpush3.bf16.msra.mxu0 %v11915_v57  ;;  %11156 = vmatpush3.bf16.msra.mxu1 %v11916_v58 }
0x2323   :  { %11135 = vmatprep.subr.bf16.mxu0 %v11917_v60  ;;  %11157 = vmatprep.subr.bf16.mxu1 %v11918_v0  ;;  %v11935_v0 = vld [vmem:[%s14362_s15 + $0x538] sm:$0xff]  }
0x2326   :  { %11136 = vmatpush3.bf16.msra.mxu0 %v11919_v1  ;;  %11158 = vmatpush3.bf16.msra.mxu1 %v11920_v59  ;;  %v11936_v1 = vld [vmem:[%s14362_s15 + $0x5b8] sm:$0xff]  }
0x2327   :  { %11137 = vmatprep.subr.bf16.mxu0 %v11921_v2  ;;  %11159 = vmatprep.subr.bf16.mxu1 %v11922_v42 }
0x232a   :  { %11138 = vmatpush3.bf16.msra.mxu0 %v11923_v22  ;;  %11160 = vmatpush3.bf16.msra.mxu1 %v11924_v61  ;;  %v11937_v61 = vld [vmem:[%s14362_s15 + $0x570] sm:$0xff]  }
0x232b   :  { %11139 = vmatprep.subr.bf16.mxu0 %v11925_v36  ;;  %11161 = vmatprep.subr.bf16.mxu1 %v11926_v39  ;;  %v11938_v36 = vld [vmem:[%s14362_s15 + $0x5f0] sm:$0xff]  }
0x232e   :  { %11140 = vmatpush3.bf16.msra.mxu0 %v11927_v19  ;;  %11162 = vmatpush3.bf16.msra.mxu1 %v11928_v25 }
0x232f   :  { %11141 = vmatprep.subr.bf16.mxu0 %v11929_v3  ;;  %11163 = vmatprep.subr.bf16.mxu1 %v11930_v30 }
0x2332   :  { %11142 = vmatpush3.bf16.msra.mxu0 %v11931_v6  ;;  %11164 = vmatpush3.bf16.msra.mxu1 %v11932_v4  ;;  %v11939_v4 = vld [vmem:[%s14362_s15 + $0x530] sm:$0xff]  }
0x2333   :  { %11171 = vmatprep.subr.bf16.mxu0 %v11933_v18  ;;  %11193 = vmatprep.subr.bf16.mxu1 %v11934_v7  ;;  %v11940_v18 = vld [vmem:[%s14362_s15 + $0x5b0] sm:$0xff]   ;;  %v11941_v7 = vld [vmem:[%s14362_s15 + $0x568] sm:$0xff]  }
0x23bd   :  { %v8042_v9 = vpop.f32.mrf.mxu0  ;;  %v8085_v13 = vpop.f32.mrf.mxu1 }
0x23be   :  { %v8043_v40 = vadd.f32 %v8042_v9, %v7768_v17  ;;  %v8086_v43 = vadd.f32 %v8085_v13, %v7776_v21 }
0x23bf   :  { %v8044_v28 = vpop.f32.mrf.mxu0  ;;  %v8087_v29 = vpop.f32.mrf.mxu1 }
0x23c0   :  { %v8045_v35 = vadd.f32 %v8044_v28, %v7772_v15  ;;  %v8088_v46 = vadd.f32 %v8087_v29, %v7780_v41  ;;  %v8352_v53 = vmax.f32 %v8043_v40, 0.0  ;;  %v8354_v12 = vmax.f32 %v8086_v43, 0.0  ;;  %v11943_v29 = vld [vmem:[%s14362_s15 + $0x528] sm:$0xff]   ;;  %v11948_v40 = vld [vmem:[%s14362_s15 + $0x5a0] sm:$0xff]   ;;  %v11949_v43 = vld [vmem:[%s14362_s15 + $0x558] sm:$0xff]  }
0x23c1   :  { %v8046_v34 = vpop.f32.mrf.mxu0  ;;  %v8089_v24 = vpop.f32.mrf.mxu1 }
0x23c2   :  { %v8047_v37 = vadd.f32 %v8046_v34, %v7768_v17  ;;  %v8090_v38 = vadd.f32 %v8089_v24, %v7776_v21  ;;  %v8353_v23 = vmax.f32 %v8045_v35, 0.0  ;;  %v8355_v33 = vmax.f32 %v8088_v46, 0.0  ;;  %v11942_v17 = vld [vmem:[%s14362_s15 + $0x5e8] sm:$0xff]   ;;  %v11945_v24 = vld [vmem:[%s14362_s15 + $0x560] sm:$0xff]  }
0x23c3   :  { %v8048_v49 = vpop.f32.mrf.mxu0  ;;  %v8091_v47 = vpop.f32.mrf.mxu1  ;;  %v11944_v34 = vld [vmem:[%s14362_s15 + $0x5a8] sm:$0xff]   ;;  %v11946_v35 = vld [vmem:[%s14362_s15 + $0x5e0] sm:$0xff]  }
0x23c4   :  { %v8049_v31 = vadd.f32 %v8048_v49, %v7772_v15  ;;  %v8092_v48 = vadd.f32 %v8091_v47, %v7780_v41  ;;  %v8368_v50 = vmax.f32 %v8047_v37, 0.0  ;;  %v8370_v5 = vmax.f32 %v8090_v38, 0.0  ;;  %v11947_v37 = vld [vmem:[%s14362_s15 + $0x520] sm:$0xff]   ;;  %v11950_v49 = vld [vmem:[%s14362_s15 + $0x5d8] sm:$0xff]  }
0x23c5   :  { %v13980_v27 = vpop.f32.mrf.mxu0  ;;  %v13982_v32 = vpop.f32.mrf.mxu1 }
0x23c6   :  { %v8369_v51 = vmax.f32 %v8049_v31, 0.0  ;;  %v8371_v52 = vmax.f32 %v8092_v48, 0.0  ;;  %v8384_v59 = vpack.c.bf16 %v8368_v50, %v8352_v53  ;;  %v8386_v2 = vpack.c.bf16 %v8370_v5, %v8354_v12  ;;  %v11951_v31 = vld [vmem:[%s14362_s15 + $0x518] sm:$0xff]   ;;  %v11953_v5 = vld [vmem:[%s14362_s15 + $0x550] sm:$0xff]   ;;  %v11958_v53 = vld [vmem:[%s14362_s15 + $0x5c8] sm:$0xff]  }
0x23c7   :  { %v8130_v56 = vpop.f32.mrf.mxu0  ;;  %v8173_v57 = vpop.f32.mrf.mxu1  ;;  %v11952_v50 = vld [vmem:[%s14362_s15 + $0x598] sm:$0xff]   ;;  %v7784_v12 = vrot.slane %v13970_v8, %v13059_v10 }
0x23c8   :  { %v8385_v58 = vpack.c.bf16 %v8369_v51, %v8353_v23  ;;  %v8387_v60 = vpack.c.bf16 %v8371_v52, %v8355_v33  ;;  %v8131_v39 = vadd.f32 %v8130_v56, %v7788_v63  ;;  %v8174_v19 = vadd.f32 %v8173_v57, %v7796_v26  ;;  %v11955_v23 = vld [vmem:[%s14362_s15 + $0x510] sm:$0xff]   ;;  %v11957_v52 = vld [vmem:[%s14362_s15 + $0x548] sm:$0xff]   ;;  %v14079_v57 = vld [vmem:[%s14361_s14 + $0x18] sm:$0xff] }
0x23c9   :  { %v13994_v42 = vpop.f32.mrf.mxu0  ;;  %v13996_v22 = vpop.f32.mrf.mxu1  ;;  %v11956_v51 = vld [vmem:[%s14362_s15 + $0x590] sm:$0xff]   ;;  %v7792_v56 = vrot.slane %v13970_v8, %v13062_v11  ;;  %v11960_v8 = vld [vmem:[%s14362_s15 + $0x588] sm:$0xff]  }
0x23ca   :  { %9465 = vmatprep.mubr.bf16.mxu0 %v8385_v58  ;;  %9506 = vmatprep.mubr.bf16.mxu1 %v8387_v60  ;;  %v8357_v9 = vmax.f32 %v8131_v39, 0.0  ;;  %v8359_v13 = vmax.f32 %v8174_v19, 0.0  ;;  %v11959_v60 = vld [vmem:[%s14362_s15 + $0x508] sm:$0xff]  }
0x23cb   :  { %v8134_v25 = vpop.f32.mrf.mxu0  ;;  %v8177_v3 = vpop.f32.mrf.mxu1  ;;  %9466 = vmatmul.mubr.bf16.vlgmr.msra.gmra.mxu0 %v8384_v59  ;;  %9507 = vmatmul.mubr.bf16.vlgmr.msra.gmra.mxu1 %v8386_v2  ;;  %v11961_v2 = vld [vmem:[%s14362_s15 + $0x540] sm:$0xff]   ;;  %v8172_v19 = vadd.f32 %v13982_v32, %v7792_v56 }
0x23cc   :  { %v8135_v30 = vadd.f32 %v8134_v25, %v7788_v63  ;;  %v8178_v6 = vadd.f32 %v8177_v3, %v7796_v26  ;;  %11172 = vmatpush3.bf16.msra.mxu0 %v11935_v0  ;;  %11194 = vmatpush3.bf16.msra.mxu1 %v11936_v1  ;;  %v11954_v63 = vld [vmem:[%s14362_s15 + $0x5d0] sm:$0xff]   ;;  %v8133_v0 = vadd.f32 %v13994_v42, %v7784_v12  ;;  %v11963_v3 = vld [vmem:[%s14362_s15 + $0x500] sm:$0xff]  }
0x23cd   :  { %11173 = vmatprep.subr.bf16.mxu0 %v11937_v61  ;;  %11195 = vmatprep.subr.bf16.mxu1 %v11938_v36  ;;  %v14028_v46 = vpop.f32.mrf.mxu0  ;;  %v14033_v38 = vpop.f32.mrf.mxu1  ;;  %v7804_v1 = vrot.slane %v14079_v57, %v12952_v44  ;;  %v8176_v61 = vadd.f32 %v13996_v22, %v7792_v56  ;;  %v7812_v36 = vrot.slane %v14079_v57, %v12955_v45  ;;  %v11962_v44 = vld [vmem:[%s14362_s15 + $0x5c0] sm:$0xff]  }
0x23ce   :  { %v8373_v15 = vmax.f32 %v8135_v30, 0.0  ;;  %v8375_v41 = vmax.f32 %v8178_v6, 0.0  ;;  %v8129_v42 = vadd.f32 %v13980_v27, %v7784_v12  ;;  %v8372_v22 = vmax.f32 %v8133_v0, 0.0  ;;  %v11964_v45 = vld [vmem:[%s14362_s15 + $0x580] sm:$0xff]   ;;  %v11965_v27 = vld [vmem:[%s14362_s15 + $0x678] sm:$0xff]  }
0x23cf   :  { %v8216_v47 = vpop.f32.mrf.mxu0  ;;  %v8259_v48 = vpop.f32.mrf.mxu1  ;;  %v8374_v6 = vmax.f32 %v8176_v61, 0.0  ;;  %v11982_v12 = vld [vmem:[%s14362_s15 + $0x6d8] sm:$0xff]  }
0x23d0   :  { %v8389_v21 = vpack.c.bf16 %v8373_v15, %v8357_v9  ;;  %v8391_v28 = vpack.c.bf16 %v8375_v41, %v8359_v13  ;;  %11174 = vmatpush3.bf16.msra.mxu0 %v11939_v4  ;;  %11196 = vmatpush3.bf16.msra.mxu1 %v11940_v18  ;;  %v8217_v30 = vadd.f32 %v8216_v47, %v7804_v1  ;;  %v11966_v4 = vld [vmem:[%s14362_s15 + $0x6f8] sm:$0xff]   ;;  %v8356_v18 = vmax.f32 %v8129_v42, 0.0  ;;  %v11974_v47 = vld [vmem:[%s14362_s15 + $0x6e8] sm:$0xff]  }
0x23d1   :  { %11175 = vmatprep.subr.bf16.mxu0 %v11941_v7  ;;  %11197 = vmatprep.subr.bf16.mxu1 %v11942_v17  ;;  %v14056_v26 = vpop.f32.mrf.mxu0  ;;  %v14061_v33 = vpop.f32.mrf.mxu1  ;;  %v8260_v32 = vadd.f32 %v8259_v48, %v7812_v36  ;;  %v8358_v9 = vmax.f32 %v8172_v19, 0.0  ;;  %v11967_v15 = vld [vmem:[%s14362_s15 + $0x638] sm:$0xff]   ;;  %v11976_v48 = vld [vmem:[%s14362_s15 + $0x6a8] sm:$0xff]   ;;  %v7808_v19 = vrot.slane %v14079_v57, %v12961_v16  ;;  %v11993_v16 = vld [vmem:[%s14362_s15 + $0x640] sm:$0xff]  }
0x23d2   :  { %9547 = vmatprep.mubr.bf16.mxu0 %v8389_v21  ;;  %9588 = vmatprep.mubr.bf16.mxu1 %v8391_v28  ;;  %v8388_v41 = vpack.c.bf16 %v8372_v22, %v8356_v18  ;;  %v8361_v17 = vmax.f32 %v8217_v30, 0.0  ;;  %v11968_v21 = vld [vmem:[%s14362_s15 + $0x6b8] sm:$0xff]   ;;  %v11990_v42 = vld [vmem:[%s14362_s15 + $0x6c8] sm:$0xff]   ;;  %v7820_v30 = vrot.slane %v14079_v57, %v12977_v54  ;;  %v11994_v54 = vld [vmem:[%s14362_s15 + $0x6c0] sm:$0xff]  }
0x23d3   :  { %v8220_v58 = vpop.f32.mrf.mxu0  ;;  %v8263_v59 = vpop.f32.mrf.mxu1  ;;  %v8390_v28 = vpack.c.bf16 %v8374_v6, %v8358_v9  ;;  %v11984_v0 = vld [vmem:[%s14362_s15 + $0x698] sm:$0xff]   ;;  %v7828_v6 = vrot.slane %v14079_v57, %v12980_v55  ;;  %v11996_v55 = vld [vmem:[%s14362_s15 + $0x680] sm:$0xff]  }
0x23d4   :  { %11176 = vmatpush3.bf16.msra.mxu0 %v11943_v29  ;;  %11198 = vmatpush3.bf16.msra.mxu1 %v11944_v34  ;;  %v8221_v39 = vadd.f32 %v8220_v58, %v7804_v1  ;;  %v8264_v25 = vadd.f32 %v8263_v59, %v7812_v36  ;;  %v8363_v29 = vmax.f32 %v8260_v32, 0.0  ;;  %v11969_v34 = vld [vmem:[%s14362_s15 + $0x670] sm:$0xff]   ;;  %v11983_v58 = vld [vmem:[%s14362_s15 + $0x618] sm:$0xff]  }
0x23d5   :  { %11177 = vmatprep.subr.bf16.mxu0 %v11945_v24  ;;  %11199 = vmatprep.subr.bf16.mxu1 %v11946_v35  ;;  %v11970_v35 = vld [vmem:[%s14362_s15 + $0x6f0] sm:$0xff]  }
0x23d6   :  { %v8377_v7 = vmax.f32 %v8221_v39, 0.0  ;;  %v8379_v13 = vmax.f32 %v8264_v25, 0.0  ;;  %v11985_v1 = vld [vmem:[%s14362_s15 + $0x650] sm:$0xff]   ;;  %v7800_v39 = vrot.slane %v14079_v57, %v12958_v20  ;;  %v11992_v20 = vld [vmem:[%s14362_s15 + $0x688] sm:$0xff]  }
0x23d7   :  { %v11986_v59 = vld [vmem:[%s14362_s15 + $0x6d0] sm:$0xff]  }
0x23d8   :  { %11178 = vmatpush3.bf16.msra.mxu0 %v11947_v37  ;;  %11200 = vmatpush3.bf16.msra.mxu1 %v11948_v40  ;;  %v8393_v24 = vpack.c.bf16 %v8377_v7, %v8361_v17  ;;  %v8395_v37 = vpack.c.bf16 %v8379_v13, %v8363_v29  ;;  %v11971_v40 = vld [vmem:[%s14362_s15 + $0x630] sm:$0xff]   ;;  %v8219_v22 = vadd.f32 %v14056_v26, %v7800_v39  ;;  %v11995_v7 = vld [vmem:[%s14362_s15 + $0x600] sm:$0xff]   ;;  %v11999_v29 = vld [vmem:[%s14362_s15 + $0x738] sm:$0xff]  }
0x23d9   :  { %11179 = vmatprep.subr.bf16.mxu0 %v11949_v43  ;;  %11201 = vmatprep.subr.bf16.mxu1 %v11950_v49  ;;  %v11972_v43 = vld [vmem:[%s14362_s15 + $0x6b0] sm:$0xff]   ;;  %v11973_v49 = vld [vmem:[%s14362_s15 + $0x668] sm:$0xff]   ;;  %v8215_v26 = vadd.f32 %v14028_v46, %v7800_v39  ;;  %v11997_v46 = vld [vmem:[%s14362_s15 + $0x778] sm:$0xff]  }
0x23da   :  { %v11988_v36 = vld [vmem:[%s14362_s15 + $0x690] sm:$0xff]  }
0x23db   :  { %v12020_v39 = vld [vmem:[%s14362_s15 + $0x790] sm:$0xff]  }
0x23dc   :  { %11180 = vmatpush3.bf16.msra.mxu0 %v11951_v31  ;;  %11202 = vmatpush3.bf16.msra.mxu1 %v11952_v50  ;;  %v11975_v31 = vld [vmem:[%s14362_s15 + $0x628] sm:$0xff]   ;;  %v11977_v50 = vld [vmem:[%s14362_s15 + $0x660] sm:$0xff]  }
0x23dd   :  { %11181 = vmatprep.subr.bf16.mxu0 %v11953_v5  ;;  %11203 = vmatprep.subr.bf16.mxu1 %v11954_v63  ;;  %v11978_v5 = vld [vmem:[%s14362_s15 + $0x6e0] sm:$0xff]   ;;  %v14149_v63 = vpop.f32.mrf.mxu0 }
0x23df   :  { %v8302_v56 = vpop.f32.mrf.mxu0 }
0x23e0   :  { %11182 = vmatpush3.bf16.msra.mxu0 %v11955_v23  ;;  %11204 = vmatpush3.bf16.msra.mxu1 %v11956_v51  ;;  %v11979_v23 = vld [vmem:[%s14362_s15 + $0x620] sm:$0xff]   ;;  %v14154_v51 = vpop.f32.mrf.mxu1  ;;  %v8303_v9 = vadd.f32 %v8302_v56, %v7820_v30 }
0x23e1   :  { %11183 = vmatprep.subr.bf16.mxu0 %v11957_v52  ;;  %11205 = vmatprep.subr.bf16.mxu1 %v11958_v53  ;;  %v11980_v52 = vld [vmem:[%s14362_s15 + $0x6a0] sm:$0xff]   ;;  %v11981_v53 = vld [vmem:[%s14362_s15 + $0x658] sm:$0xff]  }
0x23e2   :  { %v12010_v56 = vld [vmem:[%s14362_s15 + $0x7e0] sm:$0xff]  }
0x23e4   :  { %11184 = vmatpush3.bf16.msra.mxu0 %v11959_v60  ;;  %11206 = vmatpush3.bf16.msra.mxu1 %v11960_v8  ;;  %v8345_v60 = vpop.f32.mrf.mxu1  ;;  %v14177_v8 = vpop.f32.mrf.mxu0 }
0x23e5   :  { %11185 = vmatprep.subr.bf16.mxu0 %v11961_v2  ;;  %11207 = vmatprep.subr.bf16.mxu1 %v11962_v44  ;;  %v11987_v2 = vld [vmem:[%s14362_s15 + $0x610] sm:$0xff]   ;;  %v11989_v44 = vld [vmem:[%s14362_s15 + $0x648] sm:$0xff]  }
0x23e6   :  { %v14182_v61 = vpop.f32.mrf.mxu1  ;;  %v8306_v25 = vpop.f32.mrf.mxu0 }
0x23e7   :  { %v8307_v32 = vadd.f32 %v8306_v25, %v7820_v30  ;;  %v12022_v25 = vld [vmem:[%s14362_s15 + $0x7c8] sm:$0xff]  }
0x23e8   :  { %11186 = vmatpush3.bf16.msra.mxu0 %v11963_v3  ;;  %11208 = vmatpush3.bf16.msra.mxu1 %v11964_v45  ;;  %v11991_v3 = vld [vmem:[%s14362_s15 + $0x608] sm:$0xff]   ;;  %v8349_v45 = vpop.f32.mrf.mxu1 }
0x23e9   :  { %11215 = vmatprep.subr.bf16.mxu0 %v11965_v27  ;;  %11237 = vmatprep.subr.bf16.mxu1 %v11966_v4  ;;  %v8262_v27 = vadd.f32 %v14061_v33, %v7808_v19  ;;  %v8258_v4 = vadd.f32 %v14033_v38, %v7808_v19  ;;  %v8350_v18 = vadd.f32 %v8349_v45, %v7828_v6  ;;  %v8376_v33 = vmax.f32 %v8219_v22, 0.0  ;;  %v12021_v19 = vld [vmem:[%s14362_s15 + $0x748] sm:$0xff]  }
0x23ea   :  { %v8346_v38 = vadd.f32 %v8345_v60, %v7828_v6  ;;  %v8381_v17 = vmax.f32 %v8307_v32, 0.0  ;;  %v12012_v60 = vld [vmem:[%s14362_s15 + $0x7a0] sm:$0xff]   ;;  %v7824_v22 = vrot.slane %v14079_v57, %v13062_v11  ;;  %v12023_v30 = vld [vmem:[%s14362_s15 + $0x708] sm:$0xff]  }
0x23eb   :  { %9548 = vmatmul.mubr.bf16.vlgmr.msra.gmra.mxu0 %v8388_v41  ;;  %9589 = vmatmul.mubr.bf16.vlgmr.msra.gmra.mxu1 %v8390_v28  ;;  %v8378_v13 = vmax.f32 %v8262_v27, 0.0  ;;  %v8360_v41 = vmax.f32 %v8215_v26, 0.0  ;;  %v8383_v28 = vmax.f32 %v8350_v18, 0.0  ;;  %v12026_v11 = vld [vmem:[%s14362_s15 + $0x7c0] sm:$0xff]  }
0x23ec   :  { %11216 = vmatpush3.bf16.msra.mxu0 %v11967_v15  ;;  %9629 = vmatprep.mubr.bf16.mxu0 %v8393_v24  ;;  %v11998_v15 = vld [vmem:[%s14362_s15 + $0x7f8] sm:$0xff]   ;;  %v8365_v24 = vmax.f32 %v8303_v9, 0.0  ;;  %v12027_v27 = vld [vmem:[%s14362_s15 + $0x700] sm:$0xff]  }
0x23ed   :  { %11238 = vmatpush3.bf16.msra.mxu1 %v11968_v21  ;;  %9670 = vmatprep.mubr.bf16.mxu1 %v8395_v37  ;;  %v8362_v21 = vmax.f32 %v8258_v4, 0.0 }
0x23ee   :  { %11217 = vmatprep.subr.bf16.mxu0 %v11969_v34  ;;  %11239 = vmatprep.subr.bf16.mxu1 %v11970_v35  ;;  %v8392_v34 = vpack.c.bf16 %v8376_v33, %v8360_v41  ;;  %v12000_v35 = vld [vmem:[%s14362_s15 + $0x7b8] sm:$0xff]  }
0x23ef   :  { %v8394_v37 = vpack.c.bf16 %v8378_v13, %v8362_v21 }
0x23f0   :  { %11218 = vmatpush3.bf16.msra.mxu0 %v11971_v40  ;;  %v8367_v40 = vmax.f32 %v8346_v38, 0.0 }
0x23f1   :  { %11240 = vmatpush3.bf16.msra.mxu1 %v11972_v43  ;;  %11219 = vmatprep.subr.bf16.mxu0 %v11973_v49  ;;  %v12001_v43 = vld [vmem:[%s14362_s15 + $0x770] sm:$0xff]   ;;  %v8397_v49 = vpack.c.bf16 %v8381_v17, %v8365_v24  ;;  %v10586_v24 = vld [vmem:[%s14363_s16 + $0x1] ss:$0 sm:$0xff] }
0x23f2   :  { %11241 = vmatprep.subr.bf16.mxu1 %v11974_v47  ;;  %v12002_v47 = vld [vmem:[%s14362_s15 + $0x7f0] sm:$0xff]  }
0x23f4   :  { %11220 = vmatpush3.bf16.msra.mxu0 %v11975_v31  ;;  %v8399_v31 = vpack.c.bf16 %v8383_v28, %v8367_v40 }
0x23f5   :  { %11242 = vmatpush3.bf16.msra.mxu1 %v11976_v48  ;;  %11221 = vmatprep.subr.bf16.mxu0 %v11977_v50  ;;  %v12003_v48 = vld [vmem:[%s14362_s15 + $0x730] sm:$0xff]  }
0x23f6   :  { %11243 = vmatprep.subr.bf16.mxu1 %v11978_v5  ;;  %v12004_v50 = vld [vmem:[%s14362_s15 + $0x7b0] sm:$0xff]   ;;  %v12005_v5 = vld [vmem:[%s14362_s15 + $0x768] sm:$0xff]  }
0x23f8   :  { %11222 = vmatpush3.bf16.msra.mxu0 %v11979_v23  ;;  %v12006_v23 = vld [vmem:[%s14362_s15 + $0x7e8] sm:$0xff]  }
0x23f9   :  { %11244 = vmatpush3.bf16.msra.mxu1 %v11980_v52  ;;  %11223 = vmatprep.subr.bf16.mxu0 %v11981_v53  ;;  %v12007_v52 = vld [vmem:[%s14362_s15 + $0x728] sm:$0xff]  }
0x23fa   :  { %11245 = vmatprep.subr.bf16.mxu1 %v11982_v12  ;;  %v12008_v53 = vld [vmem:[%s14362_s15 + $0x7a8] sm:$0xff]   ;;  %v12009_v12 = vld [vmem:[%s14362_s15 + $0x760] sm:$0xff]  }
0x23fc   :  { %11224 = vmatpush3.bf16.msra.mxu0 %v11983_v58  ;;  %v12011_v58 = vld [vmem:[%s14362_s15 + $0x720] sm:$0xff]  }
0x23fd   :  { %11246 = vmatpush3.bf16.msra.mxu1 %v11984_v0  ;;  %11225 = vmatprep.subr.bf16.mxu0 %v11985_v1  ;;  %v12013_v0 = vld [vmem:[%s14362_s15 + $0x758] sm:$0xff]  }
0x23fe   :  { %11247 = vmatprep.subr.bf16.mxu1 %v11986_v59  ;;  %v12014_v1 = vld [vmem:[%s14362_s15 + $0x7d8] sm:$0xff]  }
0x23ff   :  { %v12015_v59 = vld [vmem:[%s14362_s15 + $0x718] sm:$0xff]  }
0x2400   :  { %11226 = vmatpush3.bf16.msra.mxu0 %v11987_v2  ;;  %v12016_v2 = vld [vmem:[%s14362_s15 + $0x798] sm:$0xff]  }
0x2401   :  { %11248 = vmatpush3.bf16.msra.mxu1 %v11988_v36  ;;  %11227 = vmatprep.subr.bf16.mxu0 %v11989_v44  ;;  %v12017_v36 = vld [vmem:[%s14362_s15 + $0x750] sm:$0xff]  }
0x2402   :  { %11249 = vmatprep.subr.bf16.mxu1 %v11990_v42  ;;  %v12018_v44 = vld [vmem:[%s14362_s15 + $0x7d0] sm:$0xff]  }
0x2403   :  { %v12019_v42 = vld [vmem:[%s14362_s15 + $0x710] sm:$0xff]  }
0x2404   :  { %11228 = vmatpush3.bf16.msra.mxu0 %v11991_v3  ;;  %v7816_v3 = vrot.slane %v14079_v57, %v13059_v10  ;;  %v12025_v10 = vld [vmem:[%s14362_s15 + $0x740] sm:$0xff]  }
0x2405   :  { %11250 = vmatpush3.bf16.msra.mxu1 %v11992_v20  ;;  %11229 = vmatprep.subr.bf16.mxu0 %v11993_v16  ;;  %v12024_v20 = vld [vmem:[%s14362_s15 + $0x788] sm:$0xff]   ;;  %v8348_v16 = vadd.f32 %v14182_v61, %v7824_v22  ;;  %v12028_v61 = vld [vmem:[%s14362_s15 + $0x780] sm:$0xff]  }
0x2406   :  { %11251 = vmatprep.subr.bf16.mxu1 %v11994_v54  ;;  %v8305_v45 = vadd.f32 %v14177_v8, %v7816_v3  ;;  %v8301_v57 = vadd.f32 %v14149_v63, %v7816_v3  ;;  %v8344_v8 = vadd.f32 %v14154_v51, %v7824_v22 }
0x2407   :  { %v8382_v54 = vmax.f32 %v8348_v16, 0.0 }
0x2408   :  { %11230 = vmatpush3.bf16.msra.mxu0 %v11995_v7  ;;  %v8380_v6 = vmax.f32 %v8305_v45, 0.0  ;;  %v8364_v26 = vmax.f32 %v8301_v57, 0.0  ;;  %v8366_v32 = vmax.f32 %v8344_v8, 0.0 }
0x2409   :  { %11252 = vmatpush3.bf16.msra.mxu1 %v11996_v55  ;;  %11259 = vmatprep.subr.bf16.mxu0 %v11997_v46 }
0x240a   :  { %11281 = vmatprep.subr.bf16.mxu1 %v11998_v15  ;;  %v8396_v63 = vpack.c.bf16 %v8380_v6, %v8364_v26  ;;  %v8398_v51 = vpack.c.bf16 %v8382_v54, %v8366_v32 }
0x240b   :  { %9630 = vmatmul.mubr.bf16.vlgmr.msra.gmra.mxu0 %v8392_v34 }
0x240c   :  { %9671 = vmatmul.mubr.bf16.vlgmr.msra.gmra.mxu1 %v8394_v37  ;;  %11260 = vmatpush3.bf16.msra.mxu0 %v11999_v29 }
0x240d   :  { %9711 = vmatprep.mubr.bf16.mxu0 %v8397_v49  ;;  %11282 = vmatpush3.bf16.msra.mxu1 %v12000_v35 }
0x240e   :  { %9752 = vmatprep.mubr.bf16.mxu1 %v8399_v31  ;;  %11261 = vmatprep.subr.bf16.mxu0 %v12001_v43 }
0x240f   :  { %11283 = vmatprep.subr.bf16.mxu1 %v12002_v47 }
0x2410   :  { %11262 = vmatpush3.bf16.msra.mxu0 %v12003_v48 }
0x2411   :  { %11284 = vmatpush3.bf16.msra.mxu1 %v12004_v50  ;;  %11263 = vmatprep.subr.bf16.mxu0 %v12005_v5 }
0x2412   :  { %11285 = vmatprep.subr.bf16.mxu1 %v12006_v23 }
0x2414   :  { %11264 = vmatpush3.bf16.msra.mxu0 %v12007_v52 }
0x2415   :  { %11286 = vmatpush3.bf16.msra.mxu1 %v12008_v53  ;;  %11265 = vmatprep.subr.bf16.mxu0 %v12009_v12 }
0x2416   :  { %11287 = vmatprep.subr.bf16.mxu1 %v12010_v56 }
0x2418   :  { %11266 = vmatpush3.bf16.msra.mxu0 %v12011_v58 }
0x2419   :  { %11288 = vmatpush3.bf16.msra.mxu1 %v12012_v60  ;;  %11267 = vmatprep.subr.bf16.mxu0 %v12013_v0 }
0x241a   :  { %11289 = vmatprep.subr.bf16.mxu1 %v12014_v1 }
0x241c   :  { %11268 = vmatpush3.bf16.msra.mxu0 %v12015_v59 }
0x241d   :  { %11290 = vmatpush3.bf16.msra.mxu1 %v12016_v2  ;;  %11269 = vmatprep.subr.bf16.mxu0 %v12017_v36 }
0x241e   :  { %11291 = vmatprep.subr.bf16.mxu1 %v12018_v44 }
0x2420   :  { %11270 = vmatpush3.bf16.msra.mxu0 %v12019_v42 }
0x2421   :  { %11292 = vmatpush3.bf16.msra.mxu1 %v12020_v39  ;;  %11271 = vmatprep.subr.bf16.mxu0 %v12021_v19 }
0x2422   :  { %11293 = vmatprep.subr.bf16.mxu1 %v12022_v25 }
0x2424   :  { %11272 = vmatpush3.bf16.msra.mxu0 %v12023_v30 }
0x2425   :  { %11294 = vmatpush3.bf16.msra.mxu1 %v12024_v20  ;;  %11273 = vmatprep.subr.bf16.mxu0 %v12025_v10 }
0x2426   :  { %11295 = vmatprep.subr.bf16.mxu1 %v12026_v11 }
0x2428   :  { %11274 = vmatpush3.bf16.msra.mxu0 %v12027_v27 }
0x2429   :  { %11296 = vmatpush3.bf16.msra.mxu1 %v12028_v61 }
0x242b   :  { %9712 = vmatmul.mubr.bf16.vlgmr.msra.gmra.mxu0 %v8396_v63 }
0x242c   :  { %9753 = vmatmul.mubr.bf16.vlgmr.msra.gmra.mxu1 %v8398_v51 }
0x248b   :  { %v11143_v4 = vpop.f32.mrf.mxu0  ;;  %v11165_v18 = vpop.f32.mrf.mxu1 }
0x248d   :  { %v11144_v7 = vpop.f32.mrf.mxu0  ;;  %v11166_v33 = vpop.f32.mrf.mxu1 }
0x248e   :  { %v11145_v34 = vadd.f32 %v11144_v7, %v11143_v4  ;;  %v11167_v31 = vadd.f32 %v11166_v33, %v11165_v18 }
0x248f   :  { %v11146_v9 = vpop.f32.mrf.mxu0  ;;  %v11168_v55 = vpop.f32.mrf.mxu1 }
0x2490   :  { %v9468_v40 = vadd.f32 %v11145_v34, %v10586_v24 }
0x2491   :  { %v11147_v46 = vpop.f32.mrf.mxu0  ;;  %v11169_v38 = vpop.f32.mrf.mxu1 }
0x2492   :  { %v11148_v43 = vadd.f32 %v11147_v46, %v11146_v9  ;;  %v9509_v50 = vadd.f32 %v11167_v31, %v9468_v40  ;;  %v11170_v53 = vadd.f32 %v11169_v38, %v11168_v55 }
0x2494   :  { %v9471_v5 = vadd.f32 %v11148_v43, %v10586_v24 }
0x2496   :  { %v9512_v58 = vadd.f32 %v11170_v53, %v9471_v5 }
0x24ab   :  { %v11187_v13 = vpop.f32.mrf.mxu0  ;;  %v11209_v15 = vpop.f32.mrf.mxu1 }
0x24ad   :  { %v11188_v41 = vpop.f32.mrf.mxu0  ;;  %v11210_v17 = vpop.f32.mrf.mxu1 }
0x24ae   :  { %v11189_v48 = vadd.f32 %v11188_v41, %v11187_v13  ;;  %v11211_v60 = vadd.f32 %v11210_v17, %v11209_v15 }
0x24af   :  { %v11190_v21 = vpop.f32.mrf.mxu0  ;;  %v11212_v28 = vpop.f32.mrf.mxu1 }
0x24b0   :  { %v9550_v12 = vadd.f32 %v11189_v48, %v9509_v50  ;;  %v10718_v48 = vld [vmem:[%s14365_s18 + $0x1] ss:$0 sm:$0xff] }
0x24b1   :  { %v11191_v29 = vpop.f32.mrf.mxu0  ;;  %v11213_v37 = vpop.f32.mrf.mxu1 }
0x24b2   :  { %v11192_v56 = vadd.f32 %v11191_v29, %v11190_v21  ;;  %v9591_v2 = vadd.f32 %v11211_v60, %v9550_v12  ;;  %v11214_v44 = vadd.f32 %v11213_v37, %v11212_v28 }
0x24b4   :  { %v9553_v36 = vadd.f32 %v11192_v56, %v9512_v58 }
0x24b6   :  { %v9594_v3 = vadd.f32 %v11214_v44, %v9553_v36 }
0x24cb   :  { %v11231_v35 = vpop.f32.mrf.mxu0 }
0x24cc   :  { %v11253_v49 = vpop.f32.mrf.mxu1 }
0x24cd   :  { %v11232_v47 = vpop.f32.mrf.mxu0 }
0x24ce   :  { %v11254_v23 = vpop.f32.mrf.mxu1  ;;  %v11233_v0 = vadd.f32 %v11232_v47, %v11231_v35  ;;  %v10717_v47 = vld [vmem:[%s14364_s17 + $0x1] ss:$0 sm:$0xff] }
0x24cf   :  { %v11234_v52 = vpop.f32.mrf.mxu0  ;;  %v11255_v22 = vadd.f32 %v11254_v23, %v11253_v49 }
0x24d0   :  { %v11256_v1 = vpop.f32.mrf.mxu1  ;;  %v9632_v42 = vadd.f32 %v11233_v0, %v9591_v2 }
0x24d1   :  { %v11235_v59 = vpop.f32.mrf.mxu0 }
0x24d2   :  { %v11236_v39 = vadd.f32 %v11235_v59, %v11234_v52  ;;  %v11257_v19 = vpop.f32.mrf.mxu1  ;;  %v9673_v20 = vadd.f32 %v11255_v22, %v9632_v42 }
0x24d3   :  { %v11258_v8 = vadd.f32 %v11257_v19, %v11256_v1 }
0x24d4   :  { %v9635_v10 = vadd.f32 %v11236_v39, %v9594_v3 }
0x24d6   :  { %v9676_v26 = vadd.f32 %v11258_v8, %v9635_v10 }
0x24eb   :  { %v11275_v25 = vpop.f32.mrf.mxu0 }
0x24ec   :  { %v11297_v30 = vpop.f32.mrf.mxu1 }
0x24ed   :  { %v11276_v45 = vpop.f32.mrf.mxu0 }
0x24ee   :  { %v11277_v16 = vadd.f32 %v11276_v45, %v11275_v25  ;;  %v11298_v11 = vpop.f32.mrf.mxu1 }
0x24ef   :  { %v11278_v57 = vpop.f32.mrf.mxu0  ;;  %v11299_v6 = vadd.f32 %v11298_v11, %v11297_v30 }
0x24f0   :  { %v9714_v27 = vadd.f32 %v11277_v16, %v9673_v20  ;;  %v11300_v61 = vpop.f32.mrf.mxu1 }
0x24f1   :  { %v11279_v54 = vpop.f32.mrf.mxu0 }
0x24f2   :  { %v9755_v32 = vadd.f32 %v11299_v6, %v9714_v27  ;;  %v11280_v63 = vadd.f32 %v11279_v54, %v11278_v57  ;;  %v11301_v51 = vpop.f32.mrf.mxu1 }
0x24f3   :  { %v11302_v18 = vadd.f32 %v11301_v51, %v11300_v61 }
0x24f4   :  { %v9717_v4 = vadd.f32 %v11280_v63, %v9676_v26  ;;  %v9761_v7 = vadd.f32 %v9755_v32, %v13789_v14 }
0x24f6   :  { %v9758_v33 = vadd.f32 %v11302_v18, %v9717_v4  ;;  %v9767_v9 = vsel %vm80_vm0, %v9761_v7, 0.0 }
0x24f7   :  { %9768 = vadd.xlane.f32.xlu0 %v9767_v9 }
0x24f8   :  { %v9762_v55 = vadd.f32 %v9758_v33, %v13787_v62 }
0x24fa   :  { %v9770_v46 = vsel %vm80_vm0, %v9762_v55, 0.0 }
0x24fb   :  { %9771 = vadd.xlane.f32.xlu1 %v9770_v46 }
0x2580   :  { %v9769_v13 = vpop.xlane.xlu0 %9768 }
0x2581   :  { %v9773_v38 = vmul.f32 0.03125, %v9769_v13 }
0x2583   :  { %v9775_v15 = vsub.f32 %v9761_v7, %v9773_v38 }
0x2584   :  { %v9772_v41 = vpop.xlane.xlu1 %9771 }
0x2585   :  { %v9774_v17 = vmul.f32 0.03125, %v9772_v41  ;;  %v9777_v21 = vmul.f32 %v9775_v15, %v9775_v15 }
0x2587   :  { %v9776_v28 = vsub.f32 %v9762_v55, %v9774_v17  ;;  %v9779_v29 = vsel %vm80_vm0, %v9777_v21, 0.0 }
0x2588   :  { %9780 = vadd.xlane.f32.xlu0 %v9779_v29 }
0x2589   :  { %v9778_v14 = vmul.f32 %v9776_v28, %v9776_v28 }
0x258b   :  { %v9782_v34 = vsel %vm80_vm0, %v9778_v14, 0.0 }
0x258c   :  { %9783 = vadd.xlane.f32.xlu1 %v9782_v34 }
0x2611   :  { %v9781_v24 = vpop.xlane.xlu0 %9780 }
0x2612   :  { %v9785_v35 = vmul.f32 0.03125, %v9781_v24 }
0x2614   :  { %v9787_v62 = vadd.f32 1e-05, %v9785_v35 }
0x2615   :  { %v9784_v37 = vpop.xlane.xlu1 %9783 }
0x2616   :  { %12113 = vrsqrt.f32 %v9787_v62  ;;  %v9786_v40 = vmul.f32 0.03125, %v9784_v37 }
0x2618   :  { %v9788_v43 = vadd.f32 1e-05, %v9786_v40 }
0x261a   :  { %12115 = vrsqrt.f32 %v9788_v43 }
0x2623   :  { %v12114_v49 = vpop.eup %12113 }
0x2624   :  { %v9791_v31 = vmul.f32 %v12114_v49, %v9775_v15 }
0x2626   :  { %v9799_v50 = vmul.f32 %v10717_v47, %v9791_v31 }
0x2627   :  { %v12116_v5 = vpop.eup %12115 }
0x2628   :  { %v9792_v23 = vmul.f32 %v12116_v5, %v9776_v28  ;;  %v9807_v52 = vadd.f32 %v10718_v48, %v9799_v50 }
0x262a   :  { %v9800_v53 = vmul.f32 %v10717_v47, %v9792_v23  ;;  %9809 = vst.msk [vmem:[#allocation2] sm:$0xff] %vm80_vm0, %v9807_v52 }
0x262c   :  { %v9808_v12 = vadd.f32 %v10718_v48, %v9800_v53 }
0x262e   :  { %9810 = vst.msk [vmem:[#allocation2 + $0x8] sm:$0xff] %vm80_vm0, %v9808_v12 }
0x262f   :  { %12128 = shalt.err (!%p12125_p4)
}
0x2630   :  { %s12143_s17 = smov 128   ;;  %s12144_s18 = smov 8  }
0x2631   :  { %9822 = dma.vmem_to_hbm [thread:$0]  %s9817_s21, 256, %s14366_s19, [#allocation3], %s12143_s17, %s12143_s17, %s12144_s18  }
0x2632   :  { %12137 = dma.done.wait [#allocation3], 256  }
0x2633   :  { %12138 = vsyncadd [#allocation3], 4294967040 }
0x2634   :  { %9826 = vsyncpa [#allocation3], 1 }

</bundles_post_ra>
